<compile_context>
chip_gen: v6e
topology: v6e:2x2x1
jax: 0.10.0
libtpu: 0.0.40
codegen_flags: <defaults>
</compile_context>

<pallas_src>
import math
from functools import partial

import jax
import jax.numpy as jnp
from jax.experimental import pallas as pl
from jax.experimental.pallas import tpu as pltpu


def _round_up(x, m):
    return ((x + m - 1) // m) * m


def _cdiv(a, b):
    return (a + b - 1) // b


# ----------------------------------------------------------------------------
# Pallas kernel 1: direct conv on a flattened, lane-major spatial axis.
#
#   xm_ref : (NB, C, TILE)         main lane tile of the padded flat input
#   xh_ref : (NB, C, HALO)         halo (the next HALO lanes of the same array)
#   w_ref  : (O, kh*kw*C)          resident weight (constant index_map)
#   o_ref  : (NB, O, TILE)         dense conv output tile (cropped in JAX)
#
# For each packed image, the kh*kw shifted slabs are stacked into a
# (kh*kw*C, TILE) im2col slab in VMEM and contracted in ONE MXU dot.
# ----------------------------------------------------------------------------
def _conv_kernel(xm_ref, xh_ref, w_ref, o_ref, *, taps, tile, nb):
    wv = w_ref[...]                                        # (O, kh*kw*C)
    for b in range(nb):                                    # static unroll
        ext = jnp.concatenate([xm_ref[b], xh_ref[b]], axis=1)   # (C, TILE+HALO)
        cols = jnp.concatenate([ext[:, off:off + tile] for off in taps], axis=0)
        o_ref[b] = jnp.dot(wv, cols, preferred_element_type=jnp.float32)


def conv2d_pallas(x, w, stride=(1, 1), padding=(0, 1 - 1), dilation=(1, 1),
                  tile_target=2048):
    """2-D conv, NCHW in / NCHW out, bias-free (matches F.conv2d)."""
    N, C, H, W = x.shape
    O, C2, kh, kw = w.shape
    assert C == C2
    sh, sw = stride
    ph, pw = padding
    dh, dw = dilation

    if ph or pw:
        x = jnp.pad(x, ((0, 0), (0, 0), (ph, ph), (pw, pw)))
    Hp, Wp = H + 2 * ph, W + 2 * pw
    ekh = dh * (kh - 1) + 1
    ekw = dw * (kw - 1) + 1
    OH = (Hp - ekh) // sh + 1
    OW = (Wp - ekw) // sw + 1
    assert OH > 0 and OW > 0

    taps = tuple(i * dh * Wp + j * dw for i in range(kh) for j in range(kw))
    max_off = taps[-1]
    HALO = _round_up(max(max_off, 1), 128)          # 128-aligned halo block
    L_valid = Hp * Wp                               # dense positions we keep
    TILE = _round_up(min(tile_target, _round_up(L_valid, 128)), HALO)
    nt = _cdiv(L_valid, TILE)
    L_pad = nt * TILE + HALO                        # padded flat length / image
    NB = 2 if N % 2 == 0 else 1                     # pack 2 images -> 8 sublanes

    xf = x.reshape(N, C, Hp * Wp)
    xf = jnp.pad(xf, ((0, 0), (0, 0), (0, L_pad - Hp * Wp)))
    KC = kh * kw * C
    # weight as (O, kh*kw*C), row order matches the im2col slab (tap-major)
    wt = jnp.transpose(w, (0, 2, 3, 1)).reshape(O, KC)

    halo_step = TILE // HALO                        # exact by construction
    kern = partial(_conv_kernel, taps=taps, tile=TILE, nb=NB)
    flops = int(2 * N * O * KC * nt * TILE)
    bytes_acc = int(4 * (N * C * nt * (TILE + HALO) + O * KC + N * O * nt * TILE))

    out_flat = pl.pallas_call(
        kern,
        out_shape=jax.ShapeDtypeStruct((N, O, nt * TILE), jnp.float32),
        grid=(N // NB, nt),
        in_specs=[
            pl.BlockSpec((NB, C, TILE), lambda n, l: (n, 0, l)),
            pl.BlockSpec((NB, C, HALO),
                         lambda n, l: (n, 0, (l + 1) * halo_step)),
            pl.BlockSpec((O, KC), lambda n, l: (0, 0)),
        ],
        out_specs=pl.BlockSpec((NB, O, TILE), lambda n, l: (n, 0, l)),
        compiler_params=pltpu.CompilerParams(
            dimension_semantics=("parallel", "parallel"),
            vmem_limit_bytes=48 * 1024 * 1024),
        cost_estimate=pl.CostEstimate(flops=flops, transcendentals=0,
                                      bytes_accessed=bytes_acc),
    )(xf, xf, wt)                                   # same array feeds main+halo

    # Crop the dense flat output back to the valid (OH, OW) window
    # (also handles stride > 1 by subsampling).
    out = out_flat[:, :, :Hp * Wp].reshape(N, O, Hp, Wp)
    out = out[:, :, 0:sh * (OH - 1) + 1:sh, 0:sw * (OW - 1) + 1:sw]
    return out


# ----------------------------------------------------------------------------
# Pallas kernel 2: max-over-scales + first-max index -> relu*cos / relu*sin.
# The S resized full-size maps are passed as S separate inputs (no HBM stack);
# cos/sin of the S discrete angles are compile-time constants.
# ----------------------------------------------------------------------------
def _scale_max_kernel(*refs, n_scales, cos_tab, sin_tab):
    x_refs = refs[:n_scales]
    u_ref = refs[n_scales]
    v_ref = refs[n_scales + 1]

    strength = x_refs[0][...]
    cosv = jnp.full_like(strength, cos_tab[0])
    sinv = jnp.full_like(strength, sin_tab[0])
    for s in range(1, n_scales):
        cur = x_refs[s][...]
        take = cur > strength                        # strict '>' => first max
        strength = jnp.where(take, cur, strength)
        cosv = jnp.where(take, cos_tab[s], cosv)
        sinv = jnp.where(take, sin_tab[s], sinv)
    r = jnp.maximum(strength, 0.0)                   # F.relu(strength)
    u_ref[...] = r * cosv
    v_ref[...] = r * sinv


def scale_max_pallas(maps, n_scales_small, angle_range, lane_tile=16384):
    """maps: list of S same-shaped f32 arrays. Returns (u, v) of that shape."""
    S = len(maps)
    orig_shape = maps[0].shape
    M = maps[0].size

    # Fold to 8 sublane rows when possible (full vreg / DMA tiles), keep the
    # long flat axis on lanes and tile it in big lane-dense blocks.
    rows = 8 if M % 8 == 0 else 1
    cols = M // rows
    maps2 = [m.reshape(rows, cols) for m in maps]
    lt = cols if cols <= lane_tile else lane_tile    # full extent or mult-of-128
    grid = (_cdiv(cols, lt),)

    cos_tab = tuple(math.cos((s - n_scales_small) * math.pi / 180.0
                             * angle_range / S) for s in range(S))
    sin_tab = tuple(math.sin((s - n_scales_small) * math.pi / 180.0
                             * angle_range / S) for s in range(S))

    kern = partial(_scale_max_kernel, n_scales=S,
                   cos_tab=cos_tab, sin_tab=sin_tab)
    spec = pl.BlockSpec((rows, lt), lambda i: (0, i))
    flops = int(6 * S * M)
    bytes_acc = int(4 * (S + 2) * M)

    u, v = pl.pallas_call(
        kern,
        out_shape=(jax.ShapeDtypeStruct((rows, cols), jnp.float32),
                   jax.ShapeDtypeStruct((rows, cols), jnp.float32)),
        grid=grid,
        in_specs=[spec] * S,
        out_specs=(pl.BlockSpec((rows, lt), lambda i: (0, i)),
                   pl.BlockSpec((rows, lt), lambda i: (0, i))),
        compiler_params=pltpu.CompilerParams(
            dimension_semantics=("parallel",),
            vmem_limit_bytes=32 * 1024 * 1024),
        cost_estimate=pl.CostEstimate(flops=flops, transcendentals=0,
                                      bytes_accessed=bytes_acc),
    )(*maps2)
    return u.reshape(orig_shape), v.reshape(orig_shape)


# ----------------------------------------------------------------------------
# JAX glue: bilinear resize (align_corners=True matches old F.upsample)
# ----------------------------------------------------------------------------
def _resize_indices(in_size, out_size, align_corners):
    d = jnp.arange(out_size, dtype=jnp.float32)
    if align_corners:
        if out_size == 1:
            src = jnp.zeros((out_size,), jnp.float32)
        else:
            src = d * ((in_size - 1) / (out_size - 1))
    else:
        scale = in_size / out_size
        src = jnp.maximum((d + 0.5) * scale - 0.5, 0.0)
    i0 = jnp.clip(jnp.floor(src).astype(jnp.int32), 0, in_size - 1)
    i1 = jnp.minimum(i0 + 1, in_size - 1)
    w = src - i0.astype(jnp.float32)
    return i0, i1, w


def resize_bilinear_nchw(x, out_size, align_corners=True):
    N, C, H, W = x.shape
    OH, OW = out_size
    if (OH, OW) == (H, W):
        return x
    y0, y1, wy = _resize_indices(H, OH, align_corners)
    x0, x1, wx = _resize_indices(W, OW, align_corners)
    top = x[:, :, y0, :]
    bot = x[:, :, y1, :]
    v = top * (1.0 - wy)[None, None, :, None] + bot * wy[None, None, :, None]
    left = v[:, :, :, x0]
    right = v[:, :, :, x1]
    return left * (1.0 - wx)[None, None, None, :] + right * wx[None, None, None, :]


# ----------------------------------------------------------------------------
# ScaleConv (mode=1) forward
# ----------------------------------------------------------------------------
def scale_conv_forward(x, weight1, *, stride=(1, 1), padding=(0, 0),
                       dilation=(1, 1), n_scales_small=5, n_scales_big=3,
                       angle_range=120, align_corners=True):
    N, C, H, W = x.shape
    O = weight1.shape[0]
    S = n_scales_small + n_scales_big
    maps = [None] * S

    # big scales: cumulative upsampling; torch appends -> indices n_small+n-1
    input_s = x
    for n in range(1, n_scales_big + 1):
        size = (int(round(1.26 ** n * H)), int(round(1.26 ** n * W)))
        input_s = resize_bilinear_nchw(input_s, size, align_corners)
        out = conv2d_pallas(input_s, weight1, stride, padding, dilation)
        out = resize_bilinear_nchw(out, (H, W), align_corners)
        maps[n_scales_small + n - 1] = out

    # small scales: cumulative downsampling; torch prepends -> indices n_small-1-n
    input_s = x
    for n in range(0, n_scales_small):
        size = (int(round(1.26 ** (-n) * H)), int(round(1.26 ** (-n) * W)))
        input_s = resize_bilinear_nchw(input_s, size, align_corners)
        out = conv2d_pallas(input_s, weight1, stride, padding, dilation)
        out = resize_bilinear_nchw(out, (H, W), align_corners)
        maps[n_scales_small - 1 - n] = out

    u, v = scale_max_pallas(maps, n_scales_small, angle_range)
    return u.reshape(N, O, H, W), v.reshape(N, O, H, W)


if __name__ == "__main__":
    key = jax.random.PRNGKey(0)
    k_w, k_x = jax.random.split(key)

    in_channels, out_channels, ksize = 4, 4, 3
    # reset_parameters(): uniform(-stdv, stdv), stdv = 1/sqrt(in_ch * kh * kw)
    stdv = 1.0 / math.sqrt(in_channels * ksize * ksize)
    weight1 = jax.random.uniform(k_w, (out_channels, in_channels, ksize, ksize),
                                 minval=-stdv, maxval=stdv, dtype=jnp.float32)

    x = jax.random.normal(k_x, (2, in_channels, 16, 16), dtype=jnp.float32)

    fwd = jax.jit(partial(scale_conv_forward,
                          stride=(1, 1), padding=(0, 0), dilation=(1, 1),
                          n_scales_small=5, n_scales_big=3, angle_range=120))
    u, v = fwd(x, weight1)
    jax.block_until_ready((u, v))

    assert u.shape == (2, out_channels, 16, 16)
    assert v.shape == (2, out_channels, 16, 16)
    assert bool(jnp.isfinite(u).all()) and bool(jnp.isfinite(v).all())
    print("KERNEL_OK")
</pallas_src>

<mosaic_0001>
module attributes {stable_mosaic.version = 11 : i64} {
  func.func @_conv_kernel(%arg0: i32, %arg1: i32, %arg2: memref<2x4x128xf32, #tpu.memory_space<vmem>>, %arg3: memref<2x4x128xf32, #tpu.memory_space<vmem>>, %arg4: memref<4x36xf32, #tpu.memory_space<vmem>>, %arg5: memref<2x4x128xf32, #tpu.memory_space<vmem>>) attributes {dimension_semantics = [#tpu.dimension_semantics<parallel>, #tpu.dimension_semantics<parallel>], iteration_bounds = array<i64: 1, 1>, scalar_prefetch = 0 : i64, scratch_operands = 0 : i64, tpu.core_type = #tpu.core_type<tc>, window_params = [{transform_indices = @transform_0, window_bounds = array<i64: 2, 4, 128>}, {transform_indices = @transform_1, window_bounds = array<i64: 2, 4, 128>}, {pipeline_mode = #tpu.pipeline_mode<synchronous>, transform_indices = @transform_2, window_bounds = array<i64: 4, 36>}, {transform_indices = @transform_3, window_bounds = array<i64: 2, 4, 128>}]} {
    %c0 = arith.constant 0 : index
    %c0_0 = arith.constant 0 : index
    %0 = vector.load %arg4[%c0, %c0_0] : memref<4x36xf32, #tpu.memory_space<vmem>>, vector<4x36xf32>
    %c0_1 = arith.constant 0 : index
    %c0_2 = arith.constant 0 : index
    %c0_3 = arith.constant 0 : index
    %1 = vector.load %arg2[%c0_1, %c0_2, %c0_3] : memref<2x4x128xf32, #tpu.memory_space<vmem>>, vector<1x4x128xf32>
    %2 = vector.shape_cast %1 : vector<1x4x128xf32> to vector<4x128xf32>
    %c0_4 = arith.constant 0 : index
    %c0_5 = arith.constant 0 : index
    %c0_6 = arith.constant 0 : index
    %3 = vector.load %arg3[%c0_4, %c0_5, %c0_6] : memref<2x4x128xf32, #tpu.memory_space<vmem>>, vector<1x4x128xf32>
    %4 = vector.shape_cast %3 : vector<1x4x128xf32> to vector<4x128xf32>
    %5 = tpu.concatenate %2, %4 in 1 : vector<4x128xf32>, vector<4x128xf32> -> vector<4x256xf32>
    %6 = vector.extract_strided_slice %5 {offsets = [0, 0], sizes = [4, 128], strides = [1, 1]} : vector<4x256xf32> to vector<4x128xf32>
    %7 = vector.extract_strided_slice %5 {offsets = [0, 1], sizes = [4, 128], strides = [1, 1]} : vector<4x256xf32> to vector<4x128xf32>
    %8 = vector.extract_strided_slice %5 {offsets = [0, 2], sizes = [4, 128], strides = [1, 1]} : vector<4x256xf32> to vector<4x128xf32>
    %9 = vector.extract_strided_slice %5 {offsets = [0, 6], sizes = [4, 128], strides = [1, 1]} : vector<4x256xf32> to vector<4x128xf32>
    %10 = vector.extract_strided_slice %5 {offsets = [0, 7], sizes = [4, 128], strides = [1, 1]} : vector<4x256xf32> to vector<4x128xf32>
    %11 = vector.extract_strided_slice %5 {offsets = [0, 8], sizes = [4, 128], strides = [1, 1]} : vector<4x256xf32> to vector<4x128xf32>
    %12 = vector.extract_strided_slice %5 {offsets = [0, 12], sizes = [4, 128], strides = [1, 1]} : vector<4x256xf32> to vector<4x128xf32>
    %13 = vector.extract_strided_slice %5 {offsets = [0, 13], sizes = [4, 128], strides = [1, 1]} : vector<4x256xf32> to vector<4x128xf32>
    %14 = vector.extract_strided_slice %5 {offsets = [0, 14], sizes = [4, 128], strides = [1, 1]} : vector<4x256xf32> to vector<4x128xf32>
    %15 = tpu.concatenate %6, %7, %8, %9, %10, %11, %12, %13, %14 in 0 : vector<4x128xf32>, vector<4x128xf32>, vector<4x128xf32>, vector<4x128xf32>, vector<4x128xf32>, vector<4x128xf32>, vector<4x128xf32>, vector<4x128xf32>, vector<4x128xf32> -> vector<36x128xf32>
    %cst = arith.constant dense<0.000000e+00> : vector<4x128xf32>
    %16 = tpu.matmul %0, %15, %cst {dimension_numbers = #tpu.dot_dimension_numbers<[1], [0], [0], [1], [0, 0, 1, 1], [], []>} : vector<4x36xf32>, vector<36x128xf32>, vector<4x128xf32> -> vector<4x128xf32>
    %c0_7 = arith.constant 0 : index
    %c0_8 = arith.constant 0 : index
    %c0_9 = arith.constant 0 : index
    %17 = vector.load %arg5[%c0_7, %c0_8, %c0_9] : memref<2x4x128xf32, #tpu.memory_space<vmem>>, vector<1x4x128xf32>
    %18 = vector.shape_cast %17 : vector<1x4x128xf32> to vector<4x128xf32>
    %19 = vector.shape_cast %16 : vector<4x128xf32> to vector<1x4x128xf32>
    tpu.vector_store %arg5[%c0_7, %c0_8, %c0_9], %19 {strides = array<i32>} : memref<2x4x128xf32, #tpu.memory_space<vmem>>, vector<1x4x128xf32>,
    %c1 = arith.constant 1 : index
    %c0_10 = arith.constant 0 : index
    %c0_11 = arith.constant 0 : index
    %20 = vector.load %arg2[%c1, %c0_10, %c0_11] : memref<2x4x128xf32, #tpu.memory_space<vmem>>, vector<1x4x128xf32>
    %21 = vector.shape_cast %20 : vector<1x4x128xf32> to vector<4x128xf32>
    %c1_12 = arith.constant 1 : index
    %c0_13 = arith.constant 0 : index
    %c0_14 = arith.constant 0 : index
    %22 = vector.load %arg3[%c1_12, %c0_13, %c0_14] : memref<2x4x128xf32, #tpu.memory_space<vmem>>, vector<1x4x128xf32>
    %23 = vector.shape_cast %22 : vector<1x4x128xf32> to vector<4x128xf32>
    %24 = tpu.concatenate %21, %23 in 1 : vector<4x128xf32>, vector<4x128xf32> -> vector<4x256xf32>
    %25 = vector.extract_strided_slice %24 {offsets = [0, 0], sizes = [4, 128], strides = [1, 1]} : vector<4x256xf32> to vector<4x128xf32>
    %26 = vector.extract_strided_slice %24 {offsets = [0, 1], sizes = [4, 128], strides = [1, 1]} : vector<4x256xf32> to vector<4x128xf32>
    %27 = vector.extract_strided_slice %24 {offsets = [0, 2], sizes = [4, 128], strides = [1, 1]} : vector<4x256xf32> to vector<4x128xf32>
    %28 = vector.extract_strided_slice %24 {offsets = [0, 6], sizes = [4, 128], strides = [1, 1]} : vector<4x256xf32> to vector<4x128xf32>
    %29 = vector.extract_strided_slice %24 {offsets = [0, 7], sizes = [4, 128], strides = [1, 1]} : vector<4x256xf32> to vector<4x128xf32>
    %30 = vector.extract_strided_slice %24 {offsets = [0, 8], sizes = [4, 128], strides = [1, 1]} : vector<4x256xf32> to vector<4x128xf32>
    %31 = vector.extract_strided_slice %24 {offsets = [0, 12], sizes = [4, 128], strides = [1, 1]} : vector<4x256xf32> to vector<4x128xf32>
    %32 = vector.extract_strided_slice %24 {offsets = [0, 13], sizes = [4, 128], strides = [1, 1]} : vector<4x256xf32> to vector<4x128xf32>
    %33 = vector.extract_strided_slice %24 {offsets = [0, 14], sizes = [4, 128], strides = [1, 1]} : vector<4x256xf32> to vector<4x128xf32>
    %34 = tpu.concatenate %25, %26, %27, %28, %29, %30, %31, %32, %33 in 0 : vector<4x128xf32>, vector<4x128xf32>, vector<4x128xf32>, vector<4x128xf32>, vector<4x128xf32>, vector<4x128xf32>, vector<4x128xf32>, vector<4x128xf32>, vector<4x128xf32> -> vector<36x128xf32>
    %cst_15 = arith.constant dense<0.000000e+00> : vector<4x128xf32>
    %35 = tpu.matmul %0, %34, %cst_15 {dimension_numbers = #tpu.dot_dimension_numbers<[1], [0], [0], [1], [0, 0, 1, 1], [], []>} : vector<4x36xf32>, vector<36x128xf32>, vector<4x128xf32> -> vector<4x128xf32>
    %c1_16 = arith.constant 1 : index
    %c0_17 = arith.constant 0 : index
    %c0_18 = arith.constant 0 : index
    %36 = vector.load %arg5[%c1_16, %c0_17, %c0_18] : memref<2x4x128xf32, #tpu.memory_space<vmem>>, vector<1x4x128xf32>
    %37 = vector.shape_cast %36 : vector<1x4x128xf32> to vector<4x128xf32>
    %38 = vector.shape_cast %35 : vector<4x128xf32> to vector<1x4x128xf32>
    tpu.vector_store %arg5[%c1_16, %c0_17, %c0_18], %38 {strides = array<i32>} : memref<2x4x128xf32, #tpu.memory_space<vmem>>, vector<1x4x128xf32>,
    return
  }
  func.func @transform_0(%arg0: i32, %arg1: i32) -> (i32, i32, i32) {
    %c0_i32 = arith.constant 0 : i32
    %c0_i32_0 = arith.constant 0 : i32
    return %arg0, %c0_i32, %arg1 : i32, i32, i32
  }
  func.func @transform_1(%arg0: i32, %arg1: i32) -> (i32, i32, i32) {
    %c1_i32 = arith.constant 1 : i32
    %0 = arith.addi %arg1, %c1_i32 : i32
    %c1_i32_0 = arith.constant 1 : i32
    %1 = arith.muli %0, %c1_i32_0 : i32
    %c0_i32 = arith.constant 0 : i32
    %c0_i32_1 = arith.constant 0 : i32
    return %arg0, %c0_i32, %1 : i32, i32, i32
  }
  func.func @transform_2(%arg0: i32, %arg1: i32) -> (i32, i32) {
    %c0_i32 = arith.constant 0 : i32
    %c0_i32_0 = arith.constant 0 : i32
    %c0_i32_1 = arith.constant 0 : i32
    return %c0_i32, %c0_i32_0 : i32, i32
  }
  func.func @transform_3(%arg0: i32, %arg1: i32) -> (i32, i32, i32) {
    %c0_i32 = arith.constant 0 : i32
    %c0_i32_0 = arith.constant 0 : i32
    return %arg0, %c0_i32, %arg1 : i32, i32, i32
  }
}

module attributes {stable_mosaic.version = 11 : i64} {
  func.func @_conv_kernel(%arg0: i32, %arg1: i32, %arg2: memref<2x4x128xf32, #tpu.memory_space<vmem>>, %arg3: memref<2x4x128xf32, #tpu.memory_space<vmem>>, %arg4: memref<4x36xf32, #tpu.memory_space<vmem>>, %arg5: memref<2x4x128xf32, #tpu.memory_space<vmem>>) attributes {dimension_semantics = [#tpu.dimension_semantics<parallel>, #tpu.dimension_semantics<parallel>], iteration_bounds = array<i64: 1, 1>, scalar_prefetch = 0 : i64, scratch_operands = 0 : i64, tpu.core_type = #tpu.core_type<tc>, window_params = [{transform_indices = @transform_0, window_bounds = array<i64: 2, 4, 128>}, {transform_indices = @transform_1, window_bounds = array<i64: 2, 4, 128>}, {pipeline_mode = #tpu.pipeline_mode<synchronous>, transform_indices = @transform_2, window_bounds = array<i64: 4, 36>}, {transform_indices = @transform_3, window_bounds = array<i64: 2, 4, 128>}]} {
    %c0 = arith.constant 0 : index
    %c0_0 = arith.constant 0 : index
    %0 = vector.load %arg4[%c0, %c0_0] : memref<4x36xf32, #tpu.memory_space<vmem>>, vector<4x36xf32>
    %c0_1 = arith.constant 0 : index
    %c0_2 = arith.constant 0 : index
    %c0_3 = arith.constant 0 : index
    %1 = vector.load %arg2[%c0_1, %c0_2, %c0_3] : memref<2x4x128xf32, #tpu.memory_space<vmem>>, vector<1x4x128xf32>
    %2 = vector.shape_cast %1 : vector<1x4x128xf32> to vector<4x128xf32>
    %c0_4 = arith.constant 0 : index
    %c0_5 = arith.constant 0 : index
    %c0_6 = arith.constant 0 : index
    %3 = vector.load %arg3[%c0_4, %c0_5, %c0_6] : memref<2x4x128xf32, #tpu.memory_space<vmem>>, vector<1x4x128xf32>
    %4 = vector.shape_cast %3 : vector<1x4x128xf32> to vector<4x128xf32>
    %5 = tpu.concatenate %2, %4 in 1 : vector<4x128xf32>, vector<4x128xf32> -> vector<4x256xf32>
    %6 = vector.extract_strided_slice %5 {offsets = [0, 0], sizes = [4, 128], strides = [1, 1]} : vector<4x256xf32> to vector<4x128xf32>
    %7 = vector.extract_strided_slice %5 {offsets = [0, 1], sizes = [4, 128], strides = [1, 1]} : vector<4x256xf32> to vector<4x128xf32>
    %8 = vector.extract_strided_slice %5 {offsets = [0, 2], sizes = [4, 128], strides = [1, 1]} : vector<4x256xf32> to vector<4x128xf32>
    %9 = vector.extract_strided_slice %5 {offsets = [0, 8], sizes = [4, 128], strides = [1, 1]} : vector<4x256xf32> to vector<4x128xf32>
    %10 = vector.extract_strided_slice %5 {offsets = [0, 9], sizes = [4, 128], strides = [1, 1]} : vector<4x256xf32> to vector<4x128xf32>
    %11 = vector.extract_strided_slice %5 {offsets = [0, 10], sizes = [4, 128], strides = [1, 1]} : vector<4x256xf32> to vector<4x128xf32>
    %12 = vector.extract_strided_slice %5 {offsets = [0, 16], sizes = [4, 128], strides = [1, 1]} : vector<4x256xf32> to vector<4x128xf32>
    %13 = vector.extract_strided_slice %5 {offsets = [0, 17], sizes = [4, 128], strides = [1, 1]} : vector<4x256xf32> to vector<4x128xf32>
    %14 = vector.extract_strided_slice %5 {offsets = [0, 18], sizes = [4, 128], strides = [1, 1]} : vector<4x256xf32> to vector<4x128xf32>
    %15 = tpu.concatenate %6, %7, %8, %9, %10, %11, %12, %13, %14 in 0 : vector<4x128xf32>, vector<4x128xf32>, vector<4x128xf32>, vector<4x128xf32>, vector<4x128xf32>, vector<4x128xf32>, vector<4x128xf32>, vector<4x128xf32>, vector<4x128xf32> -> vector<36x128xf32>
    %cst = arith.constant dense<0.000000e+00> : vector<4x128xf32>
    %16 = tpu.matmul %0, %15, %cst {dimension_numbers = #tpu.dot_dimension_numbers<[1], [0], [0], [1], [0, 0, 1, 1], [], []>} : vector<4x36xf32>, vector<36x128xf32>, vector<4x128xf32> -> vector<4x128xf32>
    %c0_7 = arith.constant 0 : index
    %c0_8 = arith.constant 0 : index
    %c0_9 = arith.constant 0 : index
    %17 = vector.load %arg5[%c0_7, %c0_8, %c0_9] : memref<2x4x128xf32, #tpu.memory_space<vmem>>, vector<1x4x128xf32>
    %18 = vector.shape_cast %17 : vector<1x4x128xf32> to vector<4x128xf32>
    %19 = vector.shape_cast %16 : vector<4x128xf32> to vector<1x4x128xf32>
    tpu.vector_store %arg5[%c0_7, %c0_8, %c0_9], %19 {strides = array<i32>} : memref<2x4x128xf32, #tpu.memory_space<vmem>>, vector<1x4x128xf32>,
    %c1 = arith.constant 1 : index
    %c0_10 = arith.constant 0 : index
    %c0_11 = arith.constant 0 : index
    %20 = vector.load %arg2[%c1, %c0_10, %c0_11] : memref<2x4x128xf32, #tpu.memory_space<vmem>>, vector<1x4x128xf32>
    %21 = vector.shape_cast %20 : vector<1x4x128xf32> to vector<4x128xf32>
    %c1_12 = arith.constant 1 : index
    %c0_13 = arith.constant 0 : index
    %c0_14 = arith.constant 0 : index
    %22 = vector.load %arg3[%c1_12, %c0_13, %c0_14] : memref<2x4x128xf32, #tpu.memory_space<vmem>>, vector<1x4x128xf32>
    %23 = vector.shape_cast %22 : vector<1x4x128xf32> to vector<4x128xf32>
    %24 = tpu.concatenate %21, %23 in 1 : vector<4x128xf32>, vector<4x128xf32> -> vector<4x256xf32>
    %25 = vector.extract_strided_slice %24 {offsets = [0, 0], sizes = [4, 128], strides = [1, 1]} : vector<4x256xf32> to vector<4x128xf32>
    %26 = vector.extract_strided_slice %24 {offsets = [0, 1], sizes = [4, 128], strides = [1, 1]} : vector<4x256xf32> to vector<4x128xf32>
    %27 = vector.extract_strided_slice %24 {offsets = [0, 2], sizes = [4, 128], strides = [1, 1]} : vector<4x256xf32> to vector<4x128xf32>
    %28 = vector.extract_strided_slice %24 {offsets = [0, 8], sizes = [4, 128], strides = [1, 1]} : vector<4x256xf32> to vector<4x128xf32>
    %29 = vector.extract_strided_slice %24 {offsets = [0, 9], sizes = [4, 128], strides = [1, 1]} : vector<4x256xf32> to vector<4x128xf32>
    %30 = vector.extract_strided_slice %24 {offsets = [0, 10], sizes = [4, 128], strides = [1, 1]} : vector<4x256xf32> to vector<4x128xf32>
    %31 = vector.extract_strided_slice %24 {offsets = [0, 16], sizes = [4, 128], strides = [1, 1]} : vector<4x256xf32> to vector<4x128xf32>
    %32 = vector.extract_strided_slice %24 {offsets = [0, 17], sizes = [4, 128], strides = [1, 1]} : vector<4x256xf32> to vector<4x128xf32>
    %33 = vector.extract_strided_slice %24 {offsets = [0, 18], sizes = [4, 128], strides = [1, 1]} : vector<4x256xf32> to vector<4x128xf32>
    %34 = tpu.concatenate %25, %26, %27, %28, %29, %30, %31, %32, %33 in 0 : vector<4x128xf32>, vector<4x128xf32>, vector<4x128xf32>, vector<4x128xf32>, vector<4x128xf32>, vector<4x128xf32>, vector<4x128xf32>, vector<4x128xf32>, vector<4x128xf32> -> vector<36x128xf32>
    %cst_15 = arith.constant dense<0.000000e+00> : vector<4x128xf32>
    %35 = tpu.matmul %0, %34, %cst_15 {dimension_numbers = #tpu.dot_dimension_numbers<[1], [0], [0], [1], [0, 0, 1, 1], [], []>} : vector<4x36xf32>, vector<36x128xf32>, vector<4x128xf32> -> vector<4x128xf32>
    %c1_16 = arith.constant 1 : index
    %c0_17 = arith.constant 0 : index
    %c0_18 = arith.constant 0 : index
    %36 = vector.load %arg5[%c1_16, %c0_17, %c0_18] : memref<2x4x128xf32, #tpu.memory_space<vmem>>, vector<1x4x128xf32>
    %37 = vector.shape_cast %36 : vector<1x4x128xf32> to vector<4x128xf32>
    %38 = vector.shape_cast %35 : vector<4x128xf32> to vector<1x4x128xf32>
    tpu.vector_store %arg5[%c1_16, %c0_17, %c0_18], %38 {strides = array<i32>} : memref<2x4x128xf32, #tpu.memory_space<vmem>>, vector<1x4x128xf32>,
    return
  }
  func.func @transform_0(%arg0: i32, %arg1: i32) -> (i32, i32, i32) {
    %c0_i32 = arith.constant 0 : i32
    %c0_i32_0 = arith.constant 0 : i32
    return %arg0, %c0_i32, %arg1 : i32, i32, i32
  }
  func.func @transform_1(%arg0: i32, %arg1: i32) -> (i32, i32, i32) {
    %c1_i32 = arith.constant 1 : i32
    %0 = arith.addi %arg1, %c1_i32 : i32
    %c1_i32_0 = arith.constant 1 : i32
    %1 = arith.muli %0, %c1_i32_0 : i32
    %c0_i32 = arith.constant 0 : i32
    %c0_i32_1 = arith.constant 0 : i32
    return %arg0, %c0_i32, %1 : i32, i32, i32
  }
  func.func @transform_2(%arg0: i32, %arg1: i32) -> (i32, i32) {
    %c0_i32 = arith.constant 0 : i32
    %c0_i32_0 = arith.constant 0 : i32
    %c0_i32_1 = arith.constant 0 : i32
    return %c0_i32, %c0_i32_0 : i32, i32
  }
  func.func @transform_3(%arg0: i32, %arg1: i32) -> (i32, i32, i32) {
    %c0_i32 = arith.constant 0 : i32
    %c0_i32_0 = arith.constant 0 : i32
    return %arg0, %c0_i32, %arg1 : i32, i32, i32
  }
}

module attributes {stable_mosaic.version = 11 : i64} {
  func.func @_conv_kernel(%arg0: i32, %arg1: i32, %arg2: memref<2x4x128xf32, #tpu.memory_space<vmem>>, %arg3: memref<2x4x128xf32, #tpu.memory_space<vmem>>, %arg4: memref<4x36xf32, #tpu.memory_space<vmem>>, %arg5: memref<2x4x128xf32, #tpu.memory_space<vmem>>) attributes {dimension_semantics = [#tpu.dimension_semantics<parallel>, #tpu.dimension_semantics<parallel>], iteration_bounds = array<i64: 1, 1>, scalar_prefetch = 0 : i64, scratch_operands = 0 : i64, tpu.core_type = #tpu.core_type<tc>, window_params = [{transform_indices = @transform_0, window_bounds = array<i64: 2, 4, 128>}, {transform_indices = @transform_1, window_bounds = array<i64: 2, 4, 128>}, {pipeline_mode = #tpu.pipeline_mode<synchronous>, transform_indices = @transform_2, window_bounds = array<i64: 4, 36>}, {transform_indices = @transform_3, window_bounds = array<i64: 2, 4, 128>}]} {
    %c0 = arith.constant 0 : index
    %c0_0 = arith.constant 0 : index
    %0 = vector.load %arg4[%c0, %c0_0] : memref<4x36xf32, #tpu.memory_space<vmem>>, vector<4x36xf32>
    %c0_1 = arith.constant 0 : index
    %c0_2 = arith.constant 0 : index
    %c0_3 = arith.constant 0 : index
    %1 = vector.load %arg2[%c0_1, %c0_2, %c0_3] : memref<2x4x128xf32, #tpu.memory_space<vmem>>, vector<1x4x128xf32>
    %2 = vector.shape_cast %1 : vector<1x4x128xf32> to vector<4x128xf32>
    %c0_4 = arith.constant 0 : index
    %c0_5 = arith.constant 0 : index
    %c0_6 = arith.constant 0 : index
    %3 = vector.load %arg3[%c0_4, %c0_5, %c0_6] : memref<2x4x128xf32, #tpu.memory_space<vmem>>, vector<1x4x128xf32>
    %4 = vector.shape_cast %3 : vector<1x4x128xf32> to vector<4x128xf32>
    %5 = tpu.concatenate %2, %4 in 1 : vector<4x128xf32>, vector<4x128xf32> -> vector<4x256xf32>
    %6 = vector.extract_strided_slice %5 {offsets = [0, 0], sizes = [4, 128], strides = [1, 1]} : vector<4x256xf32> to vector<4x128xf32>
    %7 = vector.extract_strided_slice %5 {offsets = [0, 1], sizes = [4, 128], strides = [1, 1]} : vector<4x256xf32> to vector<4x128xf32>
    %8 = vector.extract_strided_slice %5 {offsets = [0, 2], sizes = [4, 128], strides = [1, 1]} : vector<4x256xf32> to vector<4x128xf32>
    %9 = vector.extract_strided_slice %5 {offsets = [0, 10], sizes = [4, 128], strides = [1, 1]} : vector<4x256xf32> to vector<4x128xf32>
    %10 = vector.extract_strided_slice %5 {offsets = [0, 11], sizes = [4, 128], strides = [1, 1]} : vector<4x256xf32> to vector<4x128xf32>
    %11 = vector.extract_strided_slice %5 {offsets = [0, 12], sizes = [4, 128], strides = [1, 1]} : vector<4x256xf32> to vector<4x128xf32>
    %12 = vector.extract_strided_slice %5 {offsets = [0, 20], sizes = [4, 128], strides = [1, 1]} : vector<4x256xf32> to vector<4x128xf32>
    %13 = vector.extract_strided_slice %5 {offsets = [0, 21], sizes = [4, 128], strides = [1, 1]} : vector<4x256xf32> to vector<4x128xf32>
    %14 = vector.extract_strided_slice %5 {offsets = [0, 22], sizes = [4, 128], strides = [1, 1]} : vector<4x256xf32> to vector<4x128xf32>
    %15 = tpu.concatenate %6, %7, %8, %9, %10, %11, %12, %13, %14 in 0 : vector<4x128xf32>, vector<4x128xf32>, vector<4x128xf32>, vector<4x128xf32>, vector<4x128xf32>, vector<4x128xf32>, vector<4x128xf32>, vector<4x128xf32>, vector<4x128xf32> -> vector<36x128xf32>
    %cst = arith.constant dense<0.000000e+00> : vector<4x128xf32>
    %16 = tpu.matmul %0, %15, %cst {dimension_numbers = #tpu.dot_dimension_numbers<[1], [0], [0], [1], [0, 0, 1, 1], [], []>} : vector<4x36xf32>, vector<36x128xf32>, vector<4x128xf32> -> vector<4x128xf32>
    %c0_7 = arith.constant 0 : index
    %c0_8 = arith.constant 0 : index
    %c0_9 = arith.constant 0 : index
    %17 = vector.load %arg5[%c0_7, %c0_8, %c0_9] : memref<2x4x128xf32, #tpu.memory_space<vmem>>, vector<1x4x128xf32>
    %18 = vector.shape_cast %17 : vector<1x4x128xf32> to vector<4x128xf32>
    %19 = vector.shape_cast %16 : vector<4x128xf32> to vector<1x4x128xf32>
    tpu.vector_store %arg5[%c0_7, %c0_8, %c0_9], %19 {strides = array<i32>} : memref<2x4x128xf32, #tpu.memory_space<vmem>>, vector<1x4x128xf32>,
    %c1 = arith.constant 1 : index
    %c0_10 = arith.constant 0 : index
    %c0_11 = arith.constant 0 : index
    %20 = vector.load %arg2[%c1, %c0_10, %c0_11] : memref<2x4x128xf32, #tpu.memory_space<vmem>>, vector<1x4x128xf32>
    %21 = vector.shape_cast %20 : vector<1x4x128xf32> to vector<4x128xf32>
    %c1_12 = arith.constant 1 : index
    %c0_13 = arith.constant 0 : index
    %c0_14 = arith.constant 0 : index
    %22 = vector.load %arg3[%c1_12, %c0_13, %c0_14] : memref<2x4x128xf32, #tpu.memory_space<vmem>>, vector<1x4x128xf32>
    %23 = vector.shape_cast %22 : vector<1x4x128xf32> to vector<4x128xf32>
    %24 = tpu.concatenate %21, %23 in 1 : vector<4x128xf32>, vector<4x128xf32> -> vector<4x256xf32>
    %25 = vector.extract_strided_slice %24 {offsets = [0, 0], sizes = [4, 128], strides = [1, 1]} : vector<4x256xf32> to vector<4x128xf32>
    %26 = vector.extract_strided_slice %24 {offsets = [0, 1], sizes = [4, 128], strides = [1, 1]} : vector<4x256xf32> to vector<4x128xf32>
    %27 = vector.extract_strided_slice %24 {offsets = [0, 2], sizes = [4, 128], strides = [1, 1]} : vector<4x256xf32> to vector<4x128xf32>
    %28 = vector.extract_strided_slice %24 {offsets = [0, 10], sizes = [4, 128], strides = [1, 1]} : vector<4x256xf32> to vector<4x128xf32>
    %29 = vector.extract_strided_slice %24 {offsets = [0, 11], sizes = [4, 128], strides = [1, 1]} : vector<4x256xf32> to vector<4x128xf32>
    %30 = vector.extract_strided_slice %24 {offsets = [0, 12], sizes = [4, 128], strides = [1, 1]} : vector<4x256xf32> to vector<4x128xf32>
    %31 = vector.extract_strided_slice %24 {offsets = [0, 20], sizes = [4, 128], strides = [1, 1]} : vector<4x256xf32> to vector<4x128xf32>
    %32 = vector.extract_strided_slice %24 {offsets = [0, 21], sizes = [4, 128], strides = [1, 1]} : vector<4x256xf32> to vector<4x128xf32>
    %33 = vector.extract_strided_slice %24 {offsets = [0, 22], sizes = [4, 128], strides = [1, 1]} : vector<4x256xf32> to vector<4x128xf32>
    %34 = tpu.concatenate %25, %26, %27, %28, %29, %30, %31, %32, %33 in 0 : vector<4x128xf32>, vector<4x128xf32>, vector<4x128xf32>, vector<4x128xf32>, vector<4x128xf32>, vector<4x128xf32>, vector<4x128xf32>, vector<4x128xf32>, vector<4x128xf32> -> vector<36x128xf32>
    %cst_15 = arith.constant dense<0.000000e+00> : vector<4x128xf32>
    %35 = tpu.matmul %0, %34, %cst_15 {dimension_numbers = #tpu.dot_dimension_numbers<[1], [0], [0], [1], [0, 0, 1, 1], [], []>} : vector<4x36xf32>, vector<36x128xf32>, vector<4x128xf32> -> vector<4x128xf32>
    %c1_16 = arith.constant 1 : index
    %c0_17 = arith.constant 0 : index
    %c0_18 = arith.constant 0 : index
    %36 = vector.load %arg5[%c1_16, %c0_17, %c0_18] : memref<2x4x128xf32, #tpu.memory_space<vmem>>, vector<1x4x128xf32>
    %37 = vector.shape_cast %36 : vector<1x4x128xf32> to vector<4x128xf32>
    %38 = vector.shape_cast %35 : vector<4x128xf32> to vector<1x4x128xf32>
    tpu.vector_store %arg5[%c1_16, %c0_17, %c0_18], %38 {strides = array<i32>} : memref<2x4x128xf32, #tpu.memory_space<vmem>>, vector<1x4x128xf32>,
    return
  }
  func.func @transform_0(%arg0: i32, %arg1: i32) -> (i32, i32, i32) {
    %c0_i32 = arith.constant 0 : i32
    %c0_i32_0 = arith.constant 0 : i32
    return %arg0, %c0_i32, %arg1 : i32, i32, i32
  }
  func.func @transform_1(%arg0: i32, %arg1: i32) -> (i32, i32, i32) {
    %c1_i32 = arith.constant 1 : i32
    %0 = arith.addi %arg1, %c1_i32 : i32
    %c1_i32_0 = arith.constant 1 : i32
    %1 = arith.muli %0, %c1_i32_0 : i32
    %c0_i32 = arith.constant 0 : i32
    %c0_i32_1 = arith.constant 0 : i32
    return %arg0, %c0_i32, %1 : i32, i32, i32
  }
  func.func @transform_2(%arg0: i32, %arg1: i32) -> (i32, i32) {
    %c0_i32 = arith.constant 0 : i32
    %c0_i32_0 = arith.constant 0 : i32
    %c0_i32_1 = arith.constant 0 : i32
    return %c0_i32, %c0_i32_0 : i32, i32
  }
  func.func @transform_3(%arg0: i32, %arg1: i32) -> (i32, i32, i32) {
    %c0_i32 = arith.constant 0 : i32
    %c0_i32_0 = arith.constant 0 : i32
    return %arg0, %c0_i32, %arg1 : i32, i32, i32
  }
}

module attributes {stable_mosaic.version = 11 : i64} {
  func.func @_conv_kernel(%arg0: i32, %arg1: i32, %arg2: memref<2x4x256xf32, #tpu.memory_space<vmem>>, %arg3: memref<2x4x128xf32, #tpu.memory_space<vmem>>, %arg4: memref<4x36xf32, #tpu.memory_space<vmem>>, %arg5: memref<2x4x256xf32, #tpu.memory_space<vmem>>) attributes {dimension_semantics = [#tpu.dimension_semantics<parallel>, #tpu.dimension_semantics<parallel>], iteration_bounds = array<i64: 1, 1>, scalar_prefetch = 0 : i64, scratch_operands = 0 : i64, tpu.core_type = #tpu.core_type<tc>, window_params = [{transform_indices = @transform_0, window_bounds = array<i64: 2, 4, 256>}, {transform_indices = @transform_1, window_bounds = array<i64: 2, 4, 128>}, {pipeline_mode = #tpu.pipeline_mode<synchronous>, transform_indices = @transform_2, window_bounds = array<i64: 4, 36>}, {transform_indices = @transform_3, window_bounds = array<i64: 2, 4, 256>}]} {
    %c0 = arith.constant 0 : index
    %c0_0 = arith.constant 0 : index
    %0 = vector.load %arg4[%c0, %c0_0] : memref<4x36xf32, #tpu.memory_space<vmem>>, vector<4x36xf32>
    %c0_1 = arith.constant 0 : index
    %c0_2 = arith.constant 0 : index
    %c0_3 = arith.constant 0 : index
    %1 = vector.load %arg2[%c0_1, %c0_2, %c0_3] : memref<2x4x256xf32, #tpu.memory_space<vmem>>, vector<1x4x256xf32>
    %2 = vector.shape_cast %1 : vector<1x4x256xf32> to vector<4x256xf32>
    %c0_4 = arith.constant 0 : index
    %c0_5 = arith.constant 0 : index
    %c0_6 = arith.constant 0 : index
    %3 = vector.load %arg3[%c0_4, %c0_5, %c0_6] : memref<2x4x128xf32, #tpu.memory_space<vmem>>, vector<1x4x128xf32>
    %4 = vector.shape_cast %3 : vector<1x4x128xf32> to vector<4x128xf32>
    %5 = tpu.concatenate %2, %4 in 1 : vector<4x256xf32>, vector<4x128xf32> -> vector<4x384xf32>
    %6 = vector.extract_strided_slice %5 {offsets = [0, 0], sizes = [4, 256], strides = [1, 1]} : vector<4x384xf32> to vector<4x256xf32>
    %7 = vector.extract_strided_slice %5 {offsets = [0, 1], sizes = [4, 256], strides = [1, 1]} : vector<4x384xf32> to vector<4x256xf32>
    %8 = vector.extract_strided_slice %5 {offsets = [0, 2], sizes = [4, 256], strides = [1, 1]} : vector<4x384xf32> to vector<4x256xf32>
    %9 = vector.extract_strided_slice %5 {offsets = [0, 13], sizes = [4, 256], strides = [1, 1]} : vector<4x384xf32> to vector<4x256xf32>
    %10 = vector.extract_strided_slice %5 {offsets = [0, 14], sizes = [4, 256], strides = [1, 1]} : vector<4x384xf32> to vector<4x256xf32>
    %11 = vector.extract_strided_slice %5 {offsets = [0, 15], sizes = [4, 256], strides = [1, 1]} : vector<4x384xf32> to vector<4x256xf32>
    %12 = vector.extract_strided_slice %5 {offsets = [0, 26], sizes = [4, 256], strides = [1, 1]} : vector<4x384xf32> to vector<4x256xf32>
    %13 = vector.extract_strided_slice %5 {offsets = [0, 27], sizes = [4, 256], strides = [1, 1]} : vector<4x384xf32> to vector<4x256xf32>
    %14 = vector.extract_strided_slice %5 {offsets = [0, 28], sizes = [4, 256], strides = [1, 1]} : vector<4x384xf32> to vector<4x256xf32>
    %15 = tpu.concatenate %6, %7, %8, %9, %10, %11, %12, %13, %14 in 0 : vector<4x256xf32>, vector<4x256xf32>, vector<4x256xf32>, vector<4x256xf32>, vector<4x256xf32>, vector<4x256xf32>, vector<4x256xf32>, vector<4x256xf32>, vector<4x256xf32> -> vector<36x256xf32>
    %cst = arith.constant dense<0.000000e+00> : vector<4x256xf32>
    %16 = tpu.matmul %0, %15, %cst {dimension_numbers = #tpu.dot_dimension_numbers<[1], [0], [0], [1], [0, 0, 1, 1], [], []>} : vector<4x36xf32>, vector<36x256xf32>, vector<4x256xf32> -> vector<4x256xf32>
    %c0_7 = arith.constant 0 : index
    %c0_8 = arith.constant 0 : index
    %c0_9 = arith.constant 0 : index
    %17 = vector.load %arg5[%c0_7, %c0_8, %c0_9] : memref<2x4x256xf32, #tpu.memory_space<vmem>>, vector<1x4x256xf32>
    %18 = vector.shape_cast %17 : vector<1x4x256xf32> to vector<4x256xf32>
    %19 = vector.shape_cast %16 : vector<4x256xf32> to vector<1x4x256xf32>
    tpu.vector_store %arg5[%c0_7, %c0_8, %c0_9], %19 {strides = array<i32>} : memref<2x4x256xf32, #tpu.memory_space<vmem>>, vector<1x4x256xf32>,
    %c1 = arith.constant 1 : index
    %c0_10 = arith.constant 0 : index
    %c0_11 = arith.constant 0 : index
    %20 = vector.load %arg2[%c1, %c0_10, %c0_11] : memref<2x4x256xf32, #tpu.memory_space<vmem>>, vector<1x4x256xf32>
    %21 = vector.shape_cast %20 : vector<1x4x256xf32> to vector<4x256xf32>
    %c1_12 = arith.constant 1 : index
    %c0_13 = arith.constant 0 : index
    %c0_14 = arith.constant 0 : index
    %22 = vector.load %arg3[%c1_12, %c0_13, %c0_14] : memref<2x4x128xf32, #tpu.memory_space<vmem>>, vector<1x4x128xf32>
    %23 = vector.shape_cast %22 : vector<1x4x128xf32> to vector<4x128xf32>
    %24 = tpu.concatenate %21, %23 in 1 : vector<4x256xf32>, vector<4x128xf32> -> vector<4x384xf32>
    %25 = vector.extract_strided_slice %24 {offsets = [0, 0], sizes = [4, 256], strides = [1, 1]} : vector<4x384xf32> to vector<4x256xf32>
    %26 = vector.extract_strided_slice %24 {offsets = [0, 1], sizes = [4, 256], strides = [1, 1]} : vector<4x384xf32> to vector<4x256xf32>
    %27 = vector.extract_strided_slice %24 {offsets = [0, 2], sizes = [4, 256], strides = [1, 1]} : vector<4x384xf32> to vector<4x256xf32>
    %28 = vector.extract_strided_slice %24 {offsets = [0, 13], sizes = [4, 256], strides = [1, 1]} : vector<4x384xf32> to vector<4x256xf32>
    %29 = vector.extract_strided_slice %24 {offsets = [0, 14], sizes = [4, 256], strides = [1, 1]} : vector<4x384xf32> to vector<4x256xf32>
    %30 = vector.extract_strided_slice %24 {offsets = [0, 15], sizes = [4, 256], strides = [1, 1]} : vector<4x384xf32> to vector<4x256xf32>
    %31 = vector.extract_strided_slice %24 {offsets = [0, 26], sizes = [4, 256], strides = [1, 1]} : vector<4x384xf32> to vector<4x256xf32>
    %32 = vector.extract_strided_slice %24 {offsets = [0, 27], sizes = [4, 256], strides = [1, 1]} : vector<4x384xf32> to vector<4x256xf32>
    %33 = vector.extract_strided_slice %24 {offsets = [0, 28], sizes = [4, 256], strides = [1, 1]} : vector<4x384xf32> to vector<4x256xf32>
    %34 = tpu.concatenate %25, %26, %27, %28, %29, %30, %31, %32, %33 in 0 : vector<4x256xf32>, vector<4x256xf32>, vector<4x256xf32>, vector<4x256xf32>, vector<4x256xf32>, vector<4x256xf32>, vector<4x256xf32>, vector<4x256xf32>, vector<4x256xf32> -> vector<36x256xf32>
    %cst_15 = arith.constant dense<0.000000e+00> : vector<4x256xf32>
    %35 = tpu.matmul %0, %34, %cst_15 {dimension_numbers = #tpu.dot_dimension_numbers<[1], [0], [0], [1], [0, 0, 1, 1], [], []>} : vector<4x36xf32>, vector<36x256xf32>, vector<4x256xf32> -> vector<4x256xf32>
    %c1_16 = arith.constant 1 : index
    %c0_17 = arith.constant 0 : index
    %c0_18 = arith.constant 0 : index
    %36 = vector.load %arg5[%c1_16, %c0_17, %c0_18] : memref<2x4x256xf32, #tpu.memory_space<vmem>>, vector<1x4x256xf32>
    %37 = vector.shape_cast %36 : vector<1x4x256xf32> to vector<4x256xf32>
    %38 = vector.shape_cast %35 : vector<4x256xf32> to vector<1x4x256xf32>
    tpu.vector_store %arg5[%c1_16, %c0_17, %c0_18], %38 {strides = array<i32>} : memref<2x4x256xf32, #tpu.memory_space<vmem>>, vector<1x4x256xf32>,
    return
  }
  func.func @transform_0(%arg0: i32, %arg1: i32) -> (i32, i32, i32) {
    %c0_i32 = arith.constant 0 : i32
    %c0_i32_0 = arith.constant 0 : i32
    return %arg0, %c0_i32, %arg1 : i32, i32, i32
  }
  func.func @transform_1(%arg0: i32, %arg1: i32) -> (i32, i32, i32) {
    %c1_i32 = arith.constant 1 : i32
    %0 = arith.addi %arg1, %c1_i32 : i32
    %c2_i32 = arith.constant 2 : i32
    %1 = arith.muli %0, %c2_i32 : i32
    %c0_i32 = arith.constant 0 : i32
    %c0_i32_0 = arith.constant 0 : i32
    return %arg0, %c0_i32, %1 : i32, i32, i32
  }
  func.func @transform_2(%arg0: i32, %arg1: i32) -> (i32, i32) {
    %c0_i32 = arith.constant 0 : i32
    %c0_i32_0 = arith.constant 0 : i32
    %c0_i32_1 = arith.constant 0 : i32
    return %c0_i32, %c0_i32_0 : i32, i32
  }
  func.func @transform_3(%arg0: i32, %arg1: i32) -> (i32, i32, i32) {
    %c0_i32 = arith.constant 0 : i32
    %c0_i32_0 = arith.constant 0 : i32
    return %arg0, %c0_i32, %arg1 : i32, i32, i32
  }
}

module attributes {stable_mosaic.version = 11 : i64} {
  func.func @_conv_kernel(%arg0: i32, %arg1: i32, %arg2: memref<2x4x256xf32, #tpu.memory_space<vmem>>, %arg3: memref<2x4x128xf32, #tpu.memory_space<vmem>>, %arg4: memref<4x36xf32, #tpu.memory_space<vmem>>, %arg5: memref<2x4x256xf32, #tpu.memory_space<vmem>>) attributes {dimension_semantics = [#tpu.dimension_semantics<parallel>, #tpu.dimension_semantics<parallel>], iteration_bounds = array<i64: 1, 1>, scalar_prefetch = 0 : i64, scratch_operands = 0 : i64, tpu.core_type = #tpu.core_type<tc>, window_params = [{transform_indices = @transform_0, window_bounds = array<i64: 2, 4, 256>}, {transform_indices = @transform_1, window_bounds = array<i64: 2, 4, 128>}, {pipeline_mode = #tpu.pipeline_mode<synchronous>, transform_indices = @transform_2, window_bounds = array<i64: 4, 36>}, {transform_indices = @transform_3, window_bounds = array<i64: 2, 4, 256>}]} {
    %c0 = arith.constant 0 : index
    %c0_0 = arith.constant 0 : index
    %0 = vector.load %arg4[%c0, %c0_0] : memref<4x36xf32, #tpu.memory_space<vmem>>, vector<4x36xf32>
    %c0_1 = arith.constant 0 : index
    %c0_2 = arith.constant 0 : index
    %c0_3 = arith.constant 0 : index
    %1 = vector.load %arg2[%c0_1, %c0_2, %c0_3] : memref<2x4x256xf32, #tpu.memory_space<vmem>>, vector<1x4x256xf32>
    %2 = vector.shape_cast %1 : vector<1x4x256xf32> to vector<4x256xf32>
    %c0_4 = arith.constant 0 : index
    %c0_5 = arith.constant 0 : index
    %c0_6 = arith.constant 0 : index
    %3 = vector.load %arg3[%c0_4, %c0_5, %c0_6] : memref<2x4x128xf32, #tpu.memory_space<vmem>>, vector<1x4x128xf32>
    %4 = vector.shape_cast %3 : vector<1x4x128xf32> to vector<4x128xf32>
    %5 = tpu.concatenate %2, %4 in 1 : vector<4x256xf32>, vector<4x128xf32> -> vector<4x384xf32>
    %6 = vector.extract_strided_slice %5 {offsets = [0, 0], sizes = [4, 256], strides = [1, 1]} : vector<4x384xf32> to vector<4x256xf32>
    %7 = vector.extract_strided_slice %5 {offsets = [0, 1], sizes = [4, 256], strides = [1, 1]} : vector<4x384xf32> to vector<4x256xf32>
    %8 = vector.extract_strided_slice %5 {offsets = [0, 2], sizes = [4, 256], strides = [1, 1]} : vector<4x384xf32> to vector<4x256xf32>
    %9 = vector.extract_strided_slice %5 {offsets = [0, 16], sizes = [4, 256], strides = [1, 1]} : vector<4x384xf32> to vector<4x256xf32>
    %10 = vector.extract_strided_slice %5 {offsets = [0, 17], sizes = [4, 256], strides = [1, 1]} : vector<4x384xf32> to vector<4x256xf32>
    %11 = vector.extract_strided_slice %5 {offsets = [0, 18], sizes = [4, 256], strides = [1, 1]} : vector<4x384xf32> to vector<4x256xf32>
    %12 = vector.extract_strided_slice %5 {offsets = [0, 32], sizes = [4, 256], strides = [1, 1]} : vector<4x384xf32> to vector<4x256xf32>
    %13 = vector.extract_strided_slice %5 {offsets = [0, 33], sizes = [4, 256], strides = [1, 1]} : vector<4x384xf32> to vector<4x256xf32>
    %14 = vector.extract_strided_slice %5 {offsets = [0, 34], sizes = [4, 256], strides = [1, 1]} : vector<4x384xf32> to vector<4x256xf32>
    %15 = tpu.concatenate %6, %7, %8, %9, %10, %11, %12, %13, %14 in 0 : vector<4x256xf32>, vector<4x256xf32>, vector<4x256xf32>, vector<4x256xf32>, vector<4x256xf32>, vector<4x256xf32>, vector<4x256xf32>, vector<4x256xf32>, vector<4x256xf32> -> vector<36x256xf32>
    %cst = arith.constant dense<0.000000e+00> : vector<4x256xf32>
    %16 = tpu.matmul %0, %15, %cst {dimension_numbers = #tpu.dot_dimension_numbers<[1], [0], [0], [1], [0, 0, 1, 1], [], []>} : vector<4x36xf32>, vector<36x256xf32>, vector<4x256xf32> -> vector<4x256xf32>
    %c0_7 = arith.constant 0 : index
    %c0_8 = arith.constant 0 : index
    %c0_9 = arith.constant 0 : index
    %17 = vector.load %arg5[%c0_7, %c0_8, %c0_9] : memref<2x4x256xf32, #tpu.memory_space<vmem>>, vector<1x4x256xf32>
    %18 = vector.shape_cast %17 : vector<1x4x256xf32> to vector<4x256xf32>
    %19 = vector.shape_cast %16 : vector<4x256xf32> to vector<1x4x256xf32>
    tpu.vector_store %arg5[%c0_7, %c0_8, %c0_9], %19 {strides = array<i32>} : memref<2x4x256xf32, #tpu.memory_space<vmem>>, vector<1x4x256xf32>,
    %c1 = arith.constant 1 : index
    %c0_10 = arith.constant 0 : index
    %c0_11 = arith.constant 0 : index
    %20 = vector.load %arg2[%c1, %c0_10, %c0_11] : memref<2x4x256xf32, #tpu.memory_space<vmem>>, vector<1x4x256xf32>
    %21 = vector.shape_cast %20 : vector<1x4x256xf32> to vector<4x256xf32>
    %c1_12 = arith.constant 1 : index
    %c0_13 = arith.constant 0 : index
    %c0_14 = arith.constant 0 : index
    %22 = vector.load %arg3[%c1_12, %c0_13, %c0_14] : memref<2x4x128xf32, #tpu.memory_space<vmem>>, vector<1x4x128xf32>
    %23 = vector.shape_cast %22 : vector<1x4x128xf32> to vector<4x128xf32>
    %24 = tpu.concatenate %21, %23 in 1 : vector<4x256xf32>, vector<4x128xf32> -> vector<4x384xf32>
    %25 = vector.extract_strided_slice %24 {offsets = [0, 0], sizes = [4, 256], strides = [1, 1]} : vector<4x384xf32> to vector<4x256xf32>
    %26 = vector.extract_strided_slice %24 {offsets = [0, 1], sizes = [4, 256], strides = [1, 1]} : vector<4x384xf32> to vector<4x256xf32>
    %27 = vector.extract_strided_slice %24 {offsets = [0, 2], sizes = [4, 256], strides = [1, 1]} : vector<4x384xf32> to vector<4x256xf32>
    %28 = vector.extract_strided_slice %24 {offsets = [0, 16], sizes = [4, 256], strides = [1, 1]} : vector<4x384xf32> to vector<4x256xf32>
    %29 = vector.extract_strided_slice %24 {offsets = [0, 17], sizes = [4, 256], strides = [1, 1]} : vector<4x384xf32> to vector<4x256xf32>
    %30 = vector.extract_strided_slice %24 {offsets = [0, 18], sizes = [4, 256], strides = [1, 1]} : vector<4x384xf32> to vector<4x256xf32>
    %31 = vector.extract_strided_slice %24 {offsets = [0, 32], sizes = [4, 256], strides = [1, 1]} : vector<4x384xf32> to vector<4x256xf32>
    %32 = vector.extract_strided_slice %24 {offsets = [0, 33], sizes = [4, 256], strides = [1, 1]} : vector<4x384xf32> to vector<4x256xf32>
    %33 = vector.extract_strided_slice %24 {offsets = [0, 34], sizes = [4, 256], strides = [1, 1]} : vector<4x384xf32> to vector<4x256xf32>
    %34 = tpu.concatenate %25, %26, %27, %28, %29, %30, %31, %32, %33 in 0 : vector<4x256xf32>, vector<4x256xf32>, vector<4x256xf32>, vector<4x256xf32>, vector<4x256xf32>, vector<4x256xf32>, vector<4x256xf32>, vector<4x256xf32>, vector<4x256xf32> -> vector<36x256xf32>
    %cst_15 = arith.constant dense<0.000000e+00> : vector<4x256xf32>
    %35 = tpu.matmul %0, %34, %cst_15 {dimension_numbers = #tpu.dot_dimension_numbers<[1], [0], [0], [1], [0, 0, 1, 1], [], []>} : vector<4x36xf32>, vector<36x256xf32>, vector<4x256xf32> -> vector<4x256xf32>
    %c1_16 = arith.constant 1 : index
    %c0_17 = arith.constant 0 : index
    %c0_18 = arith.constant 0 : index
    %36 = vector.load %arg5[%c1_16, %c0_17, %c0_18] : memref<2x4x256xf32, #tpu.memory_space<vmem>>, vector<1x4x256xf32>
    %37 = vector.shape_cast %36 : vector<1x4x256xf32> to vector<4x256xf32>
    %38 = vector.shape_cast %35 : vector<4x256xf32> to vector<1x4x256xf32>
    tpu.vector_store %arg5[%c1_16, %c0_17, %c0_18], %38 {strides = array<i32>} : memref<2x4x256xf32, #tpu.memory_space<vmem>>, vector<1x4x256xf32>,
    return
  }
  func.func @transform_0(%arg0: i32, %arg1: i32) -> (i32, i32, i32) {
    %c0_i32 = arith.constant 0 : i32
    %c0_i32_0 = arith.constant 0 : i32
    return %arg0, %c0_i32, %arg1 : i32, i32, i32
  }
  func.func @transform_1(%arg0: i32, %arg1: i32) -> (i32, i32, i32) {
    %c1_i32 = arith.constant 1 : i32
    %0 = arith.addi %arg1, %c1_i32 : i32
    %c2_i32 = arith.constant 2 : i32
    %1 = arith.muli %0, %c2_i32 : i32
    %c0_i32 = arith.constant 0 : i32
    %c0_i32_0 = arith.constant 0 : i32
    return %arg0, %c0_i32, %1 : i32, i32, i32
  }
  func.func @transform_2(%arg0: i32, %arg1: i32) -> (i32, i32) {
    %c0_i32 = arith.constant 0 : i32
    %c0_i32_0 = arith.constant 0 : i32
    %c0_i32_1 = arith.constant 0 : i32
    return %c0_i32, %c0_i32_0 : i32, i32
  }
  func.func @transform_3(%arg0: i32, %arg1: i32) -> (i32, i32, i32) {
    %c0_i32 = arith.constant 0 : i32
    %c0_i32_0 = arith.constant 0 : i32
    return %arg0, %c0_i32, %arg1 : i32, i32, i32
  }
}

module attributes {stable_mosaic.version = 11 : i64} {
  func.func @_conv_kernel(%arg0: i32, %arg1: i32, %arg2: memref<2x4x512xf32, #tpu.memory_space<vmem>>, %arg3: memref<2x4x128xf32, #tpu.memory_space<vmem>>, %arg4: memref<4x36xf32, #tpu.memory_space<vmem>>, %arg5: memref<2x4x512xf32, #tpu.memory_space<vmem>>) attributes {dimension_semantics = [#tpu.dimension_semantics<parallel>, #tpu.dimension_semantics<parallel>], iteration_bounds = array<i64: 1, 1>, scalar_prefetch = 0 : i64, scratch_operands = 0 : i64, tpu.core_type = #tpu.core_type<tc>, window_params = [{transform_indices = @transform_0, window_bounds = array<i64: 2, 4, 512>}, {transform_indices = @transform_1, window_bounds = array<i64: 2, 4, 128>}, {pipeline_mode = #tpu.pipeline_mode<synchronous>, transform_indices = @transform_2, window_bounds = array<i64: 4, 36>}, {transform_indices = @transform_3, window_bounds = array<i64: 2, 4, 512>}]} {
    %c0 = arith.constant 0 : index
    %c0_0 = arith.constant 0 : index
    %0 = vector.load %arg4[%c0, %c0_0] : memref<4x36xf32, #tpu.memory_space<vmem>>, vector<4x36xf32>
    %c0_1 = arith.constant 0 : index
    %c0_2 = arith.constant 0 : index
    %c0_3 = arith.constant 0 : index
    %1 = vector.load %arg2[%c0_1, %c0_2, %c0_3] : memref<2x4x512xf32, #tpu.memory_space<vmem>>, vector<1x4x512xf32>
    %2 = vector.shape_cast %1 : vector<1x4x512xf32> to vector<4x512xf32>
    %c0_4 = arith.constant 0 : index
    %c0_5 = arith.constant 0 : index
    %c0_6 = arith.constant 0 : index
    %3 = vector.load %arg3[%c0_4, %c0_5, %c0_6] : memref<2x4x128xf32, #tpu.memory_space<vmem>>, vector<1x4x128xf32>
    %4 = vector.shape_cast %3 : vector<1x4x128xf32> to vector<4x128xf32>
    %5 = tpu.concatenate %2, %4 in 1 : vector<4x512xf32>, vector<4x128xf32> -> vector<4x640xf32>
    %6 = vector.extract_strided_slice %5 {offsets = [0, 0], sizes = [4, 512], strides = [1, 1]} : vector<4x640xf32> to vector<4x512xf32>
    %7 = vector.extract_strided_slice %5 {offsets = [0, 1], sizes = [4, 512], strides = [1, 1]} : vector<4x640xf32> to vector<4x512xf32>
    %8 = vector.extract_strided_slice %5 {offsets = [0, 2], sizes = [4, 512], strides = [1, 1]} : vector<4x640xf32> to vector<4x512xf32>
    %9 = vector.extract_strided_slice %5 {offsets = [0, 20], sizes = [4, 512], strides = [1, 1]} : vector<4x640xf32> to vector<4x512xf32>
    %10 = vector.extract_strided_slice %5 {offsets = [0, 21], sizes = [4, 512], strides = [1, 1]} : vector<4x640xf32> to vector<4x512xf32>
    %11 = vector.extract_strided_slice %5 {offsets = [0, 22], sizes = [4, 512], strides = [1, 1]} : vector<4x640xf32> to vector<4x512xf32>
    %12 = vector.extract_strided_slice %5 {offsets = [0, 40], sizes = [4, 512], strides = [1, 1]} : vector<4x640xf32> to vector<4x512xf32>
    %13 = vector.extract_strided_slice %5 {offsets = [0, 41], sizes = [4, 512], strides = [1, 1]} : vector<4x640xf32> to vector<4x512xf32>
    %14 = vector.extract_strided_slice %5 {offsets = [0, 42], sizes = [4, 512], strides = [1, 1]} : vector<4x640xf32> to vector<4x512xf32>
    %15 = tpu.concatenate %6, %7, %8, %9, %10, %11, %12, %13, %14 in 0 : vector<4x512xf32>, vector<4x512xf32>, vector<4x512xf32>, vector<4x512xf32>, vector<4x512xf32>, vector<4x512xf32>, vector<4x512xf32>, vector<4x512xf32>, vector<4x512xf32> -> vector<36x512xf32>
    %cst = arith.constant dense<0.000000e+00> : vector<4x512xf32>
    %16 = tpu.matmul %0, %15, %cst {dimension_numbers = #tpu.dot_dimension_numbers<[1], [0], [0], [1], [0, 0, 1, 1], [], []>} : vector<4x36xf32>, vector<36x512xf32>, vector<4x512xf32> -> vector<4x512xf32>
    %c0_7 = arith.constant 0 : index
    %c0_8 = arith.constant 0 : index
    %c0_9 = arith.constant 0 : index
    %17 = vector.load %arg5[%c0_7, %c0_8, %c0_9] : memref<2x4x512xf32, #tpu.memory_space<vmem>>, vector<1x4x512xf32>
    %18 = vector.shape_cast %17 : vector<1x4x512xf32> to vector<4x512xf32>
    %19 = vector.shape_cast %16 : vector<4x512xf32> to vector<1x4x512xf32>
    tpu.vector_store %arg5[%c0_7, %c0_8, %c0_9], %19 {strides = array<i32>} : memref<2x4x512xf32, #tpu.memory_space<vmem>>, vector<1x4x512xf32>,
    %c1 = arith.constant 1 : index
    %c0_10 = arith.constant 0 : index
    %c0_11 = arith.constant 0 : index
    %20 = vector.load %arg2[%c1, %c0_10, %c0_11] : memref<2x4x512xf32, #tpu.memory_space<vmem>>, vector<1x4x512xf32>
    %21 = vector.shape_cast %20 : vector<1x4x512xf32> to vector<4x512xf32>
    %c1_12 = arith.constant 1 : index
    %c0_13 = arith.constant 0 : index
    %c0_14 = arith.constant 0 : index
    %22 = vector.load %arg3[%c1_12, %c0_13, %c0_14] : memref<2x4x128xf32, #tpu.memory_space<vmem>>, vector<1x4x128xf32>
    %23 = vector.shape_cast %22 : vector<1x4x128xf32> to vector<4x128xf32>
    %24 = tpu.concatenate %21, %23 in 1 : vector<4x512xf32>, vector<4x128xf32> -> vector<4x640xf32>
    %25 = vector.extract_strided_slice %24 {offsets = [0, 0], sizes = [4, 512], strides = [1, 1]} : vector<4x640xf32> to vector<4x512xf32>
    %26 = vector.extract_strided_slice %24 {offsets = [0, 1], sizes = [4, 512], strides = [1, 1]} : vector<4x640xf32> to vector<4x512xf32>
    %27 = vector.extract_strided_slice %24 {offsets = [0, 2], sizes = [4, 512], strides = [1, 1]} : vector<4x640xf32> to vector<4x512xf32>
    %28 = vector.extract_strided_slice %24 {offsets = [0, 20], sizes = [4, 512], strides = [1, 1]} : vector<4x640xf32> to vector<4x512xf32>
    %29 = vector.extract_strided_slice %24 {offsets = [0, 21], sizes = [4, 512], strides = [1, 1]} : vector<4x640xf32> to vector<4x512xf32>
    %30 = vector.extract_strided_slice %24 {offsets = [0, 22], sizes = [4, 512], strides = [1, 1]} : vector<4x640xf32> to vector<4x512xf32>
    %31 = vector.extract_strided_slice %24 {offsets = [0, 40], sizes = [4, 512], strides = [1, 1]} : vector<4x640xf32> to vector<4x512xf32>
    %32 = vector.extract_strided_slice %24 {offsets = [0, 41], sizes = [4, 512], strides = [1, 1]} : vector<4x640xf32> to vector<4x512xf32>
    %33 = vector.extract_strided_slice %24 {offsets = [0, 42], sizes = [4, 512], strides = [1, 1]} : vector<4x640xf32> to vector<4x512xf32>
    %34 = tpu.concatenate %25, %26, %27, %28, %29, %30, %31, %32, %33 in 0 : vector<4x512xf32>, vector<4x512xf32>, vector<4x512xf32>, vector<4x512xf32>, vector<4x512xf32>, vector<4x512xf32>, vector<4x512xf32>, vector<4x512xf32>, vector<4x512xf32> -> vector<36x512xf32>
    %cst_15 = arith.constant dense<0.000000e+00> : vector<4x512xf32>
    %35 = tpu.matmul %0, %34, %cst_15 {dimension_numbers = #tpu.dot_dimension_numbers<[1], [0], [0], [1], [0, 0, 1, 1], [], []>} : vector<4x36xf32>, vector<36x512xf32>, vector<4x512xf32> -> vector<4x512xf32>
    %c1_16 = arith.constant 1 : index
    %c0_17 = arith.constant 0 : index
    %c0_18 = arith.constant 0 : index
    %36 = vector.load %arg5[%c1_16, %c0_17, %c0_18] : memref<2x4x512xf32, #tpu.memory_space<vmem>>, vector<1x4x512xf32>
    %37 = vector.shape_cast %36 : vector<1x4x512xf32> to vector<4x512xf32>
    %38 = vector.shape_cast %35 : vector<4x512xf32> to vector<1x4x512xf32>
    tpu.vector_store %arg5[%c1_16, %c0_17, %c0_18], %38 {strides = array<i32>} : memref<2x4x512xf32, #tpu.memory_space<vmem>>, vector<1x4x512xf32>,
    return
  }
  func.func @transform_0(%arg0: i32, %arg1: i32) -> (i32, i32, i32) {
    %c0_i32 = arith.constant 0 : i32
    %c0_i32_0 = arith.constant 0 : i32
    return %arg0, %c0_i32, %arg1 : i32, i32, i32
  }
  func.func @transform_1(%arg0: i32, %arg1: i32) -> (i32, i32, i32) {
    %c1_i32 = arith.constant 1 : i32
    %0 = arith.addi %arg1, %c1_i32 : i32
    %c4_i32 = arith.constant 4 : i32
    %1 = arith.muli %0, %c4_i32 : i32
    %c0_i32 = arith.constant 0 : i32
    %c0_i32_0 = arith.constant 0 : i32
    return %arg0, %c0_i32, %1 : i32, i32, i32
  }
  func.func @transform_2(%arg0: i32, %arg1: i32) -> (i32, i32) {
    %c0_i32 = arith.constant 0 : i32
    %c0_i32_0 = arith.constant 0 : i32
    %c0_i32_1 = arith.constant 0 : i32
    return %c0_i32, %c0_i32_0 : i32, i32
  }
  func.func @transform_3(%arg0: i32, %arg1: i32) -> (i32, i32, i32) {
    %c0_i32 = arith.constant 0 : i32
    %c0_i32_0 = arith.constant 0 : i32
    return %arg0, %c0_i32, %arg1 : i32, i32, i32
  }
}

module attributes {stable_mosaic.version = 11 : i64} {
  func.func @_conv_kernel(%arg0: i32, %arg1: i32, %arg2: memref<2x4x640xf32, #tpu.memory_space<vmem>>, %arg3: memref<2x4x128xf32, #tpu.memory_space<vmem>>, %arg4: memref<4x36xf32, #tpu.memory_space<vmem>>, %arg5: memref<2x4x640xf32, #tpu.memory_space<vmem>>) attributes {dimension_semantics = [#tpu.dimension_semantics<parallel>, #tpu.dimension_semantics<parallel>], iteration_bounds = array<i64: 1, 1>, scalar_prefetch = 0 : i64, scratch_operands = 0 : i64, tpu.core_type = #tpu.core_type<tc>, window_params = [{transform_indices = @transform_0, window_bounds = array<i64: 2, 4, 640>}, {transform_indices = @transform_1, window_bounds = array<i64: 2, 4, 128>}, {pipeline_mode = #tpu.pipeline_mode<synchronous>, transform_indices = @transform_2, window_bounds = array<i64: 4, 36>}, {transform_indices = @transform_3, window_bounds = array<i64: 2, 4, 640>}]} {
    %c0 = arith.constant 0 : index
    %c0_0 = arith.constant 0 : index
    %0 = vector.load %arg4[%c0, %c0_0] : memref<4x36xf32, #tpu.memory_space<vmem>>, vector<4x36xf32>
    %c0_1 = arith.constant 0 : index
    %c0_2 = arith.constant 0 : index
    %c0_3 = arith.constant 0 : index
    %1 = vector.load %arg2[%c0_1, %c0_2, %c0_3] : memref<2x4x640xf32, #tpu.memory_space<vmem>>, vector<1x4x640xf32>
    %2 = vector.shape_cast %1 : vector<1x4x640xf32> to vector<4x640xf32>
    %c0_4 = arith.constant 0 : index
    %c0_5 = arith.constant 0 : index
    %c0_6 = arith.constant 0 : index
    %3 = vector.load %arg3[%c0_4, %c0_5, %c0_6] : memref<2x4x128xf32, #tpu.memory_space<vmem>>, vector<1x4x128xf32>
    %4 = vector.shape_cast %3 : vector<1x4x128xf32> to vector<4x128xf32>
    %5 = tpu.concatenate %2, %4 in 1 : vector<4x640xf32>, vector<4x128xf32> -> vector<4x768xf32>
    %6 = vector.extract_strided_slice %5 {offsets = [0, 0], sizes = [4, 640], strides = [1, 1]} : vector<4x768xf32> to vector<4x640xf32>
    %7 = vector.extract_strided_slice %5 {offsets = [0, 1], sizes = [4, 640], strides = [1, 1]} : vector<4x768xf32> to vector<4x640xf32>
    %8 = vector.extract_strided_slice %5 {offsets = [0, 2], sizes = [4, 640], strides = [1, 1]} : vector<4x768xf32> to vector<4x640xf32>
    %9 = vector.extract_strided_slice %5 {offsets = [0, 25], sizes = [4, 640], strides = [1, 1]} : vector<4x768xf32> to vector<4x640xf32>
    %10 = vector.extract_strided_slice %5 {offsets = [0, 26], sizes = [4, 640], strides = [1, 1]} : vector<4x768xf32> to vector<4x640xf32>
    %11 = vector.extract_strided_slice %5 {offsets = [0, 27], sizes = [4, 640], strides = [1, 1]} : vector<4x768xf32> to vector<4x640xf32>
    %12 = vector.extract_strided_slice %5 {offsets = [0, 50], sizes = [4, 640], strides = [1, 1]} : vector<4x768xf32> to vector<4x640xf32>
    %13 = vector.extract_strided_slice %5 {offsets = [0, 51], sizes = [4, 640], strides = [1, 1]} : vector<4x768xf32> to vector<4x640xf32>
    %14 = vector.extract_strided_slice %5 {offsets = [0, 52], sizes = [4, 640], strides = [1, 1]} : vector<4x768xf32> to vector<4x640xf32>
    %15 = tpu.concatenate %6, %7, %8, %9, %10, %11, %12, %13, %14 in 0 : vector<4x640xf32>, vector<4x640xf32>, vector<4x640xf32>, vector<4x640xf32>, vector<4x640xf32>, vector<4x640xf32>, vector<4x640xf32>, vector<4x640xf32>, vector<4x640xf32> -> vector<36x640xf32>
    %cst = arith.constant dense<0.000000e+00> : vector<4x640xf32>
    %16 = tpu.matmul %0, %15, %cst {dimension_numbers = #tpu.dot_dimension_numbers<[1], [0], [0], [1], [0, 0, 1, 1], [], []>} : vector<4x36xf32>, vector<36x640xf32>, vector<4x640xf32> -> vector<4x640xf32>
    %c0_7 = arith.constant 0 : index
    %c0_8 = arith.constant 0 : index
    %c0_9 = arith.constant 0 : index
    %17 = vector.load %arg5[%c0_7, %c0_8, %c0_9] : memref<2x4x640xf32, #tpu.memory_space<vmem>>, vector<1x4x640xf32>
    %18 = vector.shape_cast %17 : vector<1x4x640xf32> to vector<4x640xf32>
    %19 = vector.shape_cast %16 : vector<4x640xf32> to vector<1x4x640xf32>
    tpu.vector_store %arg5[%c0_7, %c0_8, %c0_9], %19 {strides = array<i32>} : memref<2x4x640xf32, #tpu.memory_space<vmem>>, vector<1x4x640xf32>,
    %c1 = arith.constant 1 : index
    %c0_10 = arith.constant 0 : index
    %c0_11 = arith.constant 0 : index
    %20 = vector.load %arg2[%c1, %c0_10, %c0_11] : memref<2x4x640xf32, #tpu.memory_space<vmem>>, vector<1x4x640xf32>
    %21 = vector.shape_cast %20 : vector<1x4x640xf32> to vector<4x640xf32>
    %c1_12 = arith.constant 1 : index
    %c0_13 = arith.constant 0 : index
    %c0_14 = arith.constant 0 : index
    %22 = vector.load %arg3[%c1_12, %c0_13, %c0_14] : memref<2x4x128xf32, #tpu.memory_space<vmem>>, vector<1x4x128xf32>
    %23 = vector.shape_cast %22 : vector<1x4x128xf32> to vector<4x128xf32>
    %24 = tpu.concatenate %21, %23 in 1 : vector<4x640xf32>, vector<4x128xf32> -> vector<4x768xf32>
    %25 = vector.extract_strided_slice %24 {offsets = [0, 0], sizes = [4, 640], strides = [1, 1]} : vector<4x768xf32> to vector<4x640xf32>
    %26 = vector.extract_strided_slice %24 {offsets = [0, 1], sizes = [4, 640], strides = [1, 1]} : vector<4x768xf32> to vector<4x640xf32>
    %27 = vector.extract_strided_slice %24 {offsets = [0, 2], sizes = [4, 640], strides = [1, 1]} : vector<4x768xf32> to vector<4x640xf32>
    %28 = vector.extract_strided_slice %24 {offsets = [0, 25], sizes = [4, 640], strides = [1, 1]} : vector<4x768xf32> to vector<4x640xf32>
    %29 = vector.extract_strided_slice %24 {offsets = [0, 26], sizes = [4, 640], strides = [1, 1]} : vector<4x768xf32> to vector<4x640xf32>
    %30 = vector.extract_strided_slice %24 {offsets = [0, 27], sizes = [4, 640], strides = [1, 1]} : vector<4x768xf32> to vector<4x640xf32>
    %31 = vector.extract_strided_slice %24 {offsets = [0, 50], sizes = [4, 640], strides = [1, 1]} : vector<4x768xf32> to vector<4x640xf32>
    %32 = vector.extract_strided_slice %24 {offsets = [0, 51], sizes = [4, 640], strides = [1, 1]} : vector<4x768xf32> to vector<4x640xf32>
    %33 = vector.extract_strided_slice %24 {offsets = [0, 52], sizes = [4, 640], strides = [1, 1]} : vector<4x768xf32> to vector<4x640xf32>
    %34 = tpu.concatenate %25, %26, %27, %28, %29, %30, %31, %32, %33 in 0 : vector<4x640xf32>, vector<4x640xf32>, vector<4x640xf32>, vector<4x640xf32>, vector<4x640xf32>, vector<4x640xf32>, vector<4x640xf32>, vector<4x640xf32>, vector<4x640xf32> -> vector<36x640xf32>
    %cst_15 = arith.constant dense<0.000000e+00> : vector<4x640xf32>
    %35 = tpu.matmul %0, %34, %cst_15 {dimension_numbers = #tpu.dot_dimension_numbers<[1], [0], [0], [1], [0, 0, 1, 1], [], []>} : vector<4x36xf32>, vector<36x640xf32>, vector<4x640xf32> -> vector<4x640xf32>
    %c1_16 = arith.constant 1 : index
    %c0_17 = arith.constant 0 : index
    %c0_18 = arith.constant 0 : index
    %36 = vector.load %arg5[%c1_16, %c0_17, %c0_18] : memref<2x4x640xf32, #tpu.memory_space<vmem>>, vector<1x4x640xf32>
    %37 = vector.shape_cast %36 : vector<1x4x640xf32> to vector<4x640xf32>
    %38 = vector.shape_cast %35 : vector<4x640xf32> to vector<1x4x640xf32>
    tpu.vector_store %arg5[%c1_16, %c0_17, %c0_18], %38 {strides = array<i32>} : memref<2x4x640xf32, #tpu.memory_space<vmem>>, vector<1x4x640xf32>,
    return
  }
  func.func @transform_0(%arg0: i32, %arg1: i32) -> (i32, i32, i32) {
    %c0_i32 = arith.constant 0 : i32
    %c0_i32_0 = arith.constant 0 : i32
    return %arg0, %c0_i32, %arg1 : i32, i32, i32
  }
  func.func @transform_1(%arg0: i32, %arg1: i32) -> (i32, i32, i32) {
    %c1_i32 = arith.constant 1 : i32
    %0 = arith.addi %arg1, %c1_i32 : i32
    %c5_i32 = arith.constant 5 : i32
    %1 = arith.muli %0, %c5_i32 : i32
    %c0_i32 = arith.constant 0 : i32
    %c0_i32_0 = arith.constant 0 : i32
    return %arg0, %c0_i32, %1 : i32, i32, i32
  }
  func.func @transform_2(%arg0: i32, %arg1: i32) -> (i32, i32) {
    %c0_i32 = arith.constant 0 : i32
    %c0_i32_0 = arith.constant 0 : i32
    %c0_i32_1 = arith.constant 0 : i32
    return %c0_i32, %c0_i32_0 : i32, i32
  }
  func.func @transform_3(%arg0: i32, %arg1: i32) -> (i32, i32, i32) {
    %c0_i32 = arith.constant 0 : i32
    %c0_i32_0 = arith.constant 0 : i32
    return %arg0, %c0_i32, %arg1 : i32, i32, i32
  }
}

module attributes {stable_mosaic.version = 11 : i64} {
  func.func @_conv_kernel(%arg0: i32, %arg1: i32, %arg2: memref<2x4x1024xf32, #tpu.memory_space<vmem>>, %arg3: memref<2x4x128xf32, #tpu.memory_space<vmem>>, %arg4: memref<4x36xf32, #tpu.memory_space<vmem>>, %arg5: memref<2x4x1024xf32, #tpu.memory_space<vmem>>) attributes {dimension_semantics = [#tpu.dimension_semantics<parallel>, #tpu.dimension_semantics<parallel>], iteration_bounds = array<i64: 1, 1>, scalar_prefetch = 0 : i64, scratch_operands = 0 : i64, tpu.core_type = #tpu.core_type<tc>, window_params = [{transform_indices = @transform_0, window_bounds = array<i64: 2, 4, 1024>}, {transform_indices = @transform_1, window_bounds = array<i64: 2, 4, 128>}, {pipeline_mode = #tpu.pipeline_mode<synchronous>, transform_indices = @transform_2, window_bounds = array<i64: 4, 36>}, {transform_indices = @transform_3, window_bounds = array<i64: 2, 4, 1024>}]} {
    %c0 = arith.constant 0 : index
    %c0_0 = arith.constant 0 : index
    %0 = vector.load %arg4[%c0, %c0_0] : memref<4x36xf32, #tpu.memory_space<vmem>>, vector<4x36xf32>
    %c0_1 = arith.constant 0 : index
    %c0_2 = arith.constant 0 : index
    %c0_3 = arith.constant 0 : index
    %1 = vector.load %arg2[%c0_1, %c0_2, %c0_3] : memref<2x4x1024xf32, #tpu.memory_space<vmem>>, vector<1x4x1024xf32>
    %2 = vector.shape_cast %1 : vector<1x4x1024xf32> to vector<4x1024xf32>
    %c0_4 = arith.constant 0 : index
    %c0_5 = arith.constant 0 : index
    %c0_6 = arith.constant 0 : index
    %3 = vector.load %arg3[%c0_4, %c0_5, %c0_6] : memref<2x4x128xf32, #tpu.memory_space<vmem>>, vector<1x4x128xf32>
    %4 = vector.shape_cast %3 : vector<1x4x128xf32> to vector<4x128xf32>
    %5 = tpu.concatenate %2, %4 in 1 : vector<4x1024xf32>, vector<4x128xf32> -> vector<4x1152xf32>
    %6 = vector.extract_strided_slice %5 {offsets = [0, 0], sizes = [4, 1024], strides = [1, 1]} : vector<4x1152xf32> to vector<4x1024xf32>
    %7 = vector.extract_strided_slice %5 {offsets = [0, 1], sizes = [4, 1024], strides = [1, 1]} : vector<4x1152xf32> to vector<4x1024xf32>
    %8 = vector.extract_strided_slice %5 {offsets = [0, 2], sizes = [4, 1024], strides = [1, 1]} : vector<4x1152xf32> to vector<4x1024xf32>
    %9 = vector.extract_strided_slice %5 {offsets = [0, 32], sizes = [4, 1024], strides = [1, 1]} : vector<4x1152xf32> to vector<4x1024xf32>
    %10 = vector.extract_strided_slice %5 {offsets = [0, 33], sizes = [4, 1024], strides = [1, 1]} : vector<4x1152xf32> to vector<4x1024xf32>
    %11 = vector.extract_strided_slice %5 {offsets = [0, 34], sizes = [4, 1024], strides = [1, 1]} : vector<4x1152xf32> to vector<4x1024xf32>
    %12 = vector.extract_strided_slice %5 {offsets = [0, 64], sizes = [4, 1024], strides = [1, 1]} : vector<4x1152xf32> to vector<4x1024xf32>
    %13 = vector.extract_strided_slice %5 {offsets = [0, 65], sizes = [4, 1024], strides = [1, 1]} : vector<4x1152xf32> to vector<4x1024xf32>
    %14 = vector.extract_strided_slice %5 {offsets = [0, 66], sizes = [4, 1024], strides = [1, 1]} : vector<4x1152xf32> to vector<4x1024xf32>
    %15 = tpu.concatenate %6, %7, %8, %9, %10, %11, %12, %13, %14 in 0 : vector<4x1024xf32>, vector<4x1024xf32>, vector<4x1024xf32>, vector<4x1024xf32>, vector<4x1024xf32>, vector<4x1024xf32>, vector<4x1024xf32>, vector<4x1024xf32>, vector<4x1024xf32> -> vector<36x1024xf32>
    %cst = arith.constant dense<0.000000e+00> : vector<4x1024xf32>
    %16 = tpu.matmul %0, %15, %cst {dimension_numbers = #tpu.dot_dimension_numbers<[1], [0], [0], [1], [0, 0, 1, 1], [], []>} : vector<4x36xf32>, vector<36x1024xf32>, vector<4x1024xf32> -> vector<4x1024xf32>
    %c0_7 = arith.constant 0 : index
    %c0_8 = arith.constant 0 : index
    %c0_9 = arith.constant 0 : index
    %17 = vector.load %arg5[%c0_7, %c0_8, %c0_9] : memref<2x4x1024xf32, #tpu.memory_space<vmem>>, vector<1x4x1024xf32>
    %18 = vector.shape_cast %17 : vector<1x4x1024xf32> to vector<4x1024xf32>
    %19 = vector.shape_cast %16 : vector<4x1024xf32> to vector<1x4x1024xf32>
    tpu.vector_store %arg5[%c0_7, %c0_8, %c0_9], %19 {strides = array<i32>} : memref<2x4x1024xf32, #tpu.memory_space<vmem>>, vector<1x4x1024xf32>,
    %c1 = arith.constant 1 : index
    %c0_10 = arith.constant 0 : index
    %c0_11 = arith.constant 0 : index
    %20 = vector.load %arg2[%c1, %c0_10, %c0_11] : memref<2x4x1024xf32, #tpu.memory_space<vmem>>, vector<1x4x1024xf32>
    %21 = vector.shape_cast %20 : vector<1x4x1024xf32> to vector<4x1024xf32>
    %c1_12 = arith.constant 1 : index
    %c0_13 = arith.constant 0 : index
    %c0_14 = arith.constant 0 : index
    %22 = vector.load %arg3[%c1_12, %c0_13, %c0_14] : memref<2x4x128xf32, #tpu.memory_space<vmem>>, vector<1x4x128xf32>
    %23 = vector.shape_cast %22 : vector<1x4x128xf32> to vector<4x128xf32>
    %24 = tpu.concatenate %21, %23 in 1 : vector<4x1024xf32>, vector<4x128xf32> -> vector<4x1152xf32>
    %25 = vector.extract_strided_slice %24 {offsets = [0, 0], sizes = [4, 1024], strides = [1, 1]} : vector<4x1152xf32> to vector<4x1024xf32>
    %26 = vector.extract_strided_slice %24 {offsets = [0, 1], sizes = [4, 1024], strides = [1, 1]} : vector<4x1152xf32> to vector<4x1024xf32>
    %27 = vector.extract_strided_slice %24 {offsets = [0, 2], sizes = [4, 1024], strides = [1, 1]} : vector<4x1152xf32> to vector<4x1024xf32>
    %28 = vector.extract_strided_slice %24 {offsets = [0, 32], sizes = [4, 1024], strides = [1, 1]} : vector<4x1152xf32> to vector<4x1024xf32>
    %29 = vector.extract_strided_slice %24 {offsets = [0, 33], sizes = [4, 1024], strides = [1, 1]} : vector<4x1152xf32> to vector<4x1024xf32>
    %30 = vector.extract_strided_slice %24 {offsets = [0, 34], sizes = [4, 1024], strides = [1, 1]} : vector<4x1152xf32> to vector<4x1024xf32>
    %31 = vector.extract_strided_slice %24 {offsets = [0, 64], sizes = [4, 1024], strides = [1, 1]} : vector<4x1152xf32> to vector<4x1024xf32>
    %32 = vector.extract_strided_slice %24 {offsets = [0, 65], sizes = [4, 1024], strides = [1, 1]} : vector<4x1152xf32> to vector<4x1024xf32>
    %33 = vector.extract_strided_slice %24 {offsets = [0, 66], sizes = [4, 1024], strides = [1, 1]} : vector<4x1152xf32> to vector<4x1024xf32>
    %34 = tpu.concatenate %25, %26, %27, %28, %29, %30, %31, %32, %33 in 0 : vector<4x1024xf32>, vector<4x1024xf32>, vector<4x1024xf32>, vector<4x1024xf32>, vector<4x1024xf32>, vector<4x1024xf32>, vector<4x1024xf32>, vector<4x1024xf32>, vector<4x1024xf32> -> vector<36x1024xf32>
    %cst_15 = arith.constant dense<0.000000e+00> : vector<4x1024xf32>
    %35 = tpu.matmul %0, %34, %cst_15 {dimension_numbers = #tpu.dot_dimension_numbers<[1], [0], [0], [1], [0, 0, 1, 1], [], []>} : vector<4x36xf32>, vector<36x1024xf32>, vector<4x1024xf32> -> vector<4x1024xf32>
    %c1_16 = arith.constant 1 : index
    %c0_17 = arith.constant 0 : index
    %c0_18 = arith.constant 0 : index
    %36 = vector.load %arg5[%c1_16, %c0_17, %c0_18] : memref<2x4x1024xf32, #tpu.memory_space<vmem>>, vector<1x4x1024xf32>
    %37 = vector.shape_cast %36 : vector<1x4x1024xf32> to vector<4x1024xf32>
    %38 = vector.shape_cast %35 : vector<4x1024xf32> to vector<1x4x1024xf32>
    tpu.vector_store %arg5[%c1_16, %c0_17, %c0_18], %38 {strides = array<i32>} : memref<2x4x1024xf32, #tpu.memory_space<vmem>>, vector<1x4x1024xf32>,
    return
  }
  func.func @transform_0(%arg0: i32, %arg1: i32) -> (i32, i32, i32) {
    %c0_i32 = arith.constant 0 : i32
    %c0_i32_0 = arith.constant 0 : i32
    return %arg0, %c0_i32, %arg1 : i32, i32, i32
  }
  func.func @transform_1(%arg0: i32, %arg1: i32) -> (i32, i32, i32) {
    %c1_i32 = arith.constant 1 : i32
    %0 = arith.addi %arg1, %c1_i32 : i32
    %c8_i32 = arith.constant 8 : i32
    %1 = arith.muli %0, %c8_i32 : i32
    %c0_i32 = arith.constant 0 : i32
    %c0_i32_0 = arith.constant 0 : i32
    return %arg0, %c0_i32, %1 : i32, i32, i32
  }
  func.func @transform_2(%arg0: i32, %arg1: i32) -> (i32, i32) {
    %c0_i32 = arith.constant 0 : i32
    %c0_i32_0 = arith.constant 0 : i32
    %c0_i32_1 = arith.constant 0 : i32
    return %c0_i32, %c0_i32_0 : i32, i32
  }
  func.func @transform_3(%arg0: i32, %arg1: i32) -> (i32, i32, i32) {
    %c0_i32 = arith.constant 0 : i32
    %c0_i32_0 = arith.constant 0 : i32
    return %arg0, %c0_i32, %arg1 : i32, i32, i32
  }
}

module attributes {stable_mosaic.version = 11 : i64} {
  func.func @_scale_max_kernel(%arg0: i32, %arg1: memref<8x256xf32, #tpu.memory_space<vmem>>, %arg2: memref<8x256xf32, #tpu.memory_space<vmem>>, %arg3: memref<8x256xf32, #tpu.memory_space<vmem>>, %arg4: memref<8x256xf32, #tpu.memory_space<vmem>>, %arg5: memref<8x256xf32, #tpu.memory_space<vmem>>, %arg6: memref<8x256xf32, #tpu.memory_space<vmem>>, %arg7: memref<8x256xf32, #tpu.memory_space<vmem>>, %arg8: memref<8x256xf32, #tpu.memory_space<vmem>>, %arg9: memref<8x256xf32, #tpu.memory_space<vmem>>, %arg10: memref<8x256xf32, #tpu.memory_space<vmem>>) attributes {dimension_semantics = [#tpu.dimension_semantics<parallel>], iteration_bounds = array<i64: 1>, scalar_prefetch = 0 : i64, scratch_operands = 0 : i64, tpu.core_type = #tpu.core_type<tc>, window_params = [{transform_indices = @transform_0, window_bounds = array<i64: 8, 256>}, {transform_indices = @transform_1, window_bounds = array<i64: 8, 256>}, {transform_indices = @transform_2, window_bounds = array<i64: 8, 256>}, {transform_indices = @transform_3, window_bounds = array<i64: 8, 256>}, {transform_indices = @transform_4, window_bounds = array<i64: 8, 256>}, {transform_indices = @transform_5, window_bounds = array<i64: 8, 256>}, {transform_indices = @transform_6, window_bounds = array<i64: 8, 256>}, {transform_indices = @transform_7, window_bounds = array<i64: 8, 256>}, {transform_indices = @transform_8, window_bounds = array<i64: 8, 256>}, {transform_indices = @transform_9, window_bounds = array<i64: 8, 256>}]} {
    %c0 = arith.constant 0 : index
    %c0_0 = arith.constant 0 : index
    %0 = vector.load %arg1[%c0, %c0_0] : memref<8x256xf32, #tpu.memory_space<vmem>>, vector<8x256xf32>
    %cst = arith.constant 0.258819044 : f32
    %1 = vector.broadcast %cst : f32 to vector<8x256xf32>
    %cst_1 = arith.constant -0.965925812 : f32
    %2 = vector.broadcast %cst_1 : f32 to vector<8x256xf32>
    %c0_2 = arith.constant 0 : index
    %c0_3 = arith.constant 0 : index
    %3 = vector.load %arg2[%c0_2, %c0_3] : memref<8x256xf32, #tpu.memory_space<vmem>>, vector<8x256xf32>
    %4 = arith.cmpf ogt, %3, %0 : vector<8x256xf32>
    %5 = arith.select %4, %3, %0 : vector<8x256xi1>, vector<8x256xf32>
    %cst_4 = arith.constant 5.000000e-01 : f32
    %6 = vector.broadcast %cst_4 : f32 to vector<8x256xf32>
    %7 = arith.select %4, %6, %1 : vector<8x256xi1>, vector<8x256xf32>
    %cst_5 = arith.constant -0.866025388 : f32
    %8 = vector.broadcast %cst_5 : f32 to vector<8x256xf32>
    %9 = arith.select %4, %8, %2 : vector<8x256xi1>, vector<8x256xf32>
    %c0_6 = arith.constant 0 : index
    %c0_7 = arith.constant 0 : index
    %10 = vector.load %arg3[%c0_6, %c0_7] : memref<8x256xf32, #tpu.memory_space<vmem>>, vector<8x256xf32>
    %11 = arith.cmpf ogt, %10, %5 : vector<8x256xf32>
    %12 = arith.select %11, %10, %5 : vector<8x256xi1>, vector<8x256xf32>
    %cst_8 = arith.constant 0.707106769 : f32
    %13 = vector.broadcast %cst_8 : f32 to vector<8x256xf32>
    %14 = arith.select %11, %13, %7 : vector<8x256xi1>, vector<8x256xf32>
    %cst_9 = arith.constant -0.707106769 : f32
    %15 = vector.broadcast %cst_9 : f32 to vector<8x256xf32>
    %16 = arith.select %11, %15, %9 : vector<8x256xi1>, vector<8x256xf32>
    %c0_10 = arith.constant 0 : index
    %c0_11 = arith.constant 0 : index
    %17 = vector.load %arg4[%c0_10, %c0_11] : memref<8x256xf32, #tpu.memory_space<vmem>>, vector<8x256xf32>
    %18 = arith.cmpf ogt, %17, %12 : vector<8x256xf32>
    %19 = arith.select %18, %17, %12 : vector<8x256xi1>, vector<8x256xf32>
    %cst_12 = arith.constant 0.866025388 : f32
    %20 = vector.broadcast %cst_12 : f32 to vector<8x256xf32>
    %21 = arith.select %18, %20, %14 : vector<8x256xi1>, vector<8x256xf32>
    %cst_13 = arith.constant -5.000000e-01 : f32
    %22 = vector.broadcast %cst_13 : f32 to vector<8x256xf32>
    %23 = arith.select %18, %22, %16 : vector<8x256xi1>, vector<8x256xf32>
    %c0_14 = arith.constant 0 : index
    %c0_15 = arith.constant 0 : index
    %24 = vector.load %arg5[%c0_14, %c0_15] : memref<8x256xf32, #tpu.memory_space<vmem>>, vector<8x256xf32>
    %25 = arith.cmpf ogt, %24, %19 : vector<8x256xf32>
    %26 = arith.select %25, %24, %19 : vector<8x256xi1>, vector<8x256xf32>
    %cst_16 = arith.constant 0.965925812 : f32
    %27 = vector.broadcast %cst_16 : f32 to vector<8x256xf32>
    %28 = arith.select %25, %27, %21 : vector<8x256xi1>, vector<8x256xf32>
    %cst_17 = arith.constant -0.258819044 : f32
    %29 = vector.broadcast %cst_17 : f32 to vector<8x256xf32>
    %30 = arith.select %25, %29, %23 : vector<8x256xi1>, vector<8x256xf32>
    %c0_18 = arith.constant 0 : index
    %c0_19 = arith.constant 0 : index
    %31 = vector.load %arg6[%c0_18, %c0_19] : memref<8x256xf32, #tpu.memory_space<vmem>>, vector<8x256xf32>
    %32 = arith.cmpf ogt, %31, %26 : vector<8x256xf32>
    %33 = arith.select %32, %31, %26 : vector<8x256xi1>, vector<8x256xf32>
    %cst_20 = arith.constant 1.000000e+00 : f32
    %34 = vector.broadcast %cst_20 : f32 to vector<8x256xf32>
    %35 = arith.select %32, %34, %28 : vector<8x256xi1>, vector<8x256xf32>
    %cst_21 = arith.constant 0.000000e+00 : f32
    %36 = vector.broadcast %cst_21 : f32 to vector<8x256xf32>
    %37 = arith.select %32, %36, %30 : vector<8x256xi1>, vector<8x256xf32>
    %c0_22 = arith.constant 0 : index
    %c0_23 = arith.constant 0 : index
    %38 = vector.load %arg7[%c0_22, %c0_23] : memref<8x256xf32, #tpu.memory_space<vmem>>, vector<8x256xf32>
    %39 = arith.cmpf ogt, %38, %33 : vector<8x256xf32>
    %40 = arith.select %39, %38, %33 : vector<8x256xi1>, vector<8x256xf32>
    %cst_24 = arith.constant 0.965925812 : f32
    %41 = vector.broadcast %cst_24 : f32 to vector<8x256xf32>
    %42 = arith.select %39, %41, %35 : vector<8x256xi1>, vector<8x256xf32>
    %cst_25 = arith.constant 0.258819044 : f32
    %43 = vector.broadcast %cst_25 : f32 to vector<8x256xf32>
    %44 = arith.select %39, %43, %37 : vector<8x256xi1>, vector<8x256xf32>
    %c0_26 = arith.constant 0 : index
    %c0_27 = arith.constant 0 : index
    %45 = vector.load %arg8[%c0_26, %c0_27] : memref<8x256xf32, #tpu.memory_space<vmem>>, vector<8x256xf32>
    %46 = arith.cmpf ogt, %45, %40 : vector<8x256xf32>
    %47 = arith.select %46, %45, %40 : vector<8x256xi1>, vector<8x256xf32>
    %cst_28 = arith.constant 0.866025388 : f32
    %48 = vector.broadcast %cst_28 : f32 to vector<8x256xf32>
    %49 = arith.select %46, %48, %42 : vector<8x256xi1>, vector<8x256xf32>
    %cst_29 = arith.constant 5.000000e-01 : f32
    %50 = vector.broadcast %cst_29 : f32 to vector<8x256xf32>
    %51 = arith.select %46, %50, %44 : vector<8x256xi1>, vector<8x256xf32>
    %cst_30 = arith.constant 0.000000e+00 : f32
    %52 = vector.broadcast %cst_30 : f32 to vector<8x256xf32>
    %53 = arith.maximumf %47, %52 : vector<8x256xf32>
    %54 = arith.mulf %53, %49 : vector<8x256xf32>
    %c0_31 = arith.constant 0 : index
    %c0_32 = arith.constant 0 : index
    %55 = vector.load %arg9[%c0_31, %c0_32] : memref<8x256xf32, #tpu.memory_space<vmem>>, vector<8x256xf32>
    tpu.vector_store %arg9[%c0_31, %c0_32], %54 {strides = array<i32>} : memref<8x256xf32, #tpu.memory_space<vmem>>, vector<8x256xf32>,
    %56 = arith.mulf %53, %51 : vector<8x256xf32>
    %c0_33 = arith.constant 0 : index
    %c0_34 = arith.constant 0 : index
    %57 = vector.load %arg10[%c0_33, %c0_34] : memref<8x256xf32, #tpu.memory_space<vmem>>, vector<8x256xf32>
    tpu.vector_store %arg10[%c0_33, %c0_34], %56 {strides = array<i32>} : memref<8x256xf32, #tpu.memory_space<vmem>>, vector<8x256xf32>,
    return
  }
  func.func @transform_0(%arg0: i32) -> (i32, i32) {
    %c0_i32 = arith.constant 0 : i32
    %c0_i32_0 = arith.constant 0 : i32
    return %c0_i32, %arg0 : i32, i32
  }
  func.func @transform_1(%arg0: i32) -> (i32, i32) {
    %c0_i32 = arith.constant 0 : i32
    %c0_i32_0 = arith.constant 0 : i32
    return %c0_i32, %arg0 : i32, i32
  }
  func.func @transform_2(%arg0: i32) -> (i32, i32) {
    %c0_i32 = arith.constant 0 : i32
    %c0_i32_0 = arith.constant 0 : i32
    return %c0_i32, %arg0 : i32, i32
  }
  func.func @transform_3(%arg0: i32) -> (i32, i32) {
    %c0_i32 = arith.constant 0 : i32
    %c0_i32_0 = arith.constant 0 : i32
    return %c0_i32, %arg0 : i32, i32
  }
  func.func @transform_4(%arg0: i32) -> (i32, i32) {
    %c0_i32 = arith.constant 0 : i32
    %c0_i32_0 = arith.constant 0 : i32
    return %c0_i32, %arg0 : i32, i32
  }
  func.func @transform_5(%arg0: i32) -> (i32, i32) {
    %c0_i32 = arith.constant 0 : i32
    %c0_i32_0 = arith.constant 0 : i32
    return %c0_i32, %arg0 : i32, i32
  }
  func.func @transform_6(%arg0: i32) -> (i32, i32) {
    %c0_i32 = arith.constant 0 : i32
    %c0_i32_0 = arith.constant 0 : i32
    return %c0_i32, %arg0 : i32, i32
  }
  func.func @transform_7(%arg0: i32) -> (i32, i32) {
    %c0_i32 = arith.constant 0 : i32
    %c0_i32_0 = arith.constant 0 : i32
    return %c0_i32, %arg0 : i32, i32
  }
  func.func @transform_8(%arg0: i32) -> (i32, i32) {
    %c0_i32 = arith.constant 0 : i32
    %c0_i32_0 = arith.constant 0 : i32
    return %c0_i32, %arg0 : i32, i32
  }
  func.func @transform_9(%arg0: i32) -> (i32, i32) {
    %c0_i32 = arith.constant 0 : i32
    %c0_i32_0 = arith.constant 0 : i32
    return %c0_i32, %arg0 : i32, i32
  }
}

</mosaic_0001>

<bundles_post_ra>
// kernel: scale_conv_forward.16
= control target key start
LH: loop header
LB: loop body
LE: loop exit
PB: predicated region body
PF: predicated region fallthrough
CT: control target
= control target key end

     0   :  { %v457_v4 = vmov 0.0   ;;  %s460_s20 = smov 115   ;;  %s461_s21 = smov 121   ;;  %vm465_vm0 = vmmov 0   ;;  %vm172_vm1 = vcmask 932864   ;;  %vm174_vm2 = vcmask 1043456   ;;  %s546_s0 = inlined_call_operand.vmem [shape: f32[2,4,256], index: 0, kind: input, shape index: {}, may-alias: {0,1}]   ;;  %s547_s1 = inlined_call_operand.vmem [shape: f32[2,4,256], index: 1, kind: input, shape index: {}, may-alias: {0,1}]   ;;  %s548_s2 = inlined_call_operand.vmem [shape: f32[4,36], index: 2, kind: input, shape index: {}]   ;;  %s549_s3 = inlined_call_operand.vmem [shape: f32[2,4,128], index: 3, kind: output, shape index: {}]  }
   0x1   :  { %v28_v0 = vld [vmem:[%s546_s0 + $0x8] sm:$0xf]  ;;  %v26_v1 = vld [vmem:[%s546_s0] sm:$0xf]  ;;  %v403_v2 = vld [vmem:[%s547_s1 + $0xc] sm:$0xf]  ;;  %421 = vmatprep.subr.mxu0 %v457_v4  ;;  %434 = vmatprep.subr.mxu1 %v457_v4 }
   0x2   :  { %29 = vst [vmem:[#allocation2 + $0x4] sm:$0xf] %v28_v0  ;;  %27 = vst [vmem:[#allocation2] sm:$0xf] %v26_v1  ;;  %v402_v3 = vld [vmem:[%s547_s1 + $0x4] sm:$0xf]  ;;  %431 = vmatprep.mubr.msk.f32.mxu0 %vm465_vm0, %v457_v4  ;;  %444 = vmatprep.mubr.msk.f32.mxu1 %vm465_vm0, %v457_v4 }
   0x3   :  { %79 = vst [vmem:[#allocation3 + $0x4] sm:$0xf] %v403_v2  ;;  %77 = vst [vmem:[#allocation3] sm:$0xf] %v402_v3  ;;  %s458_s0 = smov 114   ;;  %s459_s1 = smov 116  }
   0x4   :  { %s462_s22 = smov 120   ;;  %s463_s23 = smov 126   ;;  %vm158_vm3 = vcmask 949248   ;;  %vm165_vm4 = vcmask 941056   ;;  %vm144_vm5 = vcmask 990208   ;;  %vm151_vm6 = vcmask 982016  }
   0x5   :  { %s464_s24 = smov 122   ;;  %s466_s25 = smov 127   ;;  %vm130_vm7 = vcmask 1031168   ;;  %vm137_vm8 = vcmask 998400   ;;  %vm123_vm9 = vcmask 1039360   ;;  %vm179_vm10 = vcmask 293888  }
   0x6   :  { %v112_v0 = vld [vmem:[%s548_s2] sm:$0xf] }
   0x9   :  { %v501_v5 = vld [vmem:[#allocation2 + $0x4] sm:$0xf]  ;;  %v503_v6 = vld [vmem:[#allocation2] sm:$0xf] }
   0xa   :  { %306 = vrot.lane.b32.xlu1 %v501_v5, %s458_s0  ;;  %168 = vrot.lane.b32.xlu0 %v503_v6, %s458_s0  ;;  %v259_v7 = vld [vmem:[#allocation3 + $0x4] sm:$0xf]  ;;  %v114_v8 = vld [vmem:[#allocation3] sm:$0xf]  ;;  %v117_v10 = vrot.slane %v503_v6, 4  ;;  %v262_v12 = vrot.slane %v501_v5, 4 }
   0xb   :  { %v118_v9 = vrot.slane %v114_v8, 4  ;;  %v263_v11 = vrot.slane %v259_v7, 4 }
   0xe   :  { %308 = vrot.lane.b32.xlu1 %v259_v7, %s458_s0  ;;  %170 = vrot.lane.b32.xlu0 %v114_v8, %s458_s0 }
  0x12   :  { %156 = vrot.lane.b32.xlu1 %v114_v8, %s459_s1  ;;  %154 = vrot.lane.b32.xlu0 %v503_v6, %s459_s1 }
  0x16   :  { %163 = vrot.lane.b32.xlu1 %v118_v9, %s460_s20  ;;  %161 = vrot.lane.b32.xlu0 %v117_v10, %s460_s20 }
  0x1a   :  { %296 = vrot.lane.b32.xlu1 %v259_v7, %s459_s1  ;;  %294 = vrot.lane.b32.xlu0 %v501_v5, %s459_s1 }
  0x1e   :  { %302 = vrot.lane.b32.xlu1 %v263_v11, %s460_s20  ;;  %300 = vrot.lane.b32.xlu0 %v262_v12, %s460_s20 }
  0x22   :  { %142 = vrot.lane.b32.xlu1 %v114_v8, %s461_s21  ;;  %140 = vrot.lane.b32.xlu0 %v503_v6, %s461_s21 }
  0x26   :  { %149 = vrot.lane.b32.xlu1 %v118_v9, %s462_s22  ;;  %147 = vrot.lane.b32.xlu0 %v117_v10, %s462_s22 }
  0x2a   :  { %284 = vrot.lane.b32.xlu1 %v259_v7, %s461_s21  ;;  %282 = vrot.lane.b32.xlu0 %v501_v5, %s461_s21 }
  0x2e   :  { %290 = vrot.lane.b32.xlu1 %v263_v11, %s462_s22  ;;  %288 = vrot.lane.b32.xlu0 %v262_v12, %s462_s22 }
  0x32   :  { %128 = vrot.lane.b32.xlu1 %v114_v8, %s463_s23  ;;  %126 = vrot.lane.b32.xlu0 %v503_v6, %s463_s23 }
  0x36   :  { %135 = vrot.lane.b32.xlu1 %v118_v9, %s464_s24  ;;  %133 = vrot.lane.b32.xlu0 %v117_v10, %s464_s24 }
  0x3a   :  { %272 = vrot.lane.b32.xlu1 %v259_v7, %s463_s23  ;;  %270 = vrot.lane.b32.xlu0 %v501_v5, %s463_s23 }
  0x3e   :  { %278 = vrot.lane.b32.xlu1 %v263_v11, %s464_s24  ;;  %276 = vrot.lane.b32.xlu0 %v262_v12, %s464_s24 }
  0x42   :  { %121 = vrot.lane.b32.xlu1 %v118_v9, %s466_s25  ;;  %119 = vrot.lane.b32.xlu0 %v117_v10, %s466_s25 }
  0x46   :  { %266 = vrot.lane.b32.xlu1 %v263_v11, %s466_s25  ;;  %264 = vrot.lane.b32.xlu0 %v262_v12, %s466_s25 }
  0x7c   :  { %v307_v13 = vpop.permute.xlu1 %306  ;;  %v169_v14 = vpop.permute.xlu0 %168 }
  0x80   :  { %v309_v15 = vpop.permute.xlu1 %308  ;;  %v171_v16 = vpop.permute.xlu0 %170 }
  0x81   :  { %v173_v17 = vsel %vm172_vm1, %v169_v14, %v171_v16  ;;  %v310_v18 = vsel %vm172_vm1, %v307_v13, %v309_v15 }
  0x82   :  { %422 = vmatpush3.msk.msra.mxu0 %vm174_vm2, %v173_v17  ;;  %435 = vmatpush3.msk.msra.mxu1 %vm174_vm2, %v310_v18 }
  0x83   :  { %423 = vmatprep.subr.mxu0 %v457_v4  ;;  %436 = vmatprep.subr.mxu1 %v457_v4 }
  0x84   :  { %v157_v19 = vpop.permute.xlu1 %156  ;;  %v155_v20 = vpop.permute.xlu0 %154 }
  0x85   :  { %v159_v23 = vsel %vm158_vm3, %v155_v20, %v157_v19 }
  0x88   :  { %v164_v21 = vpop.permute.xlu1 %163  ;;  %v162_v22 = vpop.permute.xlu0 %161 }
  0x89   :  { %v166_v24 = vsel %vm165_vm4, %v162_v22, %v164_v21 }
  0x8a   :  { %v178_v25 = vsel %vm174_vm2, %v159_v23, %v166_v24 }
  0x8b   :  { %424 = vmatpush3.msra.mxu0 %v178_v25 }
  0x8c   :  { %v297_v26 = vpop.permute.xlu1 %296  ;;  %v295_v27 = vpop.permute.xlu0 %294  ;;  %425 = vmatprep.subr.mxu0 %v457_v4 }
  0x8d   :  { %v298_v30 = vsel %vm158_vm3, %v295_v27, %v297_v26 }
  0x90   :  { %v303_v28 = vpop.permute.xlu1 %302  ;;  %v301_v29 = vpop.permute.xlu0 %300 }
  0x91   :  { %v304_v31 = vsel %vm165_vm4, %v301_v29, %v303_v28 }
  0x92   :  { %v314_v32 = vsel %vm174_vm2, %v298_v30, %v304_v31 }
  0x93   :  { %437 = vmatpush3.msra.mxu1 %v314_v32 }
  0x94   :  { %v143_v33 = vpop.permute.xlu1 %142  ;;  %v141_v34 = vpop.permute.xlu0 %140  ;;  %438 = vmatprep.subr.mxu1 %v457_v4 }
  0x95   :  { %v145_v37 = vsel %vm144_vm5, %v141_v34, %v143_v33 }
  0x98   :  { %v150_v35 = vpop.permute.xlu1 %149  ;;  %v148_v36 = vpop.permute.xlu0 %147 }
  0x99   :  { %v152_v38 = vsel %vm151_vm6, %v148_v36, %v150_v35 }
  0x9a   :  { %v177_v39 = vsel %vm174_vm2, %v145_v37, %v152_v38 }
  0x9b   :  { %426 = vmatpush3.msra.mxu0 %v177_v39 }
  0x9c   :  { %v285_v40 = vpop.permute.xlu1 %284  ;;  %v283_v41 = vpop.permute.xlu0 %282  ;;  %427 = vmatprep.subr.mxu0 %v457_v4 }
  0x9d   :  { %v286_v44 = vsel %vm144_vm5, %v283_v41, %v285_v40 }
  0xa0   :  { %v291_v42 = vpop.permute.xlu1 %290  ;;  %v289_v43 = vpop.permute.xlu0 %288 }
  0xa1   :  { %v292_v45 = vsel %vm151_vm6, %v289_v43, %v291_v42 }
  0xa2   :  { %v313_v46 = vsel %vm174_vm2, %v286_v44, %v292_v45 }
  0xa3   :  { %439 = vmatpush3.msra.mxu1 %v313_v46 }
  0xa4   :  { %v129_v47 = vpop.permute.xlu1 %128  ;;  %v127_v48 = vpop.permute.xlu0 %126  ;;  %440 = vmatprep.subr.mxu1 %v457_v4 }
  0xa5   :  { %v131_v51 = vsel %vm130_vm7, %v127_v48, %v129_v47 }
  0xa8   :  { %v136_v49 = vpop.permute.xlu1 %135  ;;  %v134_v50 = vpop.permute.xlu0 %133 }
  0xa9   :  { %v138_v52 = vsel %vm137_vm8, %v134_v50, %v136_v49 }
  0xaa   :  { %v176_v53 = vsel %vm174_vm2, %v131_v51, %v138_v52 }
  0xab   :  { %428 = vmatpush3.msra.mxu0 %v176_v53 }
  0xac   :  { %v273_v54 = vpop.permute.xlu1 %272  ;;  %v271_v55 = vpop.permute.xlu0 %270  ;;  %429 = vmatprep.subr.mxu0 %v457_v4 }
  0xad   :  { %v274_v58 = vsel %vm130_vm7, %v271_v55, %v273_v54 }
  0xb0   :  { %v279_v56 = vpop.permute.xlu1 %278  ;;  %v277_v57 = vpop.permute.xlu0 %276 }
  0xb1   :  { %v280_v59 = vsel %vm137_vm8, %v277_v57, %v279_v56 }
  0xb2   :  { %v312_v60 = vsel %vm174_vm2, %v274_v58, %v280_v59 }
  0xb3   :  { %441 = vmatpush3.msra.mxu1 %v312_v60 }
  0xb4   :  { %v122_v61 = vpop.permute.xlu1 %121  ;;  %v120_v62 = vpop.permute.xlu0 %119  ;;  %442 = vmatprep.subr.mxu1 %v457_v4 }
  0xb5   :  { %v124_v63 = vsel %vm123_vm9, %v120_v62, %v122_v61 }
  0xb6   :  { %v175_v1 = vsel %vm174_vm2, %v503_v6, %v124_v63 }
  0xb7   :  { %430 = vmatpush3.msra.mxu0 %v175_v1 }
  0xb8   :  { %v267_v2 = vpop.permute.xlu1 %266  ;;  %v265_v3 = vpop.permute.xlu0 %264  ;;  %432 = vmatmul.mubr.msk.f32.vlgmr.msra.gmra.mxu0 %vm179_vm10, %v112_v0 }
  0xb9   :  { %v268_v7 = vsel %vm123_vm9, %v265_v3, %v267_v2 }
  0xba   :  { %v311_v8 = vsel %vm174_vm2, %v501_v5, %v268_v7 }
  0xbb   :  { %443 = vmatpush3.msra.mxu1 %v311_v8 }
  0xbc   :  { %445 = vmatmul.mubr.msk.f32.vlgmr.msra.gmra.mxu1 %vm179_vm10, %v112_v0 }
 0x178   :  { %v251_v4 = vpop.f32.mrf.mxu0 }
 0x179   :  { %255 = vst [vmem:[%s549_s3] sm:$0xf] %v251_v4 }
 0x17a   :  { %v433_v9 = vpop.f32.mrf.mxu0 }
 0x17c   :  { %v383_v10 = vpop.f32.mrf.mxu1 }
 0x17d   :  { %408 = vst [vmem:[%s549_s3 + $0x4] sm:$0xf] %v383_v10 }
 0x17e   :  { %v446_v6 = vpop.f32.mrf.mxu1 }

// kernel: scale_conv_forward.15
= control target key start
LH: loop header
LB: loop body
LE: loop exit
PB: predicated region body
PF: predicated region fallthrough
CT: control target
= control target key end

     0   :  { %v457_v4 = vmov 0.0   ;;  %s460_s20 = smov 111   ;;  %s461_s21 = smov 119   ;;  %vm465_vm0 = vmmov 0   ;;  %vm172_vm1 = vcmask 900096   ;;  %vm174_vm2 = vcmask 1043456   ;;  %s546_s0 = inlined_call_operand.vmem [shape: f32[2,4,256], index: 0, kind: input, shape index: {}, may-alias: {0,1}]   ;;  %s547_s1 = inlined_call_operand.vmem [shape: f32[2,4,256], index: 1, kind: input, shape index: {}, may-alias: {0,1}]   ;;  %s548_s2 = inlined_call_operand.vmem [shape: f32[4,36], index: 2, kind: input, shape index: {}]   ;;  %s549_s3 = inlined_call_operand.vmem [shape: f32[2,4,128], index: 3, kind: output, shape index: {}]  }
   0x1   :  { %v28_v0 = vld [vmem:[%s546_s0 + $0x8] sm:$0xf]  ;;  %v26_v1 = vld [vmem:[%s546_s0] sm:$0xf]  ;;  %v403_v2 = vld [vmem:[%s547_s1 + $0xc] sm:$0xf]  ;;  %421 = vmatprep.subr.mxu0 %v457_v4  ;;  %434 = vmatprep.subr.mxu1 %v457_v4 }
   0x2   :  { %29 = vst [vmem:[#allocation2 + $0x4] sm:$0xf] %v28_v0  ;;  %27 = vst [vmem:[#allocation2] sm:$0xf] %v26_v1  ;;  %v402_v3 = vld [vmem:[%s547_s1 + $0x4] sm:$0xf]  ;;  %431 = vmatprep.mubr.msk.f32.mxu0 %vm465_vm0, %v457_v4  ;;  %444 = vmatprep.mubr.msk.f32.mxu1 %vm465_vm0, %v457_v4 }
   0x3   :  { %79 = vst [vmem:[#allocation3 + $0x4] sm:$0xf] %v403_v2  ;;  %77 = vst [vmem:[#allocation3] sm:$0xf] %v402_v3  ;;  %s458_s0 = smov 110   ;;  %s459_s1 = smov 112  }
   0x4   :  { %s462_s22 = smov 118   ;;  %s463_s23 = smov 126   ;;  %vm158_vm3 = vcmask 916480   ;;  %vm165_vm4 = vcmask 908288   ;;  %vm144_vm5 = vcmask 973824   ;;  %vm151_vm6 = vcmask 965632  }
   0x5   :  { %s464_s24 = smov 120   ;;  %s466_s25 = smov 127   ;;  %vm130_vm7 = vcmask 1031168   ;;  %vm137_vm8 = vcmask 982016   ;;  %vm123_vm9 = vcmask 1039360   ;;  %vm179_vm10 = vcmask 293888  }
   0x6   :  { %v112_v0 = vld [vmem:[%s548_s2] sm:$0xf] }
   0x9   :  { %v501_v5 = vld [vmem:[#allocation2 + $0x4] sm:$0xf]  ;;  %v503_v6 = vld [vmem:[#allocation2] sm:$0xf] }
   0xa   :  { %306 = vrot.lane.b32.xlu1 %v501_v5, %s458_s0  ;;  %168 = vrot.lane.b32.xlu0 %v503_v6, %s458_s0  ;;  %v259_v7 = vld [vmem:[#allocation3 + $0x4] sm:$0xf]  ;;  %v114_v8 = vld [vmem:[#allocation3] sm:$0xf]  ;;  %v117_v10 = vrot.slane %v503_v6, 4  ;;  %v262_v12 = vrot.slane %v501_v5, 4 }
   0xb   :  { %v118_v9 = vrot.slane %v114_v8, 4  ;;  %v263_v11 = vrot.slane %v259_v7, 4 }
   0xe   :  { %308 = vrot.lane.b32.xlu1 %v259_v7, %s458_s0  ;;  %170 = vrot.lane.b32.xlu0 %v114_v8, %s458_s0 }
  0x12   :  { %156 = vrot.lane.b32.xlu1 %v114_v8, %s459_s1  ;;  %154 = vrot.lane.b32.xlu0 %v503_v6, %s459_s1 }
  0x16   :  { %163 = vrot.lane.b32.xlu1 %v118_v9, %s460_s20  ;;  %161 = vrot.lane.b32.xlu0 %v117_v10, %s460_s20 }
  0x1a   :  { %296 = vrot.lane.b32.xlu1 %v259_v7, %s459_s1  ;;  %294 = vrot.lane.b32.xlu0 %v501_v5, %s459_s1 }
  0x1e   :  { %302 = vrot.lane.b32.xlu1 %v263_v11, %s460_s20  ;;  %300 = vrot.lane.b32.xlu0 %v262_v12, %s460_s20 }
  0x22   :  { %142 = vrot.lane.b32.xlu1 %v114_v8, %s461_s21  ;;  %140 = vrot.lane.b32.xlu0 %v503_v6, %s461_s21 }
  0x26   :  { %149 = vrot.lane.b32.xlu1 %v118_v9, %s462_s22  ;;  %147 = vrot.lane.b32.xlu0 %v117_v10, %s462_s22 }
  0x2a   :  { %284 = vrot.lane.b32.xlu1 %v259_v7, %s461_s21  ;;  %282 = vrot.lane.b32.xlu0 %v501_v5, %s461_s21 }
  0x2e   :  { %290 = vrot.lane.b32.xlu1 %v263_v11, %s462_s22  ;;  %288 = vrot.lane.b32.xlu0 %v262_v12, %s462_s22 }
  0x32   :  { %128 = vrot.lane.b32.xlu1 %v114_v8, %s463_s23  ;;  %126 = vrot.lane.b32.xlu0 %v503_v6, %s463_s23 }
  0x36   :  { %135 = vrot.lane.b32.xlu1 %v118_v9, %s464_s24  ;;  %133 = vrot.lane.b32.xlu0 %v117_v10, %s464_s24 }
  0x3a   :  { %272 = vrot.lane.b32.xlu1 %v259_v7, %s463_s23  ;;  %270 = vrot.lane.b32.xlu0 %v501_v5, %s463_s23 }
  0x3e   :  { %278 = vrot.lane.b32.xlu1 %v263_v11, %s464_s24  ;;  %276 = vrot.lane.b32.xlu0 %v262_v12, %s464_s24 }
  0x42   :  { %121 = vrot.lane.b32.xlu1 %v118_v9, %s466_s25  ;;  %119 = vrot.lane.b32.xlu0 %v117_v10, %s466_s25 }
  0x46   :  { %266 = vrot.lane.b32.xlu1 %v263_v11, %s466_s25  ;;  %264 = vrot.lane.b32.xlu0 %v262_v12, %s466_s25 }
  0x7c   :  { %v307_v13 = vpop.permute.xlu1 %306  ;;  %v169_v14 = vpop.permute.xlu0 %168 }
  0x80   :  { %v309_v15 = vpop.permute.xlu1 %308  ;;  %v171_v16 = vpop.permute.xlu0 %170 }
  0x81   :  { %v173_v17 = vsel %vm172_vm1, %v169_v14, %v171_v16  ;;  %v310_v18 = vsel %vm172_vm1, %v307_v13, %v309_v15 }
  0x82   :  { %422 = vmatpush3.msk.msra.mxu0 %vm174_vm2, %v173_v17  ;;  %435 = vmatpush3.msk.msra.mxu1 %vm174_vm2, %v310_v18 }
  0x83   :  { %423 = vmatprep.subr.mxu0 %v457_v4  ;;  %436 = vmatprep.subr.mxu1 %v457_v4 }
  0x84   :  { %v157_v19 = vpop.permute.xlu1 %156  ;;  %v155_v20 = vpop.permute.xlu0 %154 }
  0x85   :  { %v159_v23 = vsel %vm158_vm3, %v155_v20, %v157_v19 }
  0x88   :  { %v164_v21 = vpop.permute.xlu1 %163  ;;  %v162_v22 = vpop.permute.xlu0 %161 }
  0x89   :  { %v166_v24 = vsel %vm165_vm4, %v162_v22, %v164_v21 }
  0x8a   :  { %v178_v25 = vsel %vm174_vm2, %v159_v23, %v166_v24 }
  0x8b   :  { %424 = vmatpush3.msra.mxu0 %v178_v25 }
  0x8c   :  { %v297_v26 = vpop.permute.xlu1 %296  ;;  %v295_v27 = vpop.permute.xlu0 %294  ;;  %425 = vmatprep.subr.mxu0 %v457_v4 }
  0x8d   :  { %v298_v30 = vsel %vm158_vm3, %v295_v27, %v297_v26 }
  0x90   :  { %v303_v28 = vpop.permute.xlu1 %302  ;;  %v301_v29 = vpop.permute.xlu0 %300 }
  0x91   :  { %v304_v31 = vsel %vm165_vm4, %v301_v29, %v303_v28 }
  0x92   :  { %v314_v32 = vsel %vm174_vm2, %v298_v30, %v304_v31 }
  0x93   :  { %437 = vmatpush3.msra.mxu1 %v314_v32 }
  0x94   :  { %v143_v33 = vpop.permute.xlu1 %142  ;;  %v141_v34 = vpop.permute.xlu0 %140  ;;  %438 = vmatprep.subr.mxu1 %v457_v4 }
  0x95   :  { %v145_v37 = vsel %vm144_vm5, %v141_v34, %v143_v33 }
  0x98   :  { %v150_v35 = vpop.permute.xlu1 %149  ;;  %v148_v36 = vpop.permute.xlu0 %147 }
  0x99   :  { %v152_v38 = vsel %vm151_vm6, %v148_v36, %v150_v35 }
  0x9a   :  { %v177_v39 = vsel %vm174_vm2, %v145_v37, %v152_v38 }
  0x9b   :  { %426 = vmatpush3.msra.mxu0 %v177_v39 }
  0x9c   :  { %v285_v40 = vpop.permute.xlu1 %284  ;;  %v283_v41 = vpop.permute.xlu0 %282  ;;  %427 = vmatprep.subr.mxu0 %v457_v4 }
  0x9d   :  { %v286_v44 = vsel %vm144_vm5, %v283_v41, %v285_v40 }
  0xa0   :  { %v291_v42 = vpop.permute.xlu1 %290  ;;  %v289_v43 = vpop.permute.xlu0 %288 }
  0xa1   :  { %v292_v45 = vsel %vm151_vm6, %v289_v43, %v291_v42 }
  0xa2   :  { %v313_v46 = vsel %vm174_vm2, %v286_v44, %v292_v45 }
  0xa3   :  { %439 = vmatpush3.msra.mxu1 %v313_v46 }
  0xa4   :  { %v129_v47 = vpop.permute.xlu1 %128  ;;  %v127_v48 = vpop.permute.xlu0 %126  ;;  %440 = vmatprep.subr.mxu1 %v457_v4 }
  0xa5   :  { %v131_v51 = vsel %vm130_vm7, %v127_v48, %v129_v47 }
  0xa8   :  { %v136_v49 = vpop.permute.xlu1 %135  ;;  %v134_v50 = vpop.permute.xlu0 %133 }
  0xa9   :  { %v138_v52 = vsel %vm137_vm8, %v134_v50, %v136_v49 }
  0xaa   :  { %v176_v53 = vsel %vm174_vm2, %v131_v51, %v138_v52 }
  0xab   :  { %428 = vmatpush3.msra.mxu0 %v176_v53 }
  0xac   :  { %v273_v54 = vpop.permute.xlu1 %272  ;;  %v271_v55 = vpop.permute.xlu0 %270  ;;  %429 = vmatprep.subr.mxu0 %v457_v4 }
  0xad   :  { %v274_v58 = vsel %vm130_vm7, %v271_v55, %v273_v54 }
  0xb0   :  { %v279_v56 = vpop.permute.xlu1 %278  ;;  %v277_v57 = vpop.permute.xlu0 %276 }
  0xb1   :  { %v280_v59 = vsel %vm137_vm8, %v277_v57, %v279_v56 }
  0xb2   :  { %v312_v60 = vsel %vm174_vm2, %v274_v58, %v280_v59 }
  0xb3   :  { %441 = vmatpush3.msra.mxu1 %v312_v60 }
  0xb4   :  { %v122_v61 = vpop.permute.xlu1 %121  ;;  %v120_v62 = vpop.permute.xlu0 %119  ;;  %442 = vmatprep.subr.mxu1 %v457_v4 }
  0xb5   :  { %v124_v63 = vsel %vm123_vm9, %v120_v62, %v122_v61 }
  0xb6   :  { %v175_v1 = vsel %vm174_vm2, %v503_v6, %v124_v63 }
  0xb7   :  { %430 = vmatpush3.msra.mxu0 %v175_v1 }
  0xb8   :  { %v267_v2 = vpop.permute.xlu1 %266  ;;  %v265_v3 = vpop.permute.xlu0 %264  ;;  %432 = vmatmul.mubr.msk.f32.vlgmr.msra.gmra.mxu0 %vm179_vm10, %v112_v0 }
  0xb9   :  { %v268_v7 = vsel %vm123_vm9, %v265_v3, %v267_v2 }
  0xba   :  { %v311_v8 = vsel %vm174_vm2, %v501_v5, %v268_v7 }
  0xbb   :  { %443 = vmatpush3.msra.mxu1 %v311_v8 }
  0xbc   :  { %445 = vmatmul.mubr.msk.f32.vlgmr.msra.gmra.mxu1 %vm179_vm10, %v112_v0 }
 0x178   :  { %v251_v4 = vpop.f32.mrf.mxu0 }
 0x179   :  { %255 = vst [vmem:[%s549_s3] sm:$0xf] %v251_v4 }
 0x17a   :  { %v433_v9 = vpop.f32.mrf.mxu0 }
 0x17c   :  { %v383_v10 = vpop.f32.mrf.mxu1 }
 0x17d   :  { %408 = vst [vmem:[%s549_s3 + $0x4] sm:$0xf] %v383_v10 }
 0x17e   :  { %v446_v6 = vpop.f32.mrf.mxu1 }

// kernel: scale_conv_forward.14
= control target key start
LH: loop header
LB: loop body
LE: loop exit
PB: predicated region body
PF: predicated region fallthrough
CT: control target
= control target key end

     0   :  { %v457_v4 = vmov 0.0   ;;  %s460_s20 = smov 107   ;;  %s461_s21 = smov 117   ;;  %vm465_vm0 = vmmov 0   ;;  %vm172_vm1 = vcmask 867328   ;;  %vm174_vm2 = vcmask 1043456   ;;  %s546_s0 = inlined_call_operand.vmem [shape: f32[2,4,256], index: 0, kind: input, shape index: {}, may-alias: {0,1}]   ;;  %s547_s1 = inlined_call_operand.vmem [shape: f32[2,4,256], index: 1, kind: input, shape index: {}, may-alias: {0,1}]   ;;  %s548_s2 = inlined_call_operand.vmem [shape: f32[4,36], index: 2, kind: input, shape index: {}]   ;;  %s549_s3 = inlined_call_operand.vmem [shape: f32[2,4,128], index: 3, kind: output, shape index: {}]  }
   0x1   :  { %v28_v0 = vld [vmem:[%s546_s0 + $0x8] sm:$0xf]  ;;  %v26_v1 = vld [vmem:[%s546_s0] sm:$0xf]  ;;  %v403_v2 = vld [vmem:[%s547_s1 + $0xc] sm:$0xf]  ;;  %421 = vmatprep.subr.mxu0 %v457_v4  ;;  %434 = vmatprep.subr.mxu1 %v457_v4 }
   0x2   :  { %29 = vst [vmem:[#allocation2 + $0x4] sm:$0xf] %v28_v0  ;;  %27 = vst [vmem:[#allocation2] sm:$0xf] %v26_v1  ;;  %v402_v3 = vld [vmem:[%s547_s1 + $0x4] sm:$0xf]  ;;  %431 = vmatprep.mubr.msk.f32.mxu0 %vm465_vm0, %v457_v4  ;;  %444 = vmatprep.mubr.msk.f32.mxu1 %vm465_vm0, %v457_v4 }
   0x3   :  { %79 = vst [vmem:[#allocation3 + $0x4] sm:$0xf] %v403_v2  ;;  %77 = vst [vmem:[#allocation3] sm:$0xf] %v402_v3  ;;  %s458_s0 = smov 106   ;;  %s459_s1 = smov 108  }
   0x4   :  { %s462_s22 = smov 116   ;;  %s463_s23 = smov 126   ;;  %vm158_vm3 = vcmask 883712   ;;  %vm165_vm4 = vcmask 875520   ;;  %vm144_vm5 = vcmask 957440   ;;  %vm151_vm6 = vcmask 949248  }
   0x5   :  { %s464_s24 = smov 118   ;;  %s466_s25 = smov 127   ;;  %vm130_vm7 = vcmask 1031168   ;;  %vm137_vm8 = vcmask 965632   ;;  %vm123_vm9 = vcmask 1039360   ;;  %vm179_vm10 = vcmask 293888  }
   0x6   :  { %v112_v0 = vld [vmem:[%s548_s2] sm:$0xf] }
   0x9   :  { %v501_v5 = vld [vmem:[#allocation2 + $0x4] sm:$0xf]  ;;  %v503_v6 = vld [vmem:[#allocation2] sm:$0xf] }
   0xa   :  { %306 = vrot.lane.b32.xlu1 %v501_v5, %s458_s0  ;;  %168 = vrot.lane.b32.xlu0 %v503_v6, %s458_s0  ;;  %v259_v7 = vld [vmem:[#allocation3 + $0x4] sm:$0xf]  ;;  %v114_v8 = vld [vmem:[#allocation3] sm:$0xf]  ;;  %v117_v10 = vrot.slane %v503_v6, 4  ;;  %v262_v12 = vrot.slane %v501_v5, 4 }
   0xb   :  { %v118_v9 = vrot.slane %v114_v8, 4  ;;  %v263_v11 = vrot.slane %v259_v7, 4 }
   0xe   :  { %308 = vrot.lane.b32.xlu1 %v259_v7, %s458_s0  ;;  %170 = vrot.lane.b32.xlu0 %v114_v8, %s458_s0 }
  0x12   :  { %156 = vrot.lane.b32.xlu1 %v114_v8, %s459_s1  ;;  %154 = vrot.lane.b32.xlu0 %v503_v6, %s459_s1 }
  0x16   :  { %163 = vrot.lane.b32.xlu1 %v118_v9, %s460_s20  ;;  %161 = vrot.lane.b32.xlu0 %v117_v10, %s460_s20 }
  0x1a   :  { %296 = vrot.lane.b32.xlu1 %v259_v7, %s459_s1  ;;  %294 = vrot.lane.b32.xlu0 %v501_v5, %s459_s1 }
  0x1e   :  { %302 = vrot.lane.b32.xlu1 %v263_v11, %s460_s20  ;;  %300 = vrot.lane.b32.xlu0 %v262_v12, %s460_s20 }
  0x22   :  { %142 = vrot.lane.b32.xlu1 %v114_v8, %s461_s21  ;;  %140 = vrot.lane.b32.xlu0 %v503_v6, %s461_s21 }
  0x26   :  { %149 = vrot.lane.b32.xlu1 %v118_v9, %s462_s22  ;;  %147 = vrot.lane.b32.xlu0 %v117_v10, %s462_s22 }
  0x2a   :  { %284 = vrot.lane.b32.xlu1 %v259_v7, %s461_s21  ;;  %282 = vrot.lane.b32.xlu0 %v501_v5, %s461_s21 }
  0x2e   :  { %290 = vrot.lane.b32.xlu1 %v263_v11, %s462_s22  ;;  %288 = vrot.lane.b32.xlu0 %v262_v12, %s462_s22 }
  0x32   :  { %128 = vrot.lane.b32.xlu1 %v114_v8, %s463_s23  ;;  %126 = vrot.lane.b32.xlu0 %v503_v6, %s463_s23 }
  0x36   :  { %135 = vrot.lane.b32.xlu1 %v118_v9, %s464_s24  ;;  %133 = vrot.lane.b32.xlu0 %v117_v10, %s464_s24 }
  0x3a   :  { %272 = vrot.lane.b32.xlu1 %v259_v7, %s463_s23  ;;  %270 = vrot.lane.b32.xlu0 %v501_v5, %s463_s23 }
  0x3e   :  { %278 = vrot.lane.b32.xlu1 %v263_v11, %s464_s24  ;;  %276 = vrot.lane.b32.xlu0 %v262_v12, %s464_s24 }
  0x42   :  { %121 = vrot.lane.b32.xlu1 %v118_v9, %s466_s25  ;;  %119 = vrot.lane.b32.xlu0 %v117_v10, %s466_s25 }
  0x46   :  { %266 = vrot.lane.b32.xlu1 %v263_v11, %s466_s25  ;;  %264 = vrot.lane.b32.xlu0 %v262_v12, %s466_s25 }
  0x7c   :  { %v307_v13 = vpop.permute.xlu1 %306  ;;  %v169_v14 = vpop.permute.xlu0 %168 }
  0x80   :  { %v309_v15 = vpop.permute.xlu1 %308  ;;  %v171_v16 = vpop.permute.xlu0 %170 }
  0x81   :  { %v173_v17 = vsel %vm172_vm1, %v169_v14, %v171_v16  ;;  %v310_v18 = vsel %vm172_vm1, %v307_v13, %v309_v15 }
  0x82   :  { %422 = vmatpush3.msk.msra.mxu0 %vm174_vm2, %v173_v17  ;;  %435 = vmatpush3.msk.msra.mxu1 %vm174_vm2, %v310_v18 }
  0x83   :  { %423 = vmatprep.subr.mxu0 %v457_v4  ;;  %436 = vmatprep.subr.mxu1 %v457_v4 }
  0x84   :  { %v157_v19 = vpop.permute.xlu1 %156  ;;  %v155_v20 = vpop.permute.xlu0 %154 }
  0x85   :  { %v159_v23 = vsel %vm158_vm3, %v155_v20, %v157_v19 }
  0x88   :  { %v164_v21 = vpop.permute.xlu1 %163  ;;  %v162_v22 = vpop.permute.xlu0 %161 }
  0x89   :  { %v166_v24 = vsel %vm165_vm4, %v162_v22, %v164_v21 }
  0x8a   :  { %v178_v25 = vsel %vm174_vm2, %v159_v23, %v166_v24 }
  0x8b   :  { %424 = vmatpush3.msra.mxu0 %v178_v25 }
  0x8c   :  { %v297_v26 = vpop.permute.xlu1 %296  ;;  %v295_v27 = vpop.permute.xlu0 %294  ;;  %425 = vmatprep.subr.mxu0 %v457_v4 }
  0x8d   :  { %v298_v30 = vsel %vm158_vm3, %v295_v27, %v297_v26 }
  0x90   :  { %v303_v28 = vpop.permute.xlu1 %302  ;;  %v301_v29 = vpop.permute.xlu0 %300 }
  0x91   :  { %v304_v31 = vsel %vm165_vm4, %v301_v29, %v303_v28 }
  0x92   :  { %v314_v32 = vsel %vm174_vm2, %v298_v30, %v304_v31 }
  0x93   :  { %437 = vmatpush3.msra.mxu1 %v314_v32 }
  0x94   :  { %v143_v33 = vpop.permute.xlu1 %142  ;;  %v141_v34 = vpop.permute.xlu0 %140  ;;  %438 = vmatprep.subr.mxu1 %v457_v4 }
  0x95   :  { %v145_v37 = vsel %vm144_vm5, %v141_v34, %v143_v33 }
  0x98   :  { %v150_v35 = vpop.permute.xlu1 %149  ;;  %v148_v36 = vpop.permute.xlu0 %147 }
  0x99   :  { %v152_v38 = vsel %vm151_vm6, %v148_v36, %v150_v35 }
  0x9a   :  { %v177_v39 = vsel %vm174_vm2, %v145_v37, %v152_v38 }
  0x9b   :  { %426 = vmatpush3.msra.mxu0 %v177_v39 }
  0x9c   :  { %v285_v40 = vpop.permute.xlu1 %284  ;;  %v283_v41 = vpop.permute.xlu0 %282  ;;  %427 = vmatprep.subr.mxu0 %v457_v4 }
  0x9d   :  { %v286_v44 = vsel %vm144_vm5, %v283_v41, %v285_v40 }
  0xa0   :  { %v291_v42 = vpop.permute.xlu1 %290  ;;  %v289_v43 = vpop.permute.xlu0 %288 }
  0xa1   :  { %v292_v45 = vsel %vm151_vm6, %v289_v43, %v291_v42 }
  0xa2   :  { %v313_v46 = vsel %vm174_vm2, %v286_v44, %v292_v45 }
  0xa3   :  { %439 = vmatpush3.msra.mxu1 %v313_v46 }
  0xa4   :  { %v129_v47 = vpop.permute.xlu1 %128  ;;  %v127_v48 = vpop.permute.xlu0 %126  ;;  %440 = vmatprep.subr.mxu1 %v457_v4 }
  0xa5   :  { %v131_v51 = vsel %vm130_vm7, %v127_v48, %v129_v47 }
  0xa8   :  { %v136_v49 = vpop.permute.xlu1 %135  ;;  %v134_v50 = vpop.permute.xlu0 %133 }
  0xa9   :  { %v138_v52 = vsel %vm137_vm8, %v134_v50, %v136_v49 }
  0xaa   :  { %v176_v53 = vsel %vm174_vm2, %v131_v51, %v138_v52 }
  0xab   :  { %428 = vmatpush3.msra.mxu0 %v176_v53 }
  0xac   :  { %v273_v54 = vpop.permute.xlu1 %272  ;;  %v271_v55 = vpop.permute.xlu0 %270  ;;  %429 = vmatprep.subr.mxu0 %v457_v4 }
  0xad   :  { %v274_v58 = vsel %vm130_vm7, %v271_v55, %v273_v54 }
  0xb0   :  { %v279_v56 = vpop.permute.xlu1 %278  ;;  %v277_v57 = vpop.permute.xlu0 %276 }
  0xb1   :  { %v280_v59 = vsel %vm137_vm8, %v277_v57, %v279_v56 }
  0xb2   :  { %v312_v60 = vsel %vm174_vm2, %v274_v58, %v280_v59 }
  0xb3   :  { %441 = vmatpush3.msra.mxu1 %v312_v60 }
  0xb4   :  { %v122_v61 = vpop.permute.xlu1 %121  ;;  %v120_v62 = vpop.permute.xlu0 %119  ;;  %442 = vmatprep.subr.mxu1 %v457_v4 }
  0xb5   :  { %v124_v63 = vsel %vm123_vm9, %v120_v62, %v122_v61 }
  0xb6   :  { %v175_v1 = vsel %vm174_vm2, %v503_v6, %v124_v63 }
  0xb7   :  { %430 = vmatpush3.msra.mxu0 %v175_v1 }
  0xb8   :  { %v267_v2 = vpop.permute.xlu1 %266  ;;  %v265_v3 = vpop.permute.xlu0 %264  ;;  %432 = vmatmul.mubr.msk.f32.vlgmr.msra.gmra.mxu0 %vm179_vm10, %v112_v0 }
  0xb9   :  { %v268_v7 = vsel %vm123_vm9, %v265_v3, %v267_v2 }
  0xba   :  { %v311_v8 = vsel %vm174_vm2, %v501_v5, %v268_v7 }
  0xbb   :  { %443 = vmatpush3.msra.mxu1 %v311_v8 }
  0xbc   :  { %445 = vmatmul.mubr.msk.f32.vlgmr.msra.gmra.mxu1 %vm179_vm10, %v112_v0 }
 0x178   :  { %v251_v4 = vpop.f32.mrf.mxu0 }
 0x179   :  { %255 = vst [vmem:[%s549_s3] sm:$0xf] %v251_v4 }
 0x17a   :  { %v433_v9 = vpop.f32.mrf.mxu0 }
 0x17c   :  { %v383_v10 = vpop.f32.mrf.mxu1 }
 0x17d   :  { %408 = vst [vmem:[%s549_s3 + $0x4] sm:$0xf] %v383_v10 }
 0x17e   :  { %v446_v6 = vpop.f32.mrf.mxu1 }

// kernel: scale_conv_forward.13
= control target key start
LH: loop header
LB: loop body
LE: loop exit
PB: predicated region body
PF: predicated region fallthrough
CT: control target
= control target key end

     0   :  { %s507_s20 = smov 102   ;;  %s508_s21 = smov 101   ;;  %v513_v12 = vmov 0.0   ;;  %vm199_vm0 = vcmask 818176   ;;  %vm202_vm1 = vcmask 1043456   ;;  %vm188_vm2 = vcmask 826368   ;;  %s650_s0 = inlined_call_operand.vmem [shape: f32[2,4,384], index: 0, kind: input, shape index: {}, may-alias: {0,1}]   ;;  %s651_s1 = inlined_call_operand.vmem [shape: f32[2,4,384], index: 1, kind: input, shape index: {}, may-alias: {0,1}]   ;;  %s652_s2 = inlined_call_operand.vmem [shape: f32[4,36], index: 2, kind: input, shape index: {}]   ;;  %s653_s3 = inlined_call_operand.vmem [shape: f32[2,4,256], index: 3, kind: output, shape index: {}]  }
   0x1   :  { %v538_v0 = vld [vmem:[%s650_s0] sm:$0xff]  ;;  %v543_v1 = vld [vmem:[%s650_s0 + $0xc] sm:$0xff]  ;;  %v487_v2 = vld [vmem:[%s651_s1 + $0x14] sm:$0xf]  ;;  %s506_s0 = smov 100   ;;  %s510_s22 = smov 113   ;;  %283 = vmatprep.mubr.f32.mxu0 %v513_v12  ;;  %460 = vmatprep.mubr.f32.mxu1 %v513_v12 }
   0x2   :  { %v550_v3 = vcombine.high %v538_v0, %v538_v0  ;;  %v554_v4 = vcombine.high %v543_v1, %v543_v1  ;;  %72 = vst [vmem:[#allocation3 + $0x4] sm:$0xf] %v487_v2  ;;  %v486_v5 = vld [vmem:[%s651_s1 + $0x8] sm:$0xf]  ;;  %v113_v10 = vrot.slane %v538_v0, 4  ;;  %v303_v11 = vrot.slane %v543_v1, 4 }
   0x3   :  { %70 = vst [vmem:[#allocation3] sm:$0xf] %v486_v5  ;;  %s509_s1 = smov 114   ;;  %s511_s23 = smov 126   ;;  %vm177_vm3 = vcmask 834560   ;;  %vm155_vm4 = vcmask 932864  }
   0x4   :  { %195 = vrot.lane.b32.xlu0 %v550_v3, %s506_s0  ;;  %378 = vrot.lane.b32.xlu1 %v554_v4, %s506_s0  ;;  %s512_s24 = smov 115   ;;  %s514_s25 = smov 127   ;;  %vm166_vm5 = vcmask 924672   ;;  %vm133_vm6 = vcmask 1031168   ;;  %vm144_vm7 = vcmask 941056   ;;  %vm122_vm8 = vcmask 1039360  }
   0x5   :  { %vm211_vm9 = vcmask 293888  }
   0x8   :  { %173 = vrot.lane.b32.xlu0 %v550_v3, %s507_s20 }
   0x9   :  { %v298_v6 = vld [vmem:[#allocation3 + $0x4] sm:$0xf] }
   0xa   :  { %380 = vrot.lane.b32.xlu1 %v298_v6, %s506_s0  ;;  %v108_v7 = vld [vmem:[#allocation3] sm:$0xf]  ;;  %v305_v9 = vrot.slane %v298_v6, 4 }
   0xb   :  { %v115_v8 = vrot.slane %v108_v7, 4 }
   0xc   :  { %197 = vrot.lane.b32.xlu0 %v108_v7, %s506_s0 }
   0xe   :  { %175 = vrot.lane.b32.xlu1 %v108_v7, %s507_s20 }
  0x10   :  { %184 = vrot.lane.b32.xlu0 %v550_v3, %s508_s21 }
  0x12   :  { %186 = vrot.lane.b32.xlu1 %v115_v8, %s508_s21 }
  0x14   :  { %193 = vrot.lane.b32.xlu0 %v538_v0, %s506_s0 }
  0x16   :  { %358 = vrot.lane.b32.xlu1 %v554_v4, %s507_s20 }
  0x18   :  { %360 = vrot.lane.b32.xlu0 %v298_v6, %s507_s20 }
  0x1a   :  { %368 = vrot.lane.b32.xlu1 %v554_v4, %s508_s21 }
  0x1c   :  { %370 = vrot.lane.b32.xlu0 %v305_v9, %s508_s21 }
  0x1e   :  { %376 = vrot.lane.b32.xlu1 %v543_v1, %s506_s0 }
  0x20   :  { %171 = vrot.lane.b32.xlu0 %v538_v0, %s507_s20 }
  0x22   :  { %182 = vrot.lane.b32.xlu1 %v113_v10, %s508_s21 }
  0x24   :  { %356 = vrot.lane.b32.xlu0 %v543_v1, %s507_s20 }
  0x26   :  { %366 = vrot.lane.b32.xlu1 %v303_v11, %s508_s21 }
  0x28   :  { %151 = vrot.lane.b32.xlu0 %v550_v3, %s509_s1 }
  0x2a   :  { %153 = vrot.lane.b32.xlu1 %v108_v7, %s509_s1 }
  0x2c   :  { %162 = vrot.lane.b32.xlu0 %v550_v3, %s510_s22 }
  0x2e   :  { %164 = vrot.lane.b32.xlu1 %v115_v8, %s510_s22 }
  0x30   :  { %338 = vrot.lane.b32.xlu0 %v554_v4, %s509_s1 }
  0x32   :  { %340 = vrot.lane.b32.xlu1 %v298_v6, %s509_s1 }
  0x34   :  { %348 = vrot.lane.b32.xlu0 %v554_v4, %s510_s22 }
  0x36   :  { %350 = vrot.lane.b32.xlu1 %v305_v9, %s510_s22 }
  0x38   :  { %149 = vrot.lane.b32.xlu0 %v538_v0, %s509_s1 }
  0x3a   :  { %160 = vrot.lane.b32.xlu1 %v113_v10, %s510_s22 }
  0x3c   :  { %336 = vrot.lane.b32.xlu0 %v543_v1, %s509_s1 }
  0x3e   :  { %346 = vrot.lane.b32.xlu1 %v303_v11, %s510_s22 }
  0x40   :  { %129 = vrot.lane.b32.xlu0 %v550_v3, %s511_s23 }
  0x42   :  { %131 = vrot.lane.b32.xlu1 %v108_v7, %s511_s23 }
  0x44   :  { %140 = vrot.lane.b32.xlu0 %v550_v3, %s512_s24 }
  0x46   :  { %142 = vrot.lane.b32.xlu1 %v115_v8, %s512_s24 }
  0x48   :  { %318 = vrot.lane.b32.xlu0 %v554_v4, %s511_s23 }
  0x4a   :  { %320 = vrot.lane.b32.xlu1 %v298_v6, %s511_s23 }
  0x4c   :  { %328 = vrot.lane.b32.xlu0 %v554_v4, %s512_s24 }
  0x4e   :  { %330 = vrot.lane.b32.xlu1 %v305_v9, %s512_s24 }
  0x50   :  { %127 = vrot.lane.b32.xlu0 %v538_v0, %s511_s23 }
  0x52   :  { %138 = vrot.lane.b32.xlu1 %v113_v10, %s512_s24 }
  0x54   :  { %316 = vrot.lane.b32.xlu0 %v543_v1, %s511_s23 }
  0x56   :  { %326 = vrot.lane.b32.xlu1 %v303_v11, %s512_s24 }
  0x58   :  { %118 = vrot.lane.b32.xlu0 %v550_v3, %s514_s25 }
  0x5a   :  { %120 = vrot.lane.b32.xlu1 %v115_v8, %s514_s25 }
  0x5c   :  { %308 = vrot.lane.b32.xlu0 %v554_v4, %s514_s25 }
  0x5e   :  { %310 = vrot.lane.b32.xlu1 %v305_v9, %s514_s25 }
  0x60   :  { %116 = vrot.lane.b32.xlu0 %v113_v10, %s514_s25 }
  0x62   :  { %306 = vrot.lane.b32.xlu1 %v303_v11, %s514_s25 }
  0x76   :  { %v196_v13 = vpop.permute.xlu0 %195  ;;  %v379_v14 = vpop.permute.xlu1 %378 }
  0x7a   :  { %v174_v15 = vpop.permute.xlu0 %173 }
  0x7c   :  { %v381_v16 = vpop.permute.xlu1 %380 }
  0x7d   :  { %v383_v17 = vsel %vm199_vm0, %v379_v14, %v381_v16 }
  0x7e   :  { %491 = vmatprep.subr.msk.mxu1 %vm202_vm1, %v383_v17  ;;  %v198_v18 = vpop.permute.xlu0 %197 }
  0x7f   :  { %v201_v19 = vsel %vm199_vm0, %v196_v13, %v198_v18 }
  0x80   :  { %v176_v20 = vpop.permute.xlu1 %175  ;;  %488 = vmatprep.subr.msk.mxu0 %vm202_vm1, %v201_v19 }
  0x81   :  { %v179_v25 = vsel %vm177_vm3, %v174_v15, %v176_v20 }
  0x82   :  { %v185_v21 = vpop.permute.xlu0 %184 }
  0x84   :  { %v187_v22 = vpop.permute.xlu1 %186 }
  0x85   :  { %v190_v23 = vsel %vm188_vm2, %v185_v21, %v187_v22 }
  0x86   :  { %v194_v24 = vpop.permute.xlu0 %193  ;;  %v210_v28 = vsel %vm202_vm1, %v179_v25, %v190_v23 }
  0x87   :  { %v200_v26 = vsel %vm199_vm0, %v194_v24, %v196_v13 }
  0x88   :  { %v359_v27 = vpop.permute.xlu1 %358  ;;  %489 = vmatpush1.msk.msra.mxu0 %vm202_vm1, %v200_v26 }
  0x89   :  { %243 = vmatprep.subr.mxu0 %v210_v28 }
  0x8a   :  { %v361_v29 = vpop.permute.xlu0 %360 }
  0x8b   :  { %v363_v34 = vsel %vm177_vm3, %v359_v27, %v361_v29 }
  0x8c   :  { %v369_v30 = vpop.permute.xlu1 %368 }
  0x8e   :  { %v371_v31 = vpop.permute.xlu0 %370 }
  0x8f   :  { %v373_v32 = vsel %vm188_vm2, %v369_v30, %v371_v31 }
  0x90   :  { %v377_v33 = vpop.permute.xlu1 %376  ;;  %v391_v37 = vsel %vm202_vm1, %v363_v34, %v373_v32 }
  0x91   :  { %v382_v35 = vsel %vm199_vm0, %v377_v33, %v379_v14 }
  0x92   :  { %492 = vmatpush1.msk.msra.mxu1 %vm202_vm1, %v382_v35  ;;  %v172_v36 = vpop.permute.xlu0 %171 }
  0x93   :  { %420 = vmatprep.subr.mxu1 %v391_v37  ;;  %v178_v39 = vsel %vm177_vm3, %v172_v36, %v174_v15 }
  0x94   :  { %v183_v38 = vpop.permute.xlu1 %182 }
  0x95   :  { %v189_v40 = vsel %vm188_vm2, %v183_v38, %v185_v21 }
  0x96   :  { %v357_v41 = vpop.permute.xlu0 %356  ;;  %v209_v42 = vsel %vm202_vm1, %v178_v39, %v189_v40 }
  0x97   :  { %244 = vmatpush1.msra.mxu0 %v209_v42  ;;  %v362_v44 = vsel %vm177_vm3, %v357_v41, %v359_v27 }
  0x98   :  { %v367_v43 = vpop.permute.xlu1 %366 }
  0x99   :  { %v372_v45 = vsel %vm188_vm2, %v367_v43, %v369_v30 }
  0x9a   :  { %v152_v46 = vpop.permute.xlu0 %151  ;;  %v390_v47 = vsel %vm202_vm1, %v362_v44, %v372_v45  ;;  %v106_v45 = vld [vmem:[%s652_s2] sm:$0xf] }
  0x9b   :  { %421 = vmatpush1.msra.mxu1 %v390_v47 }
  0x9c   :  { %v154_v48 = vpop.permute.xlu1 %153 }
  0x9d   :  { %v157_v51 = vsel %vm155_vm4, %v152_v46, %v154_v48 }
  0x9e   :  { %v163_v49 = vpop.permute.xlu0 %162 }
  0xa0   :  { %v165_v50 = vpop.permute.xlu1 %164 }
  0xa1   :  { %v168_v52 = vsel %vm166_vm5, %v163_v49, %v165_v50 }
  0xa2   :  { %v339_v53 = vpop.permute.xlu0 %338  ;;  %v208_v54 = vsel %vm202_vm1, %v157_v51, %v168_v52 }
  0xa3   :  { %245 = vmatprep.subr.mxu0 %v208_v54 }
  0xa4   :  { %v341_v55 = vpop.permute.xlu1 %340 }
  0xa5   :  { %v343_v58 = vsel %vm155_vm4, %v339_v53, %v341_v55 }
  0xa6   :  { %v349_v56 = vpop.permute.xlu0 %348 }
  0xa8   :  { %v351_v57 = vpop.permute.xlu1 %350 }
  0xa9   :  { %v353_v59 = vsel %vm166_vm5, %v349_v56, %v351_v57 }
  0xaa   :  { %v150_v60 = vpop.permute.xlu0 %149  ;;  %v389_v61 = vsel %vm202_vm1, %v343_v58, %v353_v59 }
  0xab   :  { %422 = vmatprep.subr.mxu1 %v389_v61  ;;  %v156_v63 = vsel %vm155_vm4, %v150_v60, %v152_v46 }
  0xac   :  { %v161_v62 = vpop.permute.xlu1 %160 }
  0xad   :  { %v167_v2 = vsel %vm166_vm5, %v161_v62, %v163_v49 }
  0xae   :  { %v337_v5 = vpop.permute.xlu0 %336  ;;  %v207_v6 = vsel %vm202_vm1, %v156_v63, %v167_v2 }
  0xaf   :  { %246 = vmatpush1.msra.mxu0 %v207_v6  ;;  %v342_v8 = vsel %vm155_vm4, %v337_v5, %v339_v53 }
  0xb0   :  { %v347_v7 = vpop.permute.xlu1 %346 }
  0xb1   :  { %v352_v9 = vsel %vm166_vm5, %v347_v7, %v349_v56 }
  0xb2   :  { %v130_v10 = vpop.permute.xlu0 %129  ;;  %v388_v11 = vsel %vm202_vm1, %v342_v8, %v352_v9 }
  0xb3   :  { %423 = vmatpush1.msra.mxu1 %v388_v11 }
  0xb4   :  { %v132_v12 = vpop.permute.xlu1 %131 }
  0xb5   :  { %v135_v15 = vsel %vm133_vm6, %v130_v10, %v132_v12 }
  0xb6   :  { %v141_v13 = vpop.permute.xlu0 %140 }
  0xb8   :  { %v143_v14 = vpop.permute.xlu1 %142 }
  0xb9   :  { %v146_v16 = vsel %vm144_vm7, %v141_v13, %v143_v14 }
  0xba   :  { %v319_v17 = vpop.permute.xlu0 %318  ;;  %v206_v18 = vsel %vm202_vm1, %v135_v15, %v146_v16 }
  0xbb   :  { %247 = vmatprep.subr.mxu0 %v206_v18 }
  0xbc   :  { %v321_v19 = vpop.permute.xlu1 %320 }
  0xbd   :  { %v323_v22 = vsel %vm133_vm6, %v319_v17, %v321_v19 }
  0xbe   :  { %v329_v20 = vpop.permute.xlu0 %328 }
  0xc0   :  { %v331_v21 = vpop.permute.xlu1 %330 }
  0xc1   :  { %v333_v23 = vsel %vm144_vm7, %v329_v20, %v331_v21 }
  0xc2   :  { %v128_v24 = vpop.permute.xlu0 %127  ;;  %v387_v25 = vsel %vm202_vm1, %v323_v22, %v333_v23 }
  0xc3   :  { %424 = vmatprep.subr.mxu1 %v387_v25  ;;  %v134_v27 = vsel %vm133_vm6, %v128_v24, %v130_v10 }
  0xc4   :  { %v139_v26 = vpop.permute.xlu1 %138 }
  0xc5   :  { %v145_v28 = vsel %vm144_vm7, %v139_v26, %v141_v13 }
  0xc6   :  { %v317_v29 = vpop.permute.xlu0 %316  ;;  %v205_v30 = vsel %vm202_vm1, %v134_v27, %v145_v28 }
  0xc7   :  { %248 = vmatpush1.msra.mxu0 %v205_v30  ;;  %v322_v32 = vsel %vm133_vm6, %v317_v29, %v319_v17 }
  0xc8   :  { %v327_v31 = vpop.permute.xlu1 %326 }
  0xc9   :  { %v332_v33 = vsel %vm144_vm7, %v327_v31, %v329_v20 }
  0xca   :  { %v119_v34 = vpop.permute.xlu0 %118  ;;  %v386_v35 = vsel %vm202_vm1, %v322_v32, %v332_v33 }
  0xcb   :  { %425 = vmatpush1.msra.mxu1 %v386_v35 }
  0xcc   :  { %v121_v36 = vpop.permute.xlu1 %120 }
  0xcd   :  { %v124_v37 = vsel %vm122_vm8, %v119_v34, %v121_v36 }
  0xce   :  { %v309_v38 = vpop.permute.xlu0 %308  ;;  %v204_v39 = vsel %vm202_vm1, %v550_v3, %v124_v37 }
  0xcf   :  { %249 = vmatprep.subr.mxu0 %v204_v39 }
  0xd0   :  { %v311_v40 = vpop.permute.xlu1 %310 }
  0xd1   :  { %v313_v41 = vsel %vm122_vm8, %v309_v38, %v311_v40 }
  0xd2   :  { %v117_v42 = vpop.permute.xlu0 %116  ;;  %v385_v43 = vsel %vm202_vm1, %v554_v4, %v313_v41 }
  0xd3   :  { %v123_v44 = vsel %vm122_vm8, %v117_v42, %v119_v34  ;;  %426 = vmatprep.subr.mxu1 %v385_v43 }
  0xd4   :  { %v307_v46 = vpop.permute.xlu1 %306  ;;  %v203_v3 = vsel %vm202_vm1, %v538_v0, %v123_v44 }
  0xd5   :  { %v312_v47 = vsel %vm122_vm8, %v307_v46, %v309_v38  ;;  %250 = vmatpush1.msra.mxu0 %v203_v3 }
  0xd6   :  { %490 = vmatmul.mubr.msk.f32.vlgmr.msra.gmra.mxu0 %vm211_vm9, %v106_v45  ;;  %v384_v48 = vsel %vm202_vm1, %v543_v1, %v312_v47 }
  0xd7   :  { %427 = vmatpush1.msra.mxu1 %v384_v48 }
  0xd8   :  { %493 = vmatmul.mubr.msk.f32.vlgmr.msra.gmra.mxu1 %vm211_vm9, %v106_v45 }
 0x196   :  { %v285_v4 = vpop.f32.mrf.mxu0 }
 0x198   :  { %v287_v49 = vpop.f32.mrf.mxu0  ;;  %v462_v50 = vpop.f32.mrf.mxu1 }
 0x199   :  { %v292_v51 = vcombine.low %v285_v4, %v287_v49 }
 0x19a   :  { %v464_v52 = vpop.f32.mrf.mxu1 }
 0x19b   :  { %294 = vst [vmem:[%s653_s3] sm:$0xff] %v292_v51  ;;  %v469_v53 = vcombine.low %v462_v50, %v464_v52 }
 0x19d   :  { %494 = vst [vmem:[%s653_s3 + $0x8] sm:$0xff] %v469_v53 }

// kernel: scale_conv_forward.12
= control target key start
LH: loop header
LB: loop body
LE: loop exit
PB: predicated region body
PF: predicated region fallthrough
CT: control target
= control target key end

     0   :  { %s507_s20 = smov 96   ;;  %s508_s21 = smov 95   ;;  %v513_v12 = vmov 0.0   ;;  %vm199_vm0 = vcmask 769024   ;;  %vm202_vm1 = vcmask 1043456   ;;  %vm188_vm2 = vcmask 777216   ;;  %s650_s0 = inlined_call_operand.vmem [shape: f32[2,4,384], index: 0, kind: input, shape index: {}, may-alias: {0,1}]   ;;  %s651_s1 = inlined_call_operand.vmem [shape: f32[2,4,384], index: 1, kind: input, shape index: {}, may-alias: {0,1}]   ;;  %s652_s2 = inlined_call_operand.vmem [shape: f32[4,36], index: 2, kind: input, shape index: {}]   ;;  %s653_s3 = inlined_call_operand.vmem [shape: f32[2,4,256], index: 3, kind: output, shape index: {}]  }
   0x1   :  { %v538_v0 = vld [vmem:[%s650_s0] sm:$0xff]  ;;  %v543_v1 = vld [vmem:[%s650_s0 + $0xc] sm:$0xff]  ;;  %v487_v2 = vld [vmem:[%s651_s1 + $0x14] sm:$0xf]  ;;  %s506_s0 = smov 94   ;;  %s510_s22 = smov 110   ;;  %283 = vmatprep.mubr.f32.mxu0 %v513_v12  ;;  %460 = vmatprep.mubr.f32.mxu1 %v513_v12 }
   0x2   :  { %v550_v3 = vcombine.high %v538_v0, %v538_v0  ;;  %v554_v4 = vcombine.high %v543_v1, %v543_v1  ;;  %72 = vst [vmem:[#allocation3 + $0x4] sm:$0xf] %v487_v2  ;;  %v486_v5 = vld [vmem:[%s651_s1 + $0x8] sm:$0xf]  ;;  %v113_v10 = vrot.slane %v538_v0, 4  ;;  %v303_v11 = vrot.slane %v543_v1, 4 }
   0x3   :  { %70 = vst [vmem:[#allocation3] sm:$0xf] %v486_v5  ;;  %s509_s1 = smov 111   ;;  %s511_s23 = smov 126   ;;  %vm177_vm3 = vcmask 785408   ;;  %vm155_vm4 = vcmask 908288  }
   0x4   :  { %195 = vrot.lane.b32.xlu0 %v550_v3, %s506_s0  ;;  %378 = vrot.lane.b32.xlu1 %v554_v4, %s506_s0  ;;  %s512_s24 = smov 112   ;;  %s514_s25 = smov 127   ;;  %vm166_vm5 = vcmask 900096   ;;  %vm133_vm6 = vcmask 1031168   ;;  %vm144_vm7 = vcmask 916480   ;;  %vm122_vm8 = vcmask 1039360  }
   0x5   :  { %vm211_vm9 = vcmask 293888  }
   0x8   :  { %173 = vrot.lane.b32.xlu0 %v550_v3, %s507_s20 }
   0x9   :  { %v298_v6 = vld [vmem:[#allocation3 + $0x4] sm:$0xf] }
   0xa   :  { %380 = vrot.lane.b32.xlu1 %v298_v6, %s506_s0  ;;  %v108_v7 = vld [vmem:[#allocation3] sm:$0xf]  ;;  %v305_v9 = vrot.slane %v298_v6, 4 }
   0xb   :  { %v115_v8 = vrot.slane %v108_v7, 4 }
   0xc   :  { %197 = vrot.lane.b32.xlu0 %v108_v7, %s506_s0 }
   0xe   :  { %175 = vrot.lane.b32.xlu1 %v108_v7, %s507_s20 }
  0x10   :  { %184 = vrot.lane.b32.xlu0 %v550_v3, %s508_s21 }
  0x12   :  { %186 = vrot.lane.b32.xlu1 %v115_v8, %s508_s21 }
  0x14   :  { %193 = vrot.lane.b32.xlu0 %v538_v0, %s506_s0 }
  0x16   :  { %358 = vrot.lane.b32.xlu1 %v554_v4, %s507_s20 }
  0x18   :  { %360 = vrot.lane.b32.xlu0 %v298_v6, %s507_s20 }
  0x1a   :  { %368 = vrot.lane.b32.xlu1 %v554_v4, %s508_s21 }
  0x1c   :  { %370 = vrot.lane.b32.xlu0 %v305_v9, %s508_s21 }
  0x1e   :  { %376 = vrot.lane.b32.xlu1 %v543_v1, %s506_s0 }
  0x20   :  { %171 = vrot.lane.b32.xlu0 %v538_v0, %s507_s20 }
  0x22   :  { %182 = vrot.lane.b32.xlu1 %v113_v10, %s508_s21 }
  0x24   :  { %356 = vrot.lane.b32.xlu0 %v543_v1, %s507_s20 }
  0x26   :  { %366 = vrot.lane.b32.xlu1 %v303_v11, %s508_s21 }
  0x28   :  { %151 = vrot.lane.b32.xlu0 %v550_v3, %s509_s1 }
  0x2a   :  { %153 = vrot.lane.b32.xlu1 %v108_v7, %s509_s1 }
  0x2c   :  { %162 = vrot.lane.b32.xlu0 %v550_v3, %s510_s22 }
  0x2e   :  { %164 = vrot.lane.b32.xlu1 %v115_v8, %s510_s22 }
  0x30   :  { %338 = vrot.lane.b32.xlu0 %v554_v4, %s509_s1 }
  0x32   :  { %340 = vrot.lane.b32.xlu1 %v298_v6, %s509_s1 }
  0x34   :  { %348 = vrot.lane.b32.xlu0 %v554_v4, %s510_s22 }
  0x36   :  { %350 = vrot.lane.b32.xlu1 %v305_v9, %s510_s22 }
  0x38   :  { %149 = vrot.lane.b32.xlu0 %v538_v0, %s509_s1 }
  0x3a   :  { %160 = vrot.lane.b32.xlu1 %v113_v10, %s510_s22 }
  0x3c   :  { %336 = vrot.lane.b32.xlu0 %v543_v1, %s509_s1 }
  0x3e   :  { %346 = vrot.lane.b32.xlu1 %v303_v11, %s510_s22 }
  0x40   :  { %129 = vrot.lane.b32.xlu0 %v550_v3, %s511_s23 }
  0x42   :  { %131 = vrot.lane.b32.xlu1 %v108_v7, %s511_s23 }
  0x44   :  { %140 = vrot.lane.b32.xlu0 %v550_v3, %s512_s24 }
  0x46   :  { %142 = vrot.lane.b32.xlu1 %v115_v8, %s512_s24 }
  0x48   :  { %318 = vrot.lane.b32.xlu0 %v554_v4, %s511_s23 }
  0x4a   :  { %320 = vrot.lane.b32.xlu1 %v298_v6, %s511_s23 }
  0x4c   :  { %328 = vrot.lane.b32.xlu0 %v554_v4, %s512_s24 }
  0x4e   :  { %330 = vrot.lane.b32.xlu1 %v305_v9, %s512_s24 }
  0x50   :  { %127 = vrot.lane.b32.xlu0 %v538_v0, %s511_s23 }
  0x52   :  { %138 = vrot.lane.b32.xlu1 %v113_v10, %s512_s24 }
  0x54   :  { %316 = vrot.lane.b32.xlu0 %v543_v1, %s511_s23 }
  0x56   :  { %326 = vrot.lane.b32.xlu1 %v303_v11, %s512_s24 }
  0x58   :  { %118 = vrot.lane.b32.xlu0 %v550_v3, %s514_s25 }
  0x5a   :  { %120 = vrot.lane.b32.xlu1 %v115_v8, %s514_s25 }
  0x5c   :  { %308 = vrot.lane.b32.xlu0 %v554_v4, %s514_s25 }
  0x5e   :  { %310 = vrot.lane.b32.xlu1 %v305_v9, %s514_s25 }
  0x60   :  { %116 = vrot.lane.b32.xlu0 %v113_v10, %s514_s25 }
  0x62   :  { %306 = vrot.lane.b32.xlu1 %v303_v11, %s514_s25 }
  0x76   :  { %v196_v13 = vpop.permute.xlu0 %195  ;;  %v379_v14 = vpop.permute.xlu1 %378 }
  0x7a   :  { %v174_v15 = vpop.permute.xlu0 %173 }
  0x7c   :  { %v381_v16 = vpop.permute.xlu1 %380 }
  0x7d   :  { %v383_v17 = vsel %vm199_vm0, %v379_v14, %v381_v16 }
  0x7e   :  { %491 = vmatprep.subr.msk.mxu1 %vm202_vm1, %v383_v17  ;;  %v198_v18 = vpop.permute.xlu0 %197 }
  0x7f   :  { %v201_v19 = vsel %vm199_vm0, %v196_v13, %v198_v18 }
  0x80   :  { %v176_v20 = vpop.permute.xlu1 %175  ;;  %488 = vmatprep.subr.msk.mxu0 %vm202_vm1, %v201_v19 }
  0x81   :  { %v179_v25 = vsel %vm177_vm3, %v174_v15, %v176_v20 }
  0x82   :  { %v185_v21 = vpop.permute.xlu0 %184 }
  0x84   :  { %v187_v22 = vpop.permute.xlu1 %186 }
  0x85   :  { %v190_v23 = vsel %vm188_vm2, %v185_v21, %v187_v22 }
  0x86   :  { %v194_v24 = vpop.permute.xlu0 %193  ;;  %v210_v28 = vsel %vm202_vm1, %v179_v25, %v190_v23 }
  0x87   :  { %v200_v26 = vsel %vm199_vm0, %v194_v24, %v196_v13 }
  0x88   :  { %v359_v27 = vpop.permute.xlu1 %358  ;;  %489 = vmatpush1.msk.msra.mxu0 %vm202_vm1, %v200_v26 }
  0x89   :  { %243 = vmatprep.subr.mxu0 %v210_v28 }
  0x8a   :  { %v361_v29 = vpop.permute.xlu0 %360 }
  0x8b   :  { %v363_v34 = vsel %vm177_vm3, %v359_v27, %v361_v29 }
  0x8c   :  { %v369_v30 = vpop.permute.xlu1 %368 }
  0x8e   :  { %v371_v31 = vpop.permute.xlu0 %370 }
  0x8f   :  { %v373_v32 = vsel %vm188_vm2, %v369_v30, %v371_v31 }
  0x90   :  { %v377_v33 = vpop.permute.xlu1 %376  ;;  %v391_v37 = vsel %vm202_vm1, %v363_v34, %v373_v32 }
  0x91   :  { %v382_v35 = vsel %vm199_vm0, %v377_v33, %v379_v14 }
  0x92   :  { %492 = vmatpush1.msk.msra.mxu1 %vm202_vm1, %v382_v35  ;;  %v172_v36 = vpop.permute.xlu0 %171 }
  0x93   :  { %420 = vmatprep.subr.mxu1 %v391_v37  ;;  %v178_v39 = vsel %vm177_vm3, %v172_v36, %v174_v15 }
  0x94   :  { %v183_v38 = vpop.permute.xlu1 %182 }
  0x95   :  { %v189_v40 = vsel %vm188_vm2, %v183_v38, %v185_v21 }
  0x96   :  { %v357_v41 = vpop.permute.xlu0 %356  ;;  %v209_v42 = vsel %vm202_vm1, %v178_v39, %v189_v40 }
  0x97   :  { %244 = vmatpush1.msra.mxu0 %v209_v42  ;;  %v362_v44 = vsel %vm177_vm3, %v357_v41, %v359_v27 }
  0x98   :  { %v367_v43 = vpop.permute.xlu1 %366 }
  0x99   :  { %v372_v45 = vsel %vm188_vm2, %v367_v43, %v369_v30 }
  0x9a   :  { %v152_v46 = vpop.permute.xlu0 %151  ;;  %v390_v47 = vsel %vm202_vm1, %v362_v44, %v372_v45  ;;  %v106_v45 = vld [vmem:[%s652_s2] sm:$0xf] }
  0x9b   :  { %421 = vmatpush1.msra.mxu1 %v390_v47 }
  0x9c   :  { %v154_v48 = vpop.permute.xlu1 %153 }
  0x9d   :  { %v157_v51 = vsel %vm155_vm4, %v152_v46, %v154_v48 }
  0x9e   :  { %v163_v49 = vpop.permute.xlu0 %162 }
  0xa0   :  { %v165_v50 = vpop.permute.xlu1 %164 }
  0xa1   :  { %v168_v52 = vsel %vm166_vm5, %v163_v49, %v165_v50 }
  0xa2   :  { %v339_v53 = vpop.permute.xlu0 %338  ;;  %v208_v54 = vsel %vm202_vm1, %v157_v51, %v168_v52 }
  0xa3   :  { %245 = vmatprep.subr.mxu0 %v208_v54 }
  0xa4   :  { %v341_v55 = vpop.permute.xlu1 %340 }
  0xa5   :  { %v343_v58 = vsel %vm155_vm4, %v339_v53, %v341_v55 }
  0xa6   :  { %v349_v56 = vpop.permute.xlu0 %348 }
  0xa8   :  { %v351_v57 = vpop.permute.xlu1 %350 }
  0xa9   :  { %v353_v59 = vsel %vm166_vm5, %v349_v56, %v351_v57 }
  0xaa   :  { %v150_v60 = vpop.permute.xlu0 %149  ;;  %v389_v61 = vsel %vm202_vm1, %v343_v58, %v353_v59 }
  0xab   :  { %422 = vmatprep.subr.mxu1 %v389_v61  ;;  %v156_v63 = vsel %vm155_vm4, %v150_v60, %v152_v46 }
  0xac   :  { %v161_v62 = vpop.permute.xlu1 %160 }
  0xad   :  { %v167_v2 = vsel %vm166_vm5, %v161_v62, %v163_v49 }
  0xae   :  { %v337_v5 = vpop.permute.xlu0 %336  ;;  %v207_v6 = vsel %vm202_vm1, %v156_v63, %v167_v2 }
  0xaf   :  { %246 = vmatpush1.msra.mxu0 %v207_v6  ;;  %v342_v8 = vsel %vm155_vm4, %v337_v5, %v339_v53 }
  0xb0   :  { %v347_v7 = vpop.permute.xlu1 %346 }
  0xb1   :  { %v352_v9 = vsel %vm166_vm5, %v347_v7, %v349_v56 }
  0xb2   :  { %v130_v10 = vpop.permute.xlu0 %129  ;;  %v388_v11 = vsel %vm202_vm1, %v342_v8, %v352_v9 }
  0xb3   :  { %423 = vmatpush1.msra.mxu1 %v388_v11 }
  0xb4   :  { %v132_v12 = vpop.permute.xlu1 %131 }
  0xb5   :  { %v135_v15 = vsel %vm133_vm6, %v130_v10, %v132_v12 }
  0xb6   :  { %v141_v13 = vpop.permute.xlu0 %140 }
  0xb8   :  { %v143_v14 = vpop.permute.xlu1 %142 }
  0xb9   :  { %v146_v16 = vsel %vm144_vm7, %v141_v13, %v143_v14 }
  0xba   :  { %v319_v17 = vpop.permute.xlu0 %318  ;;  %v206_v18 = vsel %vm202_vm1, %v135_v15, %v146_v16 }
  0xbb   :  { %247 = vmatprep.subr.mxu0 %v206_v18 }
  0xbc   :  { %v321_v19 = vpop.permute.xlu1 %320 }
  0xbd   :  { %v323_v22 = vsel %vm133_vm6, %v319_v17, %v321_v19 }
  0xbe   :  { %v329_v20 = vpop.permute.xlu0 %328 }
  0xc0   :  { %v331_v21 = vpop.permute.xlu1 %330 }
  0xc1   :  { %v333_v23 = vsel %vm144_vm7, %v329_v20, %v331_v21 }
  0xc2   :  { %v128_v24 = vpop.permute.xlu0 %127  ;;  %v387_v25 = vsel %vm202_vm1, %v323_v22, %v333_v23 }
  0xc3   :  { %424 = vmatprep.subr.mxu1 %v387_v25  ;;  %v134_v27 = vsel %vm133_vm6, %v128_v24, %v130_v10 }
  0xc4   :  { %v139_v26 = vpop.permute.xlu1 %138 }
  0xc5   :  { %v145_v28 = vsel %vm144_vm7, %v139_v26, %v141_v13 }
  0xc6   :  { %v317_v29 = vpop.permute.xlu0 %316  ;;  %v205_v30 = vsel %vm202_vm1, %v134_v27, %v145_v28 }
  0xc7   :  { %248 = vmatpush1.msra.mxu0 %v205_v30  ;;  %v322_v32 = vsel %vm133_vm6, %v317_v29, %v319_v17 }
  0xc8   :  { %v327_v31 = vpop.permute.xlu1 %326 }
  0xc9   :  { %v332_v33 = vsel %vm144_vm7, %v327_v31, %v329_v20 }
  0xca   :  { %v119_v34 = vpop.permute.xlu0 %118  ;;  %v386_v35 = vsel %vm202_vm1, %v322_v32, %v332_v33 }
  0xcb   :  { %425 = vmatpush1.msra.mxu1 %v386_v35 }
  0xcc   :  { %v121_v36 = vpop.permute.xlu1 %120 }
  0xcd   :  { %v124_v37 = vsel %vm122_vm8, %v119_v34, %v121_v36 }
  0xce   :  { %v309_v38 = vpop.permute.xlu0 %308  ;;  %v204_v39 = vsel %vm202_vm1, %v550_v3, %v124_v37 }
  0xcf   :  { %249 = vmatprep.subr.mxu0 %v204_v39 }
  0xd0   :  { %v311_v40 = vpop.permute.xlu1 %310 }
  0xd1   :  { %v313_v41 = vsel %vm122_vm8, %v309_v38, %v311_v40 }
  0xd2   :  { %v117_v42 = vpop.permute.xlu0 %116  ;;  %v385_v43 = vsel %vm202_vm1, %v554_v4, %v313_v41 }
  0xd3   :  { %v123_v44 = vsel %vm122_vm8, %v117_v42, %v119_v34  ;;  %426 = vmatprep.subr.mxu1 %v385_v43 }
  0xd4   :  { %v307_v46 = vpop.permute.xlu1 %306  ;;  %v203_v3 = vsel %vm202_vm1, %v538_v0, %v123_v44 }
  0xd5   :  { %v312_v47 = vsel %vm122_vm8, %v307_v46, %v309_v38  ;;  %250 = vmatpush1.msra.mxu0 %v203_v3 }
  0xd6   :  { %490 = vmatmul.mubr.msk.f32.vlgmr.msra.gmra.mxu0 %vm211_vm9, %v106_v45  ;;  %v384_v48 = vsel %vm202_vm1, %v543_v1, %v312_v47 }
  0xd7   :  { %427 = vmatpush1.msra.mxu1 %v384_v48 }
  0xd8   :  { %493 = vmatmul.mubr.msk.f32.vlgmr.msra.gmra.mxu1 %vm211_vm9, %v106_v45 }
 0x196   :  { %v285_v4 = vpop.f32.mrf.mxu0 }
 0x198   :  { %v287_v49 = vpop.f32.mrf.mxu0  ;;  %v462_v50 = vpop.f32.mrf.mxu1 }
 0x199   :  { %v292_v51 = vcombine.low %v285_v4, %v287_v49 }
 0x19a   :  { %v464_v52 = vpop.f32.mrf.mxu1 }
 0x19b   :  { %294 = vst [vmem:[%s653_s3] sm:$0xff] %v292_v51  ;;  %v469_v53 = vcombine.low %v462_v50, %v464_v52 }
 0x19d   :  { %494 = vst [vmem:[%s653_s3 + $0x8] sm:$0xff] %v469_v53 }

// kernel: scale_conv_forward.9
= control target key start
LH: loop header
LB: loop body
LE: loop exit
PB: predicated region body
PF: predicated region fallthrough
CT: control target
= control target key end

     0   :  { %s813_s20 = smov 86   ;;  %s814_s21 = smov 88   ;;  %v821_v11 = vmov 0.0   ;;  %vm251_vm0 = vcmask 703488   ;;  %vm256_vm1 = vcmask 1043456   ;;  %vm213_vm2 = vcmask 719872   ;;  %s1175_s0 = inlined_call_operand.vmem [shape: f32[2,4,640], index: 0, kind: input, shape index: {}, may-alias: {0,1}]   ;;  %s1176_s1 = inlined_call_operand.vmem [shape: f32[2,4,640], index: 1, kind: input, shape index: {}, may-alias: {0,1}]   ;;  %s1177_s2 = inlined_call_operand.vmem [shape: f32[4,36], index: 2, kind: input, shape index: {}]   ;;  %s1178_s3 = inlined_call_operand.vmem [shape: f32[2,4,512], index: 3, kind: output, shape index: {}]  }
   0x1   :  { %v845_v0 = vld [vmem:[%s1175_s0 + $0x8] sm:$0xff]  ;;  %v850_v1 = vld [vmem:[%s1175_s0] sm:$0xff]  ;;  %v784_v2 = vld [vmem:[%s1176_s1 + $0x10] sm:$0xf]  ;;  %s816_s22 = smov 107   ;;  %s817_s23 = smov 106   ;;  %420 = vmatprep.mubr.f32.mxu1 %v821_v11  ;;  %349 = vmatprep.mubr.f32.mxu0 %v821_v11 }
   0x2   :  { %v857_v3 = vcombine.high %v845_v0, %v845_v0  ;;  %v861_v4 = vcombine.high %v850_v1, %v850_v1  ;;  %56 = vst [vmem:[#allocation3] sm:$0xf] %v784_v2  ;;  %v785_v5 = vld [vmem:[%s1176_s1 + $0x24] sm:$0xf]  ;;  %v105_v7 = vrot.slane %v845_v0, 4  ;;  %s815_s1 = smov 87  }
   0x3   :  { %58 = vst [vmem:[#allocation3 + $0x4] sm:$0xf] %v785_v5  ;;  %v103_v9 = vrot.slane %v850_v1, 4  ;;  %s818_s24 = smov 126   ;;  %s819_s25 = smov 108   ;;  %v933_v10 = vld [vmem:[%s1175_s0 + $0x14] sm:$0xff] }
   0x4   :  { %247 = vrot.lane.b32.xlu1 %v857_v3, %s813_s20  ;;  %243 = vrot.lane.b32.xlu0 %v861_v4, %s813_s20  ;;  %s820_s26 = smov 127   ;;  %v941_v12 = vcombine.high %v933_v10, %v933_v10  ;;  %v946_v13 = vld [vmem:[%s1175_s0 + $0x1c] sm:$0xff]  ;;  %v984_v18 = vrot.slane %v933_v10, 4  ;;  %vm232_vm3 = vcmask 711680   ;;  %vm175_vm4 = vcmask 875520  }
   0x5   :  { %v950_v14 = vcombine.high %v946_v13, %v946_v13  ;;  %v967_v16 = vrot.slane %v946_v13, 4  ;;  %vm194_vm5 = vcmask 867328   ;;  %vm137_vm6 = vcmask 1031168  }
   0x6   :  { %vm156_vm7 = vcmask 883712   ;;  %vm118_vm8 = vcmask 1039360   ;;  %vm273_vm9 = vcmask 293888  }
   0x8   :  { %207 = vrot.lane.b32.xlu1 %v845_v0, %s814_s21  ;;  %245 = vrot.lane.b32.xlu0 %v845_v0, %s813_s20 }
   0x9   :  { %v95_v6 = vld [vmem:[#allocation3] sm:$0xf] }
   0xa   :  { %v107_v8 = vrot.slane %v95_v6, 4  ;;  %v441_v15 = vld [vmem:[#allocation3 + $0x4] sm:$0xf] }
   0xb   :  { %v973_v17 = vrot.slane %v441_v15, 4 }
   0xc   :  { %249 = vrot.lane.b32.xlu1 %v95_v6, %s813_s20  ;;  %205 = vrot.lane.b32.xlu0 %v861_v4, %s814_s21 }
  0x10   :  { %211 = vrot.lane.b32.xlu1 %v95_v6, %s814_s21  ;;  %209 = vrot.lane.b32.xlu0 %v857_v3, %s814_s21 }
  0x14   :  { %226 = vrot.lane.b32.xlu1 %v105_v7, %s815_s1  ;;  %224 = vrot.lane.b32.xlu0 %v861_v4, %s815_s1 }
  0x18   :  { %230 = vrot.lane.b32.xlu1 %v107_v8, %s815_s1  ;;  %228 = vrot.lane.b32.xlu0 %v857_v3, %s815_s1 }
  0x1c   :  { %203 = vrot.lane.b32.xlu1 %v850_v1, %s814_s21  ;;  %241 = vrot.lane.b32.xlu0 %v850_v1, %s813_s20 }
  0x20   :  { %167 = vrot.lane.b32.xlu1 %v861_v4, %s816_s22  ;;  %222 = vrot.lane.b32.xlu0 %v103_v9, %s815_s1 }
  0x24   :  { %171 = vrot.lane.b32.xlu1 %v857_v3, %s816_s22  ;;  %169 = vrot.lane.b32.xlu0 %v845_v0, %s816_s22 }
  0x28   :  { %186 = vrot.lane.b32.xlu1 %v861_v4, %s817_s23  ;;  %173 = vrot.lane.b32.xlu0 %v95_v6, %s816_s22 }
  0x2c   :  { %190 = vrot.lane.b32.xlu1 %v857_v3, %s817_s23  ;;  %188 = vrot.lane.b32.xlu0 %v105_v7, %s817_s23 }
  0x30   :  { %165 = vrot.lane.b32.xlu1 %v850_v1, %s816_s22  ;;  %192 = vrot.lane.b32.xlu0 %v107_v8, %s817_s23 }
  0x34   :  { %129 = vrot.lane.b32.xlu1 %v861_v4, %s818_s24  ;;  %184 = vrot.lane.b32.xlu0 %v103_v9, %s817_s23 }
  0x38   :  { %133 = vrot.lane.b32.xlu1 %v857_v3, %s818_s24  ;;  %131 = vrot.lane.b32.xlu0 %v845_v0, %s818_s24 }
  0x3c   :  { %148 = vrot.lane.b32.xlu1 %v861_v4, %s819_s25  ;;  %135 = vrot.lane.b32.xlu0 %v95_v6, %s818_s24 }
  0x40   :  { %152 = vrot.lane.b32.xlu1 %v857_v3, %s819_s25  ;;  %150 = vrot.lane.b32.xlu0 %v105_v7, %s819_s25 }
  0x44   :  { %127 = vrot.lane.b32.xlu1 %v850_v1, %s818_s24  ;;  %154 = vrot.lane.b32.xlu0 %v107_v8, %s819_s25 }
  0x48   :  { %110 = vrot.lane.b32.xlu1 %v861_v4, %s820_s26  ;;  %146 = vrot.lane.b32.xlu0 %v103_v9, %s819_s25 }
  0x4c   :  { %114 = vrot.lane.b32.xlu1 %v857_v3, %s820_s26  ;;  %112 = vrot.lane.b32.xlu0 %v105_v7, %s820_s26 }
  0x50   :  { %108 = vrot.lane.b32.xlu1 %v103_v9, %s820_s26  ;;  %116 = vrot.lane.b32.xlu0 %v107_v8, %s820_s26 }
  0x54   :  { %584 = vrot.lane.b32.xlu1 %v946_v13, %s813_s20  ;;  %582 = vrot.lane.b32.xlu0 %v941_v12, %s813_s20 }
  0x58   :  { %588 = vrot.lane.b32.xlu1 %v441_v15, %s813_s20  ;;  %586 = vrot.lane.b32.xlu0 %v950_v14, %s813_s20 }
  0x5c   :  { %548 = vrot.lane.b32.xlu1 %v946_v13, %s814_s21  ;;  %546 = vrot.lane.b32.xlu0 %v941_v12, %s814_s21 }
  0x60   :  { %552 = vrot.lane.b32.xlu1 %v441_v15, %s814_s21  ;;  %550 = vrot.lane.b32.xlu0 %v950_v14, %s814_s21 }
  0x64   :  { %566 = vrot.lane.b32.xlu1 %v967_v16, %s815_s1  ;;  %564 = vrot.lane.b32.xlu0 %v941_v12, %s815_s1 }
  0x68   :  { %570 = vrot.lane.b32.xlu1 %v973_v17, %s815_s1  ;;  %568 = vrot.lane.b32.xlu0 %v950_v14, %s815_s1 }
  0x6c   :  { %544 = vrot.lane.b32.xlu1 %v933_v10, %s814_s21  ;;  %580 = vrot.lane.b32.xlu0 %v933_v10, %s813_s20 }
  0x70   :  { %510 = vrot.lane.b32.xlu1 %v941_v12, %s816_s22  ;;  %562 = vrot.lane.b32.xlu0 %v984_v18, %s815_s1 }
  0x74   :  { %514 = vrot.lane.b32.xlu1 %v950_v14, %s816_s22  ;;  %512 = vrot.lane.b32.xlu0 %v946_v13, %s816_s22 }
  0x76   :  { %v248_v19 = vpop.permute.xlu1 %247  ;;  %v244_v20 = vpop.permute.xlu0 %243 }
  0x78   :  { %528 = vrot.lane.b32.xlu1 %v941_v12, %s817_s23  ;;  %516 = vrot.lane.b32.xlu0 %v441_v15, %s816_s22 }
  0x7a   :  { %v208_v21 = vpop.permute.xlu1 %207  ;;  %v246_v22 = vpop.permute.xlu0 %245 }
  0x7b   :  { %v253_v23 = vsel %vm251_vm0, %v244_v20, %v246_v22  ;;  %v254_v27 = vsel %vm251_vm0, %v246_v22, %v248_v19 }
  0x7c   :  { %532 = vrot.lane.b32.xlu1 %v950_v14, %s817_s23  ;;  %530 = vrot.lane.b32.xlu0 %v967_v16, %s817_s23 }
  0x7d   :  { %786 = vmatprep.subr.msk.mxu0 %vm256_vm1, %v253_v23 }
  0x7e   :  { %v250_v24 = vpop.permute.xlu1 %249  ;;  %v206_v25 = vpop.permute.xlu0 %205 }
  0x7f   :  { %v255_v26 = vsel %vm251_vm0, %v248_v19, %v250_v24  ;;  %v215_v43 = vsel %vm213_vm2, %v206_v25, %v208_v21 }
  0x80   :  { %789 = vmatprep.subr.msk.mxu1 %vm256_vm1, %v255_v26  ;;  %508 = vrot.lane.b32.xlu1 %v933_v10, %s816_s22 }
  0x81   :  { %534 = vrot.lane.b32.xlu0 %v973_v17, %s817_s23  ;;  %790 = vmatpush1.msk.msra.mxu1 %vm256_vm1, %v254_v27 }
  0x82   :  { %v212_v28 = vpop.permute.xlu1 %211  ;;  %v210_v29 = vpop.permute.xlu0 %209 }
  0x83   :  { %v216_v34 = vsel %vm213_vm2, %v208_v21, %v210_v29  ;;  %v217_v35 = vsel %vm213_vm2, %v210_v29, %v212_v28 }
  0x84   :  { %474 = vrot.lane.b32.xlu1 %v941_v12, %s818_s24 }
  0x85   :  { %526 = vrot.lane.b32.xlu0 %v984_v18, %s817_s23 }
  0x86   :  { %v227_v30 = vpop.permute.xlu1 %226  ;;  %v225_v31 = vpop.permute.xlu0 %224 }
  0x87   :  { %v234_v40 = vsel %vm232_vm3, %v225_v31, %v227_v30 }
  0x88   :  { %478 = vrot.lane.b32.xlu1 %v950_v14, %s818_s24  ;;  %v270_v45 = vsel %vm256_vm1, %v215_v43, %v234_v40 }
  0x89   :  { %476 = vrot.lane.b32.xlu0 %v946_v13, %s818_s24 }
  0x8a   :  { %v231_v32 = vpop.permute.xlu1 %230  ;;  %v229_v33 = vpop.permute.xlu0 %228 }
  0x8b   :  { %v235_v36 = vsel %vm232_vm3, %v227_v30, %v229_v33  ;;  %v236_v37 = vsel %vm232_vm3, %v229_v33, %v231_v32 }
  0x8c   :  { %492 = vrot.lane.b32.xlu1 %v941_v12, %s819_s25  ;;  %v272_v38 = vsel %vm256_vm1, %v217_v35, %v236_v37  ;;  %v271_v39 = vsel %vm256_vm1, %v216_v34, %v235_v36 }
  0x8d   :  { %480 = vrot.lane.b32.xlu0 %v441_v15, %s818_s24  ;;  %380 = vmatprep.subr.mxu1 %v272_v38 }
  0x8e   :  { %v204_v41 = vpop.permute.xlu1 %203  ;;  %381 = vmatpush1.msra.mxu1 %v271_v39  ;;  %v242_v42 = vpop.permute.xlu0 %241 }
  0x8f   :  { %v252_v44 = vsel %vm251_vm0, %v242_v42, %v244_v20  ;;  %v214_v48 = vsel %vm213_vm2, %v204_v41, %v206_v25 }
  0x90   :  { %496 = vrot.lane.b32.xlu1 %v950_v14, %s819_s25  ;;  %787 = vmatpush1.msk.msra.mxu0 %vm256_vm1, %v252_v44 }
  0x91   :  { %494 = vrot.lane.b32.xlu0 %v967_v16, %s819_s25  ;;  %309 = vmatprep.subr.mxu0 %v270_v45 }
  0x92   :  { %v168_v46 = vpop.permute.xlu1 %167  ;;  %v223_v47 = vpop.permute.xlu0 %222 }
  0x93   :  { %v233_v49 = vsel %vm232_vm3, %v223_v47, %v225_v31 }
  0x94   :  { %472 = vrot.lane.b32.xlu1 %v933_v10, %s818_s24  ;;  %v269_v50 = vsel %vm256_vm1, %v214_v48, %v233_v49 }
  0x95   :  { %498 = vrot.lane.b32.xlu0 %v973_v17, %s819_s25  ;;  %310 = vmatpush1.msra.mxu0 %v269_v50 }
  0x96   :  { %v172_v51 = vpop.permute.xlu1 %171  ;;  %v170_v52 = vpop.permute.xlu0 %169 }
  0x97   :  { %v177_v57 = vsel %vm175_vm4, %v168_v46, %v170_v52  ;;  %v178_v5 = vsel %vm175_vm4, %v170_v52, %v172_v51 }
  0x98   :  { %456 = vrot.lane.b32.xlu1 %v941_v12, %s820_s26 }
  0x99   :  { %490 = vrot.lane.b32.xlu0 %v984_v18, %s819_s25 }
  0x9a   :  { %v187_v53 = vpop.permute.xlu1 %186  ;;  %v174_v54 = vpop.permute.xlu0 %173 }
  0x9b   :  { %v179_v63 = vsel %vm175_vm4, %v172_v51, %v174_v54  ;;  %v1093_v51 = vld [vmem:[%s1177_s2] sm:$0xf] }
  0x9c   :  { %460 = vrot.lane.b32.xlu1 %v950_v14, %s820_s26 }
  0x9d   :  { %458 = vrot.lane.b32.xlu0 %v967_v16, %s820_s26 }
  0x9e   :  { %v191_v55 = vpop.permute.xlu1 %190  ;;  %v189_v56 = vpop.permute.xlu0 %188 }
  0x9f   :  { %v196_v58 = vsel %vm194_vm5, %v187_v53, %v189_v56  ;;  %v197_v60 = vsel %vm194_vm5, %v189_v56, %v191_v55 }
  0xa0   :  { %454 = vrot.lane.b32.xlu1 %v984_v18, %s820_s26  ;;  %v266_v59 = vsel %vm256_vm1, %v177_v57, %v196_v58  ;;  %v267_v7 = vsel %vm256_vm1, %v178_v5, %v197_v60 }
  0xa1   :  { %462 = vrot.lane.b32.xlu0 %v973_v17, %s820_s26  ;;  %311 = vmatprep.subr.mxu0 %v266_v59 }
  0xa2   :  { %v166_v61 = vpop.permute.xlu1 %165  ;;  %v193_v62 = vpop.permute.xlu0 %192 }
  0xa3   :  { %v198_v2 = vsel %vm194_vm5, %v191_v55, %v193_v62  ;;  %v176_v15 = vsel %vm175_vm4, %v166_v61, %v168_v46 }
  0xa4   :  { %v268_v6 = vsel %vm256_vm1, %v179_v63, %v198_v2 }
  0xa5   :  { %382 = vmatprep.subr.mxu1 %v268_v6 }
  0xa6   :  { %v130_v8 = vpop.permute.xlu1 %129  ;;  %383 = vmatpush1.msra.mxu1 %v267_v7  ;;  %v185_v9 = vpop.permute.xlu0 %184 }
  0xa7   :  { %v195_v16 = vsel %vm194_vm5, %v185_v9, %v187_v53 }
  0xa8   :  { %v265_v17 = vsel %vm256_vm1, %v176_v15, %v195_v16 }
  0xa9   :  { %312 = vmatpush1.msra.mxu0 %v265_v17 }
  0xaa   :  { %v134_v18 = vpop.permute.xlu1 %133  ;;  %v132_v19 = vpop.permute.xlu0 %131 }
  0xab   :  { %v139_v24 = vsel %vm137_vm6, %v130_v8, %v132_v19  ;;  %v140_v32 = vsel %vm137_vm6, %v132_v19, %v134_v18 }
  0xae   :  { %v149_v20 = vpop.permute.xlu1 %148  ;;  %v136_v21 = vpop.permute.xlu0 %135 }
  0xaf   :  { %v141_v30 = vsel %vm137_vm6, %v134_v18, %v136_v21 }
  0xb2   :  { %v153_v22 = vpop.permute.xlu1 %152  ;;  %v151_v23 = vpop.permute.xlu0 %150 }
  0xb3   :  { %v158_v25 = vsel %vm156_vm7, %v149_v20, %v151_v23  ;;  %v159_v27 = vsel %vm156_vm7, %v151_v23, %v153_v22 }
  0xb4   :  { %v262_v26 = vsel %vm256_vm1, %v139_v24, %v158_v25  ;;  %v263_v34 = vsel %vm256_vm1, %v140_v32, %v159_v27 }
  0xb5   :  { %313 = vmatprep.subr.mxu0 %v262_v26 }
  0xb6   :  { %v128_v28 = vpop.permute.xlu1 %127  ;;  %v155_v29 = vpop.permute.xlu0 %154 }
  0xb7   :  { %v160_v31 = vsel %vm156_vm7, %v153_v22, %v155_v29  ;;  %v138_v37 = vsel %vm137_vm6, %v128_v28, %v130_v8 }
  0xb8   :  { %v264_v33 = vsel %vm256_vm1, %v141_v30, %v160_v31 }
  0xb9   :  { %384 = vmatprep.subr.mxu1 %v264_v33 }
  0xba   :  { %v111_v35 = vpop.permute.xlu1 %110  ;;  %385 = vmatpush1.msra.mxu1 %v263_v34  ;;  %v147_v36 = vpop.permute.xlu0 %146 }
  0xbb   :  { %v157_v38 = vsel %vm156_vm7, %v147_v36, %v149_v20 }
  0xbc   :  { %v261_v39 = vsel %vm256_vm1, %v138_v37, %v157_v38 }
  0xbd   :  { %314 = vmatpush1.msra.mxu0 %v261_v39 }
  0xbe   :  { %v115_v40 = vpop.permute.xlu1 %114  ;;  %v113_v41 = vpop.permute.xlu0 %112 }
  0xbf   :  { %v120_v42 = vsel %vm118_vm8, %v111_v35, %v113_v41  ;;  %v121_v44 = vsel %vm118_vm8, %v113_v41, %v115_v40 }
  0xc0   :  { %v258_v43 = vsel %vm256_vm1, %v861_v4, %v120_v42  ;;  %v259_v4 = vsel %vm256_vm1, %v845_v0, %v121_v44 }
  0xc1   :  { %315 = vmatprep.subr.mxu0 %v258_v43 }
  0xc2   :  { %v109_v45 = vpop.permute.xlu1 %108  ;;  %v117_v46 = vpop.permute.xlu0 %116 }
  0xc3   :  { %v119_v47 = vsel %vm118_vm8, %v109_v45, %v111_v35  ;;  %v122_v48 = vsel %vm118_vm8, %v115_v40, %v117_v46 }
  0xc4   :  { %v257_v49 = vsel %vm256_vm1, %v850_v1, %v119_v47  ;;  %v260_v50 = vsel %vm256_vm1, %v857_v3, %v122_v48 }
  0xc5   :  { %316 = vmatpush1.msra.mxu0 %v257_v49  ;;  %386 = vmatprep.subr.mxu1 %v260_v50 }
  0xc6   :  { %v585_v52 = vpop.permute.xlu1 %584  ;;  %387 = vmatpush1.msra.mxu1 %v259_v4  ;;  %v583_v53 = vpop.permute.xlu0 %582  ;;  %788 = vmatmul.mubr.msk.f32.vlgmr.msra.gmra.mxu0 %vm273_vm9, %v1093_v51 }
  0xc7   :  { %v591_v1 = vsel %vm251_vm0, %v583_v53, %v585_v52  ;;  %791 = vmatmul.mubr.msk.f32.vlgmr.msra.gmra.mxu1 %vm273_vm9, %v1093_v51  ;;  %682 = vmatprep.mubr.f32.mxu0 %v821_v11 }
  0xc8   :  { %792 = vmatprep.subr.msk.mxu0 %vm256_vm1, %v591_v1  ;;  %753 = vmatprep.mubr.f32.mxu1 %v821_v11 }
  0xca   :  { %v589_v3 = vpop.permute.xlu1 %588  ;;  %v587_v54 = vpop.permute.xlu0 %586 }
  0xcb   :  { %v592_v0 = vsel %vm251_vm0, %v585_v52, %v587_v54  ;;  %v593_v55 = vsel %vm251_vm0, %v587_v54, %v589_v3 }
  0xcc   :  { %795 = vmatprep.subr.msk.mxu1 %vm256_vm1, %v593_v55 }
  0xcd   :  { %796 = vmatpush1.msk.msra.mxu1 %vm256_vm1, %v592_v0 }
  0xce   :  { %v549_v56 = vpop.permute.xlu1 %548  ;;  %v547_v57 = vpop.permute.xlu0 %546 }
  0xcf   :  { %v555_v17 = vsel %vm213_vm2, %v547_v57, %v549_v56 }
  0xd2   :  { %v553_v58 = vpop.permute.xlu1 %552  ;;  %v551_v59 = vpop.permute.xlu0 %550 }
  0xd3   :  { %v556_v11 = vsel %vm213_vm2, %v549_v56, %v551_v59  ;;  %v557_v2 = vsel %vm213_vm2, %v551_v59, %v553_v58 }
  0xd6   :  { %v567_v60 = vpop.permute.xlu1 %566  ;;  %v565_v61 = vpop.permute.xlu0 %564 }
  0xd7   :  { %v573_v9 = vsel %vm232_vm3, %v565_v61, %v567_v60 }
  0xd8   :  { %v607_v19 = vsel %vm256_vm1, %v555_v17, %v573_v9 }
  0xda   :  { %v571_v62 = vpop.permute.xlu1 %570  ;;  %v569_v63 = vpop.permute.xlu0 %568 }
  0xdb   :  { %v574_v5 = vsel %vm232_vm3, %v567_v60, %v569_v63  ;;  %v575_v6 = vsel %vm232_vm3, %v569_v63, %v571_v62 }
  0xdc   :  { %v609_v7 = vsel %vm256_vm1, %v557_v2, %v575_v6  ;;  %v608_v8 = vsel %vm256_vm1, %v556_v11, %v574_v5 }
  0xdd   :  { %713 = vmatprep.subr.mxu1 %v609_v7 }
  0xde   :  { %v545_v15 = vpop.permute.xlu1 %544  ;;  %714 = vmatpush1.msra.mxu1 %v608_v8  ;;  %v581_v16 = vpop.permute.xlu0 %580 }
  0xdf   :  { %v590_v18 = vsel %vm251_vm0, %v581_v16, %v583_v53  ;;  %v554_v22 = vsel %vm213_vm2, %v545_v15, %v547_v57 }
  0xe0   :  { %793 = vmatpush1.msk.msra.mxu0 %vm256_vm1, %v590_v18 }
  0xe1   :  { %642 = vmatprep.subr.mxu0 %v607_v19 }
  0xe2   :  { %v511_v20 = vpop.permute.xlu1 %510  ;;  %v563_v21 = vpop.permute.xlu0 %562 }
  0xe3   :  { %v572_v23 = vsel %vm232_vm3, %v563_v21, %v565_v61 }
  0xe4   :  { %v606_v24 = vsel %vm256_vm1, %v554_v22, %v572_v23 }
  0xe5   :  { %643 = vmatpush1.msra.mxu0 %v606_v24 }
  0xe6   :  { %v515_v25 = vpop.permute.xlu1 %514  ;;  %v513_v26 = vpop.permute.xlu0 %512 }
  0xe7   :  { %v519_v31 = vsel %vm175_vm4, %v511_v20, %v513_v26  ;;  %v520_v39 = vsel %vm175_vm4, %v513_v26, %v515_v25 }
  0xea   :  { %v529_v27 = vpop.permute.xlu1 %528  ;;  %v517_v28 = vpop.permute.xlu0 %516 }
  0xeb   :  { %v521_v37 = vsel %vm175_vm4, %v515_v25, %v517_v28 }
  0xee   :  { %v533_v29 = vpop.permute.xlu1 %532  ;;  %v531_v30 = vpop.permute.xlu0 %530 }
  0xef   :  { %v537_v32 = vsel %vm194_vm5, %v529_v27, %v531_v30  ;;  %v538_v35 = vsel %vm194_vm5, %v531_v30, %v533_v29 }
  0xf0   :  { %v603_v33 = vsel %vm256_vm1, %v519_v31, %v537_v32  ;;  %v604_v42 = vsel %vm256_vm1, %v520_v39, %v538_v35 }
  0xf1   :  { %644 = vmatprep.subr.mxu0 %v603_v33 }
  0xf2   :  { %v509_v34 = vpop.permute.xlu1 %508 }
  0xf3   :  { %v535_v36 = vpop.permute.xlu0 %534  ;;  %v518_v44 = vsel %vm175_vm4, %v509_v34, %v511_v20 }
  0xf4   :  { %v539_v38 = vsel %vm194_vm5, %v533_v29, %v535_v36 }
  0xf5   :  { %v605_v40 = vsel %vm256_vm1, %v521_v37, %v539_v38 }
  0xf6   :  { %715 = vmatprep.subr.mxu1 %v605_v40  ;;  %v475_v41 = vpop.permute.xlu1 %474 }
  0xf7   :  { %716 = vmatpush1.msra.mxu1 %v604_v42  ;;  %v527_v43 = vpop.permute.xlu0 %526 }
  0xf8   :  { %v536_v45 = vsel %vm194_vm5, %v527_v43, %v529_v27 }
  0xf9   :  { %v602_v46 = vsel %vm256_vm1, %v518_v44, %v536_v45 }
  0xfa   :  { %645 = vmatpush1.msra.mxu0 %v602_v46  ;;  %v479_v47 = vpop.permute.xlu1 %478 }
  0xfb   :  { %v477_v48 = vpop.permute.xlu0 %476 }
  0xfc   :  { %v483_v53 = vsel %vm137_vm6, %v475_v41, %v477_v48  ;;  %v484_v58 = vsel %vm137_vm6, %v477_v48, %v479_v47 }
  0xfe   :  { %v493_v49 = vpop.permute.xlu1 %492 }
  0xff   :  { %v481_v50 = vpop.permute.xlu0 %480 }
 0x100   :  { %v485_v56 = vsel %vm137_vm6, %v479_v47, %v481_v50 }
 0x102   :  { %v497_v4 = vpop.permute.xlu1 %496 }
 0x103   :  { %v495_v52 = vpop.permute.xlu0 %494 }
 0x104   :  { %v501_v1 = vsel %vm156_vm7, %v493_v49, %v495_v52  ;;  %v502_v0 = vsel %vm156_vm7, %v495_v52, %v497_v4 }
 0x105   :  { %v599_v3 = vsel %vm256_vm1, %v483_v53, %v501_v1  ;;  %v600_v61 = vsel %vm256_vm1, %v484_v58, %v502_v0 }
 0x106   :  { %646 = vmatprep.subr.mxu0 %v599_v3  ;;  %v473_v54 = vpop.permute.xlu1 %472 }
 0x107   :  { %v499_v55 = vpop.permute.xlu0 %498  ;;  %v482_v63 = vsel %vm137_vm6, %v473_v54, %v475_v41 }
 0x108   :  { %v503_v57 = vsel %vm156_vm7, %v497_v4, %v499_v55 }
 0x109   :  { %v601_v59 = vsel %vm256_vm1, %v485_v56, %v503_v57 }
 0x10a   :  { %717 = vmatprep.subr.mxu1 %v601_v59  ;;  %v457_v60 = vpop.permute.xlu1 %456 }
 0x10b   :  { %718 = vmatpush1.msra.mxu1 %v600_v61  ;;  %v491_v62 = vpop.permute.xlu0 %490 }
 0x10c   :  { %v500_v11 = vsel %vm156_vm7, %v491_v62, %v493_v49 }
 0x10d   :  { %v598_v2 = vsel %vm256_vm1, %v482_v63, %v500_v11 }
 0x10e   :  { %647 = vmatpush1.msra.mxu0 %v598_v2  ;;  %v461_v5 = vpop.permute.xlu1 %460 }
 0x10f   :  { %v459_v6 = vpop.permute.xlu0 %458 }
 0x110   :  { %v465_v7 = vsel %vm118_vm8, %v457_v60, %v459_v6  ;;  %v466_v15 = vsel %vm118_vm8, %v459_v6, %v461_v5 }
 0x111   :  { %v595_v8 = vsel %vm256_vm1, %v941_v12, %v465_v7  ;;  %v596_v12 = vsel %vm256_vm1, %v946_v13, %v466_v15 }
 0x112   :  { %648 = vmatprep.subr.mxu0 %v595_v8  ;;  %v455_v9 = vpop.permute.xlu1 %454 }
 0x113   :  { %v464_v16 = vsel %vm118_vm8, %v455_v9, %v457_v60  ;;  %v463_v17 = vpop.permute.xlu0 %462 }
 0x114   :  { %v467_v18 = vsel %vm118_vm8, %v461_v5, %v463_v17  ;;  %v594_v19 = vsel %vm256_vm1, %v933_v10, %v464_v16 }
 0x115   :  { %649 = vmatpush1.msra.mxu0 %v594_v19  ;;  %v597_v20 = vsel %vm256_vm1, %v950_v14, %v467_v18 }
 0x116   :  { %719 = vmatprep.subr.mxu1 %v597_v20  ;;  %794 = vmatmul.mubr.msk.f32.vlgmr.msra.gmra.mxu0 %vm273_vm9, %v1093_v51 }
 0x117   :  { %720 = vmatpush1.msra.mxu1 %v596_v12 }
 0x118   :  { %797 = vmatmul.mubr.msk.f32.vlgmr.msra.gmra.mxu1 %vm273_vm9, %v1093_v51 }
 0x186   :  { %v351_v21 = vpop.f32.mrf.mxu0 }
 0x187   :  { %v422_v22 = vpop.f32.mrf.mxu1 }
 0x188   :  { %v353_v23 = vpop.f32.mrf.mxu0 }
 0x189   :  { %v431_v24 = vcombine.low %v351_v21, %v353_v23  ;;  %v424_v10 = vpop.f32.mrf.mxu1 }
 0x18a   :  { %v432_v25 = vcombine.low %v422_v22, %v424_v10 }
 0x18b   :  { %435 = vst [vmem:[%s1178_s3] sm:$0xff] %v431_v24 }
 0x18c   :  { %436 = vst [vmem:[%s1178_s3 + $0x8] sm:$0xff] %v432_v25 }
 0x1d6   :  { %v684_v14 = vpop.f32.mrf.mxu0 }
 0x1d8   :  { %v755_v13 = vpop.f32.mrf.mxu1  ;;  %v686_v26 = vpop.f32.mrf.mxu0 }
 0x1d9   :  { %v764_v27 = vcombine.low %v684_v14, %v686_v26 }
 0x1da   :  { %v757_v28 = vpop.f32.mrf.mxu1 }
 0x1db   :  { %798 = vst [vmem:[%s1178_s3 + $0x10] sm:$0xff] %v764_v27  ;;  %v765_v51 = vcombine.low %v755_v13, %v757_v28 }
 0x1dd   :  { %799 = vst [vmem:[%s1178_s3 + $0x18] sm:$0xff] %v765_v51 }

// kernel: scale_conv_forward.10
= control target key start
LH: loop header
LB: loop body
LE: loop exit
PB: predicated region body
PF: predicated region fallthrough
CT: control target
= control target key end

     0   :  { %s1099_s18 = smov 78   ;;  %s1100_s19 = smov 76   ;;  %v1107_v14 = vmov 0.0   ;;  %vm298_vm0 = vcmask 621568   ;;  %vm304_vm1 = vcmask 1043456   ;;  %vm275_vm2 = vcmask 629760   ;;  %s1620_s0 = inlined_call_operand.vmem [shape: f32[2,4,768], index: 0, kind: input, shape index: {}, may-alias: {0,1}]   ;;  %s1621_s1 = inlined_call_operand.vmem [shape: f32[2,4,768], index: 1, kind: input, shape index: {}, may-alias: {0,1}]   ;;  %s1622_s2 = inlined_call_operand.vmem [shape: f32[4,36], index: 2, kind: input, shape index: {}]   ;;  %s1623_s3 = inlined_call_operand.vmem [shape: f32[2,4,640], index: 3, kind: output, shape index: {}]  }
   0x1   :  { %v1132_v0 = vld [vmem:[%s1620_s0 + $0x8] sm:$0xff]  ;;  %v1137_v1 = vld [vmem:[%s1620_s0] sm:$0xff]  ;;  %v1024_v2 = vld [vmem:[%s1620_s0 + $0x10] sm:$0xf]  ;;  %s1101_s26 = smov 77   ;;  %s1102_s29 = smov 102   ;;  %403 = vmatprep.mubr.f32.mxu0 %v1107_v14  ;;  %474 = vmatprep.mubr.f32.mxu1 %v1107_v14 }
   0x2   :  { %244 = vrot.lane.b32.xlu1 %v1132_v0, %s1099_s18  ;;  %290 = vrot.lane.b32.xlu0 %v1132_v0, %s1100_s19  ;;  %v1148_v3 = vcombine.high %v1137_v1, %v1137_v1  ;;  %43 = vst [vmem:[#allocation2 + $0x10] sm:$0xf] %v1024_v2  ;;  %v1026_v4 = vld [vmem:[%s1621_s1 + $0x14] sm:$0xf]  ;;  %v1156_v5 = vld [vmem:[%s1620_s0 + $0x18] sm:$0xff]  ;;  %v121_v7 = vrot.slane %v1132_v0, 4  ;;  %v1184_v10 = vcombine.high %v1132_v0, %v1132_v0 }
   0x3   :  { %70 = vst [vmem:[#allocation3] sm:$0xf] %v1026_v4  ;;  %v1161_v6 = vld [vmem:[%s1620_s0 + $0x20] sm:$0xff]  ;;  %v1025_v8 = vld [vmem:[%s1620_s0 + $0x28] sm:$0xf]  ;;  %v119_v9 = vrot.slane %v1137_v1, 4  ;;  %v1248_v16 = vcombine.high %v1156_v5, %v1156_v5 }
   0x4   :  { %45 = vst [vmem:[#allocation2 + $0x24] sm:$0xf] %v1025_v8  ;;  %s1103_s0 = smov 101   ;;  %v1027_v12 = vld [vmem:[%s1621_s1 + $0x2c] sm:$0xf]  ;;  %s1104_s5 = smov 126   ;;  %v1314_v40 = vcombine.high %v1161_v6, %v1161_v6 }
   0x5   :  { %72 = vst [vmem:[#allocation3 + $0x4] sm:$0xf] %v1027_v12  ;;  %s1105_s1 = smov 103   ;;  %s1106_s6 = smov 127   ;;  %v578_v18 = vrot.slane %v1161_v6, 4  ;;  %v1268_v19 = vrot.slane %v1156_v5, 4 }
   0x6   :  { %242 = vrot.lane.b32.xlu1 %v1148_v3, %s1099_s18  ;;  %288 = vrot.lane.b32.xlu0 %v1148_v3, %s1100_s19  ;;  %vm252_vm3 = vcmask 637952   ;;  %vm206_vm4 = vcmask 834560   ;;  %vm229_vm5 = vcmask 826368   ;;  %vm160_vm6 = vcmask 1031168  }
   0x7   :  { %vm183_vm7 = vcmask 842752   ;;  %vm137_vm8 = vcmask 1039360   ;;  %vm325_vm9 = vcmask 293888   ;;  %vm1108_vm10 = vmmov 0  }
   0x9   :  { %v1193_v11 = vld [vmem:[#allocation2 + $0x10] sm:$0xf] }
   0xa   :  { %267 = vrot.lane.b32.xlu1 %v121_v7, %s1101_s26  ;;  %265 = vrot.lane.b32.xlu0 %v1148_v3, %s1101_s26  ;;  %v123_v13 = vrot.slane %v1193_v11, 4  ;;  %v110_v15 = vld [vmem:[#allocation3] sm:$0xf] }
   0xb   :  { %v124_v17 = vrot.slane %v110_v15, 4  ;;  %v1330_v46 = vld [vmem:[#allocation2 + $0x24] sm:$0xf] }
   0xc   :  { %v1351_v56 = vrot.slane %v1330_v46, 4  ;;  %v567_v12 = vld [vmem:[#allocation3 + $0x4] sm:$0xf] }
   0xe   :  { %240 = vrot.lane.b32.xlu1 %v1137_v1, %s1099_s18  ;;  %286 = vrot.lane.b32.xlu0 %v1137_v1, %s1100_s19 }
  0x12   :  { %196 = vrot.lane.b32.xlu1 %v1148_v3, %s1102_s29  ;;  %263 = vrot.lane.b32.xlu0 %v119_v9, %s1101_s26 }
  0x16   :  { %219 = vrot.lane.b32.xlu1 %v1148_v3, %s1103_s0  ;;  %198 = vrot.lane.b32.xlu0 %v1132_v0, %s1102_s29 }
  0x1a   :  { %292 = vrot.lane.b32.xlu1 %v1184_v10, %s1100_s19  ;;  %221 = vrot.lane.b32.xlu0 %v121_v7, %s1103_s0 }
  0x1e   :  { %194 = vrot.lane.b32.xlu1 %v1137_v1, %s1102_s29  ;;  %294 = vrot.lane.b32.xlu0 %v1193_v11, %s1100_s19 }
  0x22   :  { %246 = vrot.lane.b32.xlu1 %v1184_v10, %s1099_s18  ;;  %217 = vrot.lane.b32.xlu0 %v119_v9, %s1103_s0 }
  0x26   :  { %269 = vrot.lane.b32.xlu1 %v1184_v10, %s1101_s26  ;;  %248 = vrot.lane.b32.xlu0 %v1193_v11, %s1099_s18 }
  0x2a   :  { %150 = vrot.lane.b32.xlu1 %v1148_v3, %s1104_s5  ;;  %271 = vrot.lane.b32.xlu0 %v123_v13, %s1101_s26 }
  0x2e   :  { %173 = vrot.lane.b32.xlu1 %v1148_v3, %s1105_s1  ;;  %152 = vrot.lane.b32.xlu0 %v1132_v0, %s1104_s5 }
  0x32   :  { %148 = vrot.lane.b32.xlu1 %v1137_v1, %s1104_s5  ;;  %175 = vrot.lane.b32.xlu0 %v121_v7, %s1105_s1 }
  0x36   :  { %200 = vrot.lane.b32.xlu1 %v1184_v10, %s1102_s29  ;;  %171 = vrot.lane.b32.xlu0 %v119_v9, %s1105_s1 }
  0x3a   :  { %223 = vrot.lane.b32.xlu1 %v1184_v10, %s1103_s0  ;;  %202 = vrot.lane.b32.xlu0 %v1193_v11, %s1102_s29 }
  0x3e   :  { %127 = vrot.lane.b32.xlu1 %v1148_v3, %s1106_s6  ;;  %225 = vrot.lane.b32.xlu0 %v123_v13, %s1103_s0 }
  0x42   :  { %125 = vrot.lane.b32.xlu1 %v119_v9, %s1106_s6  ;;  %129 = vrot.lane.b32.xlu0 %v121_v7, %s1106_s6 }
  0x46   :  { %156 = vrot.lane.b32.xlu1 %v1193_v11, %s1104_s5  ;;  %154 = vrot.lane.b32.xlu0 %v1184_v10, %s1104_s5 }
  0x4a   :  { %179 = vrot.lane.b32.xlu1 %v123_v13, %s1105_s1  ;;  %177 = vrot.lane.b32.xlu0 %v1184_v10, %s1105_s1 }
  0x4e   :  { %133 = vrot.lane.b32.xlu1 %v123_v13, %s1106_s6  ;;  %131 = vrot.lane.b32.xlu0 %v1184_v10, %s1106_s6 }
  0x52   :  { %250 = vrot.lane.b32.xlu1 %v110_v15, %s1099_s18  ;;  %296 = vrot.lane.b32.xlu0 %v110_v15, %s1100_s19 }
  0x56   :  { %738 = vrot.lane.b32.xlu1 %v1248_v16, %s1100_s19  ;;  %273 = vrot.lane.b32.xlu0 %v124_v17, %s1101_s26 }
  0x5a   :  { %204 = vrot.lane.b32.xlu1 %v110_v15, %s1102_s29  ;;  %740 = vrot.lane.b32.xlu0 %v1161_v6, %s1100_s19 }
  0x5e   :  { %694 = vrot.lane.b32.xlu1 %v1248_v16, %s1099_s18  ;;  %227 = vrot.lane.b32.xlu0 %v124_v17, %s1103_s0 }
  0x62   :  { %716 = vrot.lane.b32.xlu1 %v1248_v16, %s1101_s26  ;;  %696 = vrot.lane.b32.xlu0 %v1161_v6, %s1099_s18 }
  0x66   :  { %736 = vrot.lane.b32.xlu1 %v1156_v5, %s1100_s19  ;;  %718 = vrot.lane.b32.xlu0 %v578_v18, %s1101_s26 }
  0x6a   :  { %714 = vrot.lane.b32.xlu1 %v1268_v19, %s1101_s26  ;;  %692 = vrot.lane.b32.xlu0 %v1156_v5, %s1099_s18 }
  0x6e   :  { %181 = vrot.lane.b32.xlu1 %v124_v17, %s1105_s1  ;;  %158 = vrot.lane.b32.xlu0 %v110_v15, %s1104_s5 }
  0x72   :  { %652 = vrot.lane.b32.xlu1 %v1161_v6, %s1102_s29  ;;  %650 = vrot.lane.b32.xlu0 %v1248_v16, %s1102_s29 }
  0x74   :  { %v1280_v20 = vpop.permute.xlu1 %244  ;;  %v291_v21 = vpop.permute.xlu0 %290 }
  0x76   :  { %674 = vrot.lane.b32.xlu1 %v578_v18, %s1103_s0  ;;  %672 = vrot.lane.b32.xlu0 %v1248_v16, %s1103_s0 }
  0x78   :  { %v243_v22 = vpop.permute.xlu1 %242  ;;  %v289_v23 = vpop.permute.xlu0 %288 }
  0x79   :  { %v300_v24 = vsel %vm298_vm0, %v289_v23, %v291_v21  ;;  %v254_v31 = vsel %vm252_vm3, %v243_v22, %v1280_v20 }
  0x7a   :  { %670 = vrot.lane.b32.xlu1 %v1268_v19, %s1103_s0  ;;  %648 = vrot.lane.b32.xlu0 %v1156_v5, %s1102_s29 }
  0x7b   :  { %1028 = vmatprep.subr.msk.mxu0 %vm304_vm1, %v300_v24 }
  0x7c   :  { %v268_v25 = vpop.permute.xlu1 %267  ;;  %v266_v26 = vpop.permute.xlu0 %265 }
  0x7d   :  { %v277_v27 = vsel %vm275_vm2, %v266_v26, %v268_v25 }
  0x7e   :  { %606 = vrot.lane.b32.xlu1 %v1248_v16, %s1104_s5  ;;  %135 = vrot.lane.b32.xlu0 %v124_v17, %s1106_s6  ;;  %v321_v32 = vsel %vm304_vm1, %v254_v31, %v277_v27  ;;  %v581_v27 = vrot.slane %v567_v12, 4 }
  0x80   :  { %v241_v28 = vpop.permute.xlu1 %240  ;;  %v287_v29 = vpop.permute.xlu0 %286 }
  0x81   :  { %v299_v30 = vsel %vm298_vm0, %v287_v29, %v289_v23  ;;  %v253_v35 = vsel %vm252_vm3, %v241_v28, %v243_v22 }
  0x82   :  { %628 = vrot.lane.b32.xlu1 %v1248_v16, %s1105_s1  ;;  %608 = vrot.lane.b32.xlu0 %v1161_v6, %s1104_s5 }
  0x83   :  { %1029 = vmatpush1.msk.msra.mxu0 %vm304_vm1, %v299_v30 }
  0x84   :  { %363 = vmatprep.subr.mxu0 %v321_v32  ;;  %v197_v33 = vpop.permute.xlu1 %196  ;;  %v264_v34 = vpop.permute.xlu0 %263 }
  0x85   :  { %v276_v36 = vsel %vm275_vm2, %v264_v34, %v266_v26 }
  0x86   :  { %604 = vrot.lane.b32.xlu1 %v1156_v5, %s1104_s5  ;;  %630 = vrot.lane.b32.xlu0 %v578_v18, %s1105_s1  ;;  %v320_v37 = vsel %vm304_vm1, %v253_v35, %v276_v36 }
  0x87   :  { %364 = vmatpush1.msra.mxu0 %v320_v37 }
  0x88   :  { %v220_v38 = vpop.permute.xlu1 %219  ;;  %v1310_v39 = vpop.permute.xlu0 %198 }
  0x89   :  { %v208_v43 = vsel %vm206_vm4, %v197_v33, %v1310_v39 }
  0x8a   :  { %584 = vrot.lane.b32.xlu1 %v1248_v16, %s1106_s6  ;;  %626 = vrot.lane.b32.xlu0 %v1268_v19, %s1105_s1 }
  0x8c   :  { %v293_v41 = vpop.permute.xlu1 %292  ;;  %v1320_v42 = vpop.permute.xlu0 %221 }
  0x8d   :  { %v231_v44 = vsel %vm229_vm5, %v220_v38, %v1320_v42  ;;  %v301_v50 = vsel %vm298_vm0, %v291_v21, %v293_v41 }
  0x8e   :  { %742 = vrot.lane.b32.xlu1 %v1314_v40, %s1100_s19  ;;  %586 = vrot.lane.b32.xlu0 %v578_v18, %s1106_s6  ;;  %v316_v45 = vsel %vm304_vm1, %v208_v43, %v231_v44  ;;  %v1426_v43 = vld [vmem:[%s1622_s2] sm:$0xf] }
  0x8f   :  { %365 = vmatprep.subr.mxu0 %v316_v45 }
  0x90   :  { %v195_v47 = vpop.permute.xlu1 %194  ;;  %v1332_v48 = vpop.permute.xlu0 %294 }
  0x91   :  { %v302_v49 = vsel %vm298_vm0, %v293_v41, %v1332_v48  ;;  %v207_v53 = vsel %vm206_vm4, %v195_v47, %v197_v33 }
  0x92   :  { %582 = vrot.lane.b32.xlu1 %v1268_v19, %s1106_s6  ;;  %744 = vrot.lane.b32.xlu0 %v1330_v46, %s1100_s19 }
  0x93   :  { %1031 = vmatprep.subr.msk.mxu1 %vm304_vm1, %v302_v49 }
  0x94   :  { %1032 = vmatpush1.msk.msra.mxu1 %vm304_vm1, %v301_v50  ;;  %v247_v51 = vpop.permute.xlu1 %246  ;;  %v218_v52 = vpop.permute.xlu0 %217 }
  0x95   :  { %v230_v54 = vsel %vm229_vm5, %v218_v52, %v220_v38  ;;  %v255_v2 = vsel %vm252_vm3, %v1280_v20, %v247_v51 }
  0x96   :  { %700 = vrot.lane.b32.xlu1 %v1330_v46, %s1099_s18  ;;  %698 = vrot.lane.b32.xlu0 %v1314_v40, %s1099_s18  ;;  %v315_v55 = vsel %vm304_vm1, %v207_v53, %v230_v54 }
  0x97   :  { %366 = vmatpush1.msra.mxu0 %v315_v55 }
  0x98   :  { %v270_v57 = vpop.permute.xlu1 %269  ;;  %v1353_v58 = vpop.permute.xlu0 %248 }
  0x99   :  { %v278_v59 = vsel %vm275_vm2, %v268_v25, %v270_v57  ;;  %v256_v62 = vsel %vm252_vm3, %v247_v51, %v1353_v58 }
  0x9a   :  { %722 = vrot.lane.b32.xlu1 %v1351_v56, %s1101_s26  ;;  %720 = vrot.lane.b32.xlu0 %v1314_v40, %s1101_s26  ;;  %v322_v7 = vsel %vm304_vm1, %v255_v2, %v278_v59 }
  0x9c   :  { %v151_v60 = vpop.permute.xlu1 %150  ;;  %v1360_v61 = vpop.permute.xlu0 %271 }
  0x9d   :  { %v279_v63 = vsel %vm275_vm2, %v270_v57, %v1360_v61 }
  0x9e   :  { %656 = vrot.lane.b32.xlu1 %v1330_v46, %s1102_s29  ;;  %654 = vrot.lane.b32.xlu0 %v1314_v40, %s1102_s29  ;;  %v323_v4 = vsel %vm304_vm1, %v256_v62, %v279_v63 }
  0x9f   :  { %434 = vmatprep.subr.mxu1 %v323_v4 }
  0xa0   :  { %v174_v8 = vpop.permute.xlu1 %173  ;;  %435 = vmatpush1.msra.mxu1 %v322_v7  ;;  %v1374_v9 = vpop.permute.xlu0 %152 }
  0xa1   :  { %v162_v17 = vsel %vm160_vm6, %v151_v60, %v1374_v9 }
  0xa2   :  { %678 = vrot.lane.b32.xlu1 %v1351_v56, %s1103_s0  ;;  %676 = vrot.lane.b32.xlu0 %v1314_v40, %s1103_s0 }
  0xa4   :  { %v149_v13 = vpop.permute.xlu1 %148  ;;  %v176_v15 = vpop.permute.xlu0 %175 }
  0xa5   :  { %v185_v18 = vsel %vm183_vm7, %v174_v8, %v176_v15  ;;  %v161_v22 = vsel %vm160_vm6, %v149_v13, %v151_v60 }
  0xa6   :  { %610 = vrot.lane.b32.xlu1 %v1314_v40, %s1104_s5  ;;  %746 = vrot.lane.b32.xlu0 %v567_v12, %s1100_s19  ;;  %v311_v19 = vsel %vm304_vm1, %v162_v17, %v185_v18 }
  0xa7   :  { %367 = vmatprep.subr.mxu0 %v311_v19 }
  0xa8   :  { %v201_v20 = vpop.permute.xlu1 %200  ;;  %v172_v21 = vpop.permute.xlu0 %171 }
  0xa9   :  { %v184_v23 = vsel %vm183_vm7, %v172_v21, %v174_v8  ;;  %v209_v33 = vsel %vm206_vm4, %v1310_v39, %v201_v20 }
  0xaa   :  { %632 = vrot.lane.b32.xlu1 %v1314_v40, %s1105_s1  ;;  %612 = vrot.lane.b32.xlu0 %v1330_v46, %s1104_s5  ;;  %v310_v24 = vsel %vm304_vm1, %v161_v22, %v184_v23 }
  0xab   :  { %368 = vmatpush1.msra.mxu0 %v310_v24 }
  0xac   :  { %v224_v25 = vpop.permute.xlu1 %223  ;;  %v1394_v26 = vpop.permute.xlu0 %202 }
  0xad   :  { %v232_v28 = vsel %vm229_vm5, %v1320_v42, %v224_v25  ;;  %v210_v31 = vsel %vm206_vm4, %v201_v20, %v1394_v26 }
  0xae   :  { %702 = vrot.lane.b32.xlu1 %v567_v12, %s1099_s18  ;;  %634 = vrot.lane.b32.xlu0 %v1351_v56, %s1105_s1  ;;  %v317_v35 = vsel %vm304_vm1, %v209_v33, %v232_v28 }
  0xb0   :  { %v128_v29 = vpop.permute.xlu1 %127  ;;  %v1401_v30 = vpop.permute.xlu0 %225 }
  0xb1   :  { %v233_v32 = vsel %vm229_vm5, %v224_v25, %v1401_v30 }
  0xb2   :  { %588 = vrot.lane.b32.xlu1 %v1314_v40, %s1106_s6  ;;  %724 = vrot.lane.b32.xlu0 %v581_v27, %s1101_s26  ;;  %v318_v34 = vsel %vm304_vm1, %v210_v31, %v233_v32 }
  0xb3   :  { %436 = vmatprep.subr.mxu1 %v318_v34 }
  0xb4   :  { %v126_v36 = vpop.permute.xlu1 %125  ;;  %437 = vmatpush1.msra.mxu1 %v317_v35  ;;  %v130_v37 = vpop.permute.xlu0 %129 }
  0xb5   :  { %v138_v38 = vsel %vm137_vm8, %v126_v36, %v128_v29  ;;  %v139_v41 = vsel %vm137_vm8, %v128_v29, %v130_v37 }
  0xb6   :  { %658 = vrot.lane.b32.xlu1 %v567_v12, %s1102_s29  ;;  %590 = vrot.lane.b32.xlu0 %v1351_v56, %s1106_s6  ;;  %v306_v39 = vsel %vm304_vm1, %v1148_v3, %v139_v41  ;;  %v305_v42 = vsel %vm304_vm1, %v1137_v1, %v138_v38 }
  0xb7   :  { %369 = vmatprep.subr.mxu0 %v306_v39 }
  0xb8   :  { %v1428_v44 = vpop.permute.xlu1 %156  ;;  %370 = vmatpush1.msra.mxu0 %v305_v42  ;;  %v155_v45 = vpop.permute.xlu0 %154 }
  0xb9   :  { %1059 = vmatprep.subr.mxu0 %v1107_v14  ;;  %1030 = vmatmul.mubr.msk.f32.vlgmr.msra.gmra.mxu0 %vm325_vm9, %v1426_v43  ;;  %v163_v47 = vsel %vm160_vm6, %v1374_v9, %v155_v45  ;;  %v164_v49 = vsel %vm160_vm6, %v155_v45, %v1428_v44 }
  0xba   :  { %614 = vrot.lane.b32.xlu1 %v567_v12, %s1104_s5  ;;  %680 = vrot.lane.b32.xlu0 %v581_v27, %s1103_s0 }
  0xbb   :  { %1069 = vmatprep.mubr.msk.f32.mxu0 %vm1108_vm10, %v1107_v14 }
  0xbc   :  { %v1437_v1 = vpop.permute.xlu1 %179  ;;  %v178_v3 = vpop.permute.xlu0 %177 }
  0xbd   :  { %v186_v50 = vsel %vm183_vm7, %v176_v15, %v178_v3  ;;  %v187_v51 = vsel %vm183_vm7, %v178_v3, %v1437_v1 }
  0xbe   :  { %592 = vrot.lane.b32.xlu1 %v581_v27, %s1106_s6  ;;  %636 = vrot.lane.b32.xlu0 %v581_v27, %s1105_s1  ;;  %v313_v52 = vsel %vm304_vm1, %v164_v49, %v187_v51  ;;  %v312_v53 = vsel %vm304_vm1, %v163_v47, %v186_v50 }
  0xbf   :  { %438 = vmatprep.subr.mxu1 %v313_v52 }
  0xc0   :  { %v1450_v54 = vpop.permute.xlu1 %133  ;;  %439 = vmatpush1.msra.mxu1 %v312_v53  ;;  %v132_v55 = vpop.permute.xlu0 %131 }
  0xc1   :  { %v140_v56 = vsel %vm137_vm8, %v130_v37, %v132_v55  ;;  %v141_v57 = vsel %vm137_vm8, %v132_v55, %v1450_v54 }
  0xc2   :  { %v308_v59 = vsel %vm304_vm1, %v1184_v10, %v141_v57  ;;  %v307_v60 = vsel %vm304_vm1, %v1132_v0, %v140_v56 }
  0xc3   :  { %440 = vmatprep.subr.mxu1 %v308_v59 }
  0xc4   :  { %v251_v62 = vpop.permute.xlu1 %250  ;;  %441 = vmatpush1.msra.mxu1 %v307_v60  ;;  %v297_v63 = vpop.permute.xlu0 %296 }
  0xc5   :  { %v303_v2 = vsel %vm298_vm0, %v1332_v48, %v297_v63  ;;  %1033 = vmatmul.mubr.msk.f32.vlgmr.msra.gmra.mxu1 %vm325_vm9, %v1426_v43  ;;  %v257_v0 = vsel %vm252_vm3, %v1353_v58, %v251_v62 }
  0xc6   :  { %1060 = vmatpush3.msk.msra.mxu0 %vm304_vm1, %v303_v2  ;;  %847 = vmatprep.mubr.f32.mxu1 %v1107_v14 }
  0xc7   :  { %1061 = vmatprep.subr.mxu0 %v1107_v14 }
  0xc8   :  { %v739_v10 = vpop.permute.xlu1 %738  ;;  %v274_v4 = vpop.permute.xlu0 %273 }
  0xc9   :  { %v280_v7 = vsel %vm275_vm2, %v1360_v61, %v274_v4 }
  0xca   :  { %v324_v8 = vsel %vm304_vm1, %v257_v0, %v280_v7 }
  0xcb   :  { %1062 = vmatpush3.msra.mxu0 %v324_v8 }
  0xcc   :  { %v205_v48 = vpop.permute.xlu1 %204  ;;  %v1471_v9 = vpop.permute.xlu0 %740  ;;  %1063 = vmatprep.subr.mxu0 %v1107_v14 }
  0xcd   :  { %v749_v12 = vsel %vm298_vm0, %v739_v10, %v1471_v9  ;;  %v211_v58 = vsel %vm206_vm4, %v1394_v26, %v205_v48 }
  0xce   :  { %1036 = vmatprep.subr.msk.mxu1 %vm304_vm1, %v749_v12 }
  0xd0   :  { %v695_v13 = vpop.permute.xlu1 %694  ;;  %v228_v15 = vpop.permute.xlu0 %227 }
  0xd1   :  { %v234_v61 = vsel %vm229_vm5, %v1401_v30, %v228_v15 }
  0xd2   :  { %v319_v17 = vsel %vm304_vm1, %v211_v58, %v234_v61 }
  0xd3   :  { %1064 = vmatpush3.msra.mxu0 %v319_v17 }
  0xd4   :  { %v717_v18 = vpop.permute.xlu1 %716  ;;  %v1482_v19 = vpop.permute.xlu0 %696  ;;  %1065 = vmatprep.subr.mxu0 %v1107_v14 }
  0xd5   :  { %v705_v22 = vsel %vm252_vm3, %v695_v13, %v1482_v19 }
  0xd8   :  { %v737_v20 = vpop.permute.xlu1 %736  ;;  %v1485_v21 = vpop.permute.xlu0 %718 }
  0xd9   :  { %v748_v23 = vsel %vm298_vm0, %v737_v20, %v739_v10  ;;  %v727_v24 = vsel %vm275_vm2, %v717_v18, %v1485_v21 }
  0xda   :  { %1037 = vmatpush1.msk.msra.mxu1 %vm304_vm1, %v748_v23  ;;  %v769_v25 = vsel %vm304_vm1, %v705_v22, %v727_v24 }
  0xdb   :  { %807 = vmatprep.subr.mxu1 %v769_v25 }
  0xdc   :  { %v715_v26 = vpop.permute.xlu1 %714  ;;  %v693_v27 = vpop.permute.xlu0 %692 }
  0xdd   :  { %v726_v28 = vsel %vm275_vm2, %v715_v26, %v717_v18  ;;  %v704_v29 = vsel %vm252_vm3, %v693_v27, %v695_v13 }
  0xde   :  { %v768_v30 = vsel %vm304_vm1, %v704_v29, %v726_v28 }
  0xdf   :  { %808 = vmatpush1.msra.mxu1 %v768_v30 }
  0xe0   :  { %v182_v31 = vpop.permute.xlu1 %181  ;;  %v159_v32 = vpop.permute.xlu0 %158 }
  0xe1   :  { %v188_v33 = vsel %vm183_vm7, %v1437_v1, %v182_v31  ;;  %v165_v34 = vsel %vm160_vm6, %v1428_v44, %v159_v32 }
  0xe2   :  { %v314_v35 = vsel %vm304_vm1, %v165_v34, %v188_v33 }
  0xe3   :  { %1066 = vmatpush3.msra.mxu0 %v314_v35 }
  0xe4   :  { %v1502_v36 = vpop.permute.xlu1 %652  ;;  %v651_v37 = vpop.permute.xlu0 %650  ;;  %1067 = vmatprep.subr.mxu0 %v1107_v14 }
  0xe5   :  { %v661_v39 = vsel %vm206_vm4, %v651_v37, %v1502_v36 }
  0xe8   :  { %v1505_v38 = vpop.permute.xlu1 %674  ;;  %v673_v41 = vpop.permute.xlu0 %672 }
  0xe9   :  { %v683_v42 = vsel %vm229_vm5, %v673_v41, %v1505_v38 }
  0xea   :  { %v764_v45 = vsel %vm304_vm1, %v661_v39, %v683_v42 }
  0xeb   :  { %809 = vmatprep.subr.mxu1 %v764_v45 }
  0xec   :  { %v671_v44 = vpop.permute.xlu1 %670  ;;  %v649_v1 = vpop.permute.xlu0 %648 }
  0xed   :  { %v682_v3 = vsel %vm229_vm5, %v671_v44, %v673_v41  ;;  %v660_v47 = vsel %vm206_vm4, %v649_v1, %v651_v37 }
  0xee   :  { %v763_v49 = vsel %vm304_vm1, %v660_v47, %v682_v3 }
  0xef   :  { %810 = vmatpush1.msra.mxu1 %v763_v49 }
  0xf0   :  { %v607_v50 = vpop.permute.xlu1 %606  ;;  %v136_v51 = vpop.permute.xlu0 %135 }
  0xf1   :  { %v142_v52 = vsel %vm137_vm8, %v1450_v54, %v136_v51 }
  0xf2   :  { %v309_v53 = vsel %vm304_vm1, %v1193_v11, %v142_v52 }
  0xf3   :  { %1068 = vmatpush3.msra.mxu0 %v309_v53 }
  0xf4   :  { %v629_v55 = vpop.permute.xlu1 %628  ;;  %v1519_v56 = vpop.permute.xlu0 %608  ;;  %1070 = vmatmul.mubr.msk.f32.vlgmr.msra.gmra.mxu0 %vm325_vm9, %v1426_v43 }
  0xf5   :  { %918 = vmatprep.mubr.f32.mxu0 %v1107_v14  ;;  %v617_v60 = vsel %vm160_vm6, %v607_v50, %v1519_v56 }
  0xf8   :  { %v605_v57 = vpop.permute.xlu1 %604  ;;  %v631_v59 = vpop.permute.xlu0 %630 }
  0xf9   :  { %v639_v62 = vsel %vm183_vm7, %v629_v55, %v631_v59  ;;  %v616_v2 = vsel %vm160_vm6, %v605_v57, %v607_v50 }
  0xfa   :  { %v759_v54 = vsel %vm304_vm1, %v617_v60, %v639_v62 }
  0xfb   :  { %811 = vmatprep.subr.mxu1 %v759_v54 }
  0xfc   :  { %v585_v11 = vpop.permute.xlu1 %584  ;;  %v627_v63 = vpop.permute.xlu0 %626 }
  0xfd   :  { %v638_v10 = vsel %vm183_vm7, %v627_v63, %v629_v55 }
  0xfe   :  { %v758_v4 = vsel %vm304_vm1, %v616_v2, %v638_v10 }
  0xff   :  { %812 = vmatpush1.msra.mxu1 %v758_v4 }
 0x100   :  { %v743_v0 = vpop.permute.xlu1 %742  ;;  %v1531_v7 = vpop.permute.xlu0 %586 }
 0x101   :  { %v595_v8 = vsel %vm137_vm8, %v585_v11, %v1531_v7  ;;  %v750_v61 = vsel %vm298_vm0, %v1471_v9, %v743_v0 }
 0x102   :  { %v754_v48 = vsel %vm304_vm1, %v1248_v16, %v595_v8 }
 0x103   :  { %813 = vmatprep.subr.mxu1 %v754_v48 }
 0x104   :  { %v583_v12 = vpop.permute.xlu1 %582  ;;  %v745_v13 = vpop.permute.xlu0 %744 }
 0x105   :  { %v594_v15 = vsel %vm137_vm8, %v583_v12, %v585_v11  ;;  %v751_v58 = vsel %vm298_vm0, %v743_v0, %v745_v13 }
 0x106   :  { %1039 = vmatprep.subr.msk.mxu0 %vm304_vm1, %v751_v58  ;;  %v753_v17 = vsel %vm304_vm1, %v1156_v5, %v594_v15 }
 0x107   :  { %814 = vmatpush1.msra.mxu1 %v753_v17  ;;  %1040 = vmatpush1.msk.msra.mxu0 %vm304_vm1, %v750_v61 }
 0x108   :  { %v701_v18 = vpop.permute.xlu1 %700  ;;  %v699_v16 = vpop.permute.xlu0 %698  ;;  %1072 = vmatprep.subr.mxu1 %v1107_v14  ;;  %1038 = vmatmul.mubr.msk.f32.vlgmr.msra.gmra.mxu1 %vm325_vm9, %v1426_v43 }
 0x109   :  { %1082 = vmatprep.mubr.msk.f32.mxu1 %vm1108_vm10, %v1107_v14  ;;  %v706_v22 = vsel %vm252_vm3, %v1482_v19, %v699_v16  ;;  %v707_v5 = vsel %vm252_vm3, %v699_v16, %v701_v18 }
 0x10c   :  { %v723_v20 = vpop.permute.xlu1 %722  ;;  %v721_v9 = vpop.permute.xlu0 %720 }
 0x10d   :  { %v728_v23 = vsel %vm275_vm2, %v1485_v21, %v721_v9  ;;  %v729_v24 = vsel %vm275_vm2, %v721_v9, %v723_v20 }
 0x10e   :  { %v771_v25 = vsel %vm304_vm1, %v707_v5, %v729_v24  ;;  %v770_v26 = vsel %vm304_vm1, %v706_v22, %v728_v23 }
 0x10f   :  { %878 = vmatprep.subr.mxu0 %v771_v25 }
 0x110   :  { %v657_v27 = vpop.permute.xlu1 %656  ;;  %879 = vmatpush1.msra.mxu0 %v770_v26  ;;  %v655_v28 = vpop.permute.xlu0 %654 }
 0x111   :  { %v662_v19 = vsel %vm206_vm4, %v1502_v36, %v655_v28  ;;  %v663_v31 = vsel %vm206_vm4, %v655_v28, %v657_v27 }
 0x114   :  { %v679_v29 = vpop.permute.xlu1 %678  ;;  %v677_v30 = vpop.permute.xlu0 %676 }
 0x115   :  { %v684_v21 = vsel %vm229_vm5, %v1505_v38, %v677_v30  ;;  %v685_v32 = vsel %vm229_vm5, %v677_v30, %v679_v29 }
 0x116   :  { %v766_v33 = vsel %vm304_vm1, %v663_v31, %v685_v32  ;;  %v765_v34 = vsel %vm304_vm1, %v662_v19, %v684_v21 }
 0x117   :  { %880 = vmatprep.subr.mxu0 %v766_v33 }
 0x118   :  { %v611_v35 = vpop.permute.xlu1 %610  ;;  %881 = vmatpush1.msra.mxu0 %v765_v34  ;;  %v747_v37 = vpop.permute.xlu0 %746 }
 0x119   :  { %v752_v41 = vsel %vm298_vm0, %v745_v13, %v747_v37  ;;  %v618_v3 = vsel %vm160_vm6, %v1519_v56, %v611_v35 }
 0x11a   :  { %1073 = vmatpush3.msk.msra.mxu1 %vm304_vm1, %v752_v41 }
 0x11b   :  { %1074 = vmatprep.subr.mxu1 %v1107_v14 }
 0x11c   :  { %v633_v36 = vpop.permute.xlu1 %632  ;;  %v613_v39 = vpop.permute.xlu0 %612 }
 0x11d   :  { %v640_v38 = vsel %vm183_vm7, %v631_v59, %v633_v36  ;;  %v619_v44 = vsel %vm160_vm6, %v611_v35, %v613_v39 }
 0x11e   :  { %v760_v49 = vsel %vm304_vm1, %v618_v3, %v640_v38 }
 0x120   :  { %v703_v42 = vpop.permute.xlu1 %702  ;;  %v635_v45 = vpop.permute.xlu0 %634 }
 0x121   :  { %v641_v1 = vsel %vm183_vm7, %v633_v36, %v635_v45  ;;  %v708_v52 = vsel %vm252_vm3, %v701_v18, %v703_v42 }
 0x122   :  { %v761_v47 = vsel %vm304_vm1, %v619_v44, %v641_v1 }
 0x123   :  { %882 = vmatprep.subr.mxu0 %v761_v47 }
 0x124   :  { %v589_v50 = vpop.permute.xlu1 %588  ;;  %883 = vmatpush1.msra.mxu0 %v760_v49  ;;  %v725_v51 = vpop.permute.xlu0 %724 }
 0x125   :  { %v730_v53 = vsel %vm275_vm2, %v723_v20, %v725_v51  ;;  %v596_v57 = vsel %vm137_vm8, %v1531_v7, %v589_v50 }
 0x126   :  { %v772_v55 = vsel %vm304_vm1, %v708_v52, %v730_v53  ;;  %v755_v54 = vsel %vm304_vm1, %v1161_v6, %v596_v57 }
 0x127   :  { %1075 = vmatpush3.msra.mxu1 %v772_v55 }
 0x128   :  { %v659_v59 = vpop.permute.xlu1 %658  ;;  %v591_v56 = vpop.permute.xlu0 %590  ;;  %1076 = vmatprep.subr.mxu1 %v1107_v14 }
 0x129   :  { %v597_v60 = vsel %vm137_vm8, %v589_v50, %v591_v56  ;;  %v664_v2 = vsel %vm206_vm4, %v657_v27, %v659_v59 }
 0x12a   :  { %v756_v62 = vsel %vm304_vm1, %v1314_v40, %v597_v60 }
 0x12b   :  { %884 = vmatprep.subr.mxu0 %v756_v62 }
 0x12c   :  { %v615_v11 = vpop.permute.xlu1 %614  ;;  %885 = vmatpush1.msra.mxu0 %v755_v54  ;;  %v681_v63 = vpop.permute.xlu0 %680 }
 0x12d   :  { %v686_v10 = vsel %vm229_vm5, %v679_v29, %v681_v63  ;;  %1041 = vmatmul.mubr.msk.f32.vlgmr.msra.gmra.mxu0 %vm325_vm9, %v1426_v43  ;;  %v620_v40 = vsel %vm160_vm6, %v613_v39, %v615_v11 }
 0x12e   :  { %v767_v4 = vsel %vm304_vm1, %v664_v2, %v686_v10 }
 0x12f   :  { %1077 = vmatpush3.msra.mxu1 %v767_v4 }
 0x130   :  { %v593_v0 = vpop.permute.xlu1 %592  ;;  %v637_v7 = vpop.permute.xlu0 %636  ;;  %1078 = vmatprep.subr.mxu1 %v1107_v14 }
 0x131   :  { %v598_v6 = vsel %vm137_vm8, %v591_v56, %v593_v0  ;;  %v642_v8 = vsel %vm183_vm7, %v635_v45, %v637_v7 }
 0x132   :  { %v762_v48 = vsel %vm304_vm1, %v620_v40, %v642_v8  ;;  %v757_v12 = vsel %vm304_vm1, %v1330_v46, %v598_v6 }
 0x133   :  { %1079 = vmatpush3.msra.mxu1 %v762_v48 }
 0x134   :  { %1080 = vmatprep.subr.mxu1 %v1107_v14 }
 0x135   :  { %1081 = vmatpush3.msra.mxu1 %v757_v12 }
 0x136   :  { %1083 = vmatmul.mubr.msk.f32.vlgmr.msra.gmra.mxu1 %vm325_vm9, %v1426_v43 }
 0x179   :  { %v405_v13 = vpop.f32.mrf.mxu0 }
 0x17b   :  { %v407_v15 = vpop.f32.mrf.mxu0 }
 0x17c   :  { %v555_v58 = vcombine.low %v405_v13, %v407_v15 }
 0x17e   :  { %559 = vst [vmem:[%s1623_s3] sm:$0xff] %v555_v58 }
 0x185   :  { %v476_v61 = vpop.f32.mrf.mxu1 }
 0x187   :  { %v478_v17 = vpop.f32.mrf.mxu1 }
 0x188   :  { %v556_v18 = vcombine.low %v476_v61, %v478_v17 }
 0x18a   :  { %560 = vst [vmem:[%s1623_s3 + $0x8] sm:$0xff] %v556_v18 }
 0x1b4   :  { %v547_v14 = vpop.f32.mrf.mxu0 }
 0x1b5   :  { %561 = vst [vmem:[%s1623_s3 + $0x10] sm:$0xf] %v547_v14 }
 0x1b6   :  { %v1071_v46 = vpop.f32.mrf.mxu0 }
 0x1c8   :  { %v849_v43 = vpop.f32.mrf.mxu1 }
 0x1ca   :  { %v851_v16 = vpop.f32.mrf.mxu1 }
 0x1cb   :  { %v999_v20 = vcombine.low %v849_v43, %v851_v16 }
 0x1cd   :  { %1044 = vst [vmem:[%s1623_s3 + $0x14] sm:$0xff] %v999_v20 }
 0x1ed   :  { %v920_v9 = vpop.f32.mrf.mxu0 }
 0x1ef   :  { %v922_v22 = vpop.f32.mrf.mxu0 }
 0x1f0   :  { %v1000_v5 = vcombine.low %v920_v9, %v922_v22 }
 0x1f2   :  { %1045 = vst [vmem:[%s1623_s3 + $0x1c] sm:$0xff] %v1000_v5 }
 0x1f6   :  { %v991_v23 = vpop.f32.mrf.mxu1 }
 0x1f7   :  { %1046 = vst [vmem:[%s1623_s3 + $0x24] sm:$0xf] %v991_v23 }
 0x1f8   :  { %v1084_v24 = vpop.f32.mrf.mxu1 }

// kernel: scale_conv_forward.11
= control target key start
LH: loop header
LB: loop body
LE: loop exit
PB: predicated region body
PF: predicated region fallthrough
CT: control target
= control target key end

     0   :  { %s1463_s18 = smov 62   ;;  %s1464_s21 = smov 64   ;;  %v1471_v9 = vmov 0.0   ;;  %vm391_vm0 = vcmask 506880   ;;  %vm400_vm1 = vcmask 1043456   ;;  %vm321_vm2 = vcmask 523264   ;;  %s2196_s0 = inlined_call_operand.vmem [shape: f32[2,4,1152], index: 0, kind: input, shape index: {}, may-alias: {0,1}]   ;;  %s2197_s1 = inlined_call_operand.vmem [shape: f32[2,4,1152], index: 1, kind: input, shape index: {}, may-alias: {0,1}]   ;;  %s2198_s2 = inlined_call_operand.vmem [shape: f32[4,36], index: 2, kind: input, shape index: {}]   ;;  %s2199_s3 = inlined_call_operand.vmem [shape: f32[2,4,1024], index: 3, kind: output, shape index: {}]  }
   0x1   :  { %v1495_v0 = vld [vmem:[%s2196_s0 + $0x8] sm:$0xff]  ;;  %v1500_v1 = vld [vmem:[%s2196_s0] sm:$0xff]  ;;  %v1520_v5 = vld [vmem:[%s2196_s0 + $0x10] sm:$0xff]  ;;  %s1465_s22 = smov 63   ;;  %s1466_s23 = smov 95   ;;  %517 = vmatprep.mubr.f32.mxu0 %v1471_v9  ;;  %588 = vmatprep.mubr.f32.mxu1 %v1471_v9  ;;  %vm356_vm3 = vcmask 515072  }
   0x2   :  { %v1504_v2 = vcombine.high %v1495_v0, %v1495_v0  ;;  %v1508_v3 = vcombine.high %v1500_v1, %v1500_v1  ;;  %v1416_v4 = vld [vmem:[%s2197_s1 + $0x20] sm:$0xf]  ;;  %v121_v6 = vrot.slane %v1495_v0, 4  ;;  %v123_v7 = vrot.slane %v1520_v5, 4  ;;  %s1467_s24 = smov 94   ;;  %s1468_s25 = smov 126  }
   0x3   :  { %64 = vst [vmem:[#allocation3] sm:$0xf] %v1416_v4  ;;  %v119_v8 = vrot.slane %v1500_v1, 4  ;;  %s1469_s26 = smov 96   ;;  %s1470_s27 = smov 127   ;;  %v1591_v10 = vcombine.high %v1520_v5, %v1520_v5  ;;  %v1598_v11 = vld [vmem:[%s2196_s0 + $0x18] sm:$0xff] }
   0x4   :  { %379 = vrot.lane.b32.xlu1 %v1504_v2, %s1463_s18  ;;  %375 = vrot.lane.b32.xlu0 %v1508_v3, %s1463_s18  ;;  %v1602_v12 = vcombine.high %v1598_v11, %v1598_v11  ;;  %v125_v14 = vrot.slane %v1598_v11, 4  ;;  %v1417_v15 = vld [vmem:[%s2197_s1 + $0x44] sm:$0xf]  ;;  %v1694_v45 = vld [vmem:[%s2196_s0 + $0x2c] sm:$0xff]  ;;  %vm251_vm4 = vcmask 777216   ;;  %vm286_vm5 = vcmask 769024  }
   0x5   :  { %66 = vst [vmem:[#allocation3 + $0x4] sm:$0xf] %v1417_v15  ;;  %v1682_v41 = vld [vmem:[%s2196_s0 + $0x24] sm:$0xff]  ;;  %v1707_v52 = vcombine.high %v1694_v45, %v1694_v45  ;;  %v1714_v53 = vld [vmem:[%s2196_s0 + $0x34] sm:$0xff]  ;;  %v1732_v63 = vrot.slane %v1694_v45, 4  ;;  %vm181_vm6 = vcmask 1031168  }
   0x6   :  { %v1698_v46 = vcombine.high %v1682_v41, %v1682_v41  ;;  %vm216_vm7 = vcmask 785408   ;;  %vm146_vm8 = vcmask 1039360   ;;  %vm433_vm9 = vcmask 293888  }
   0x8   :  { %381 = vrot.lane.b32.xlu1 %v1520_v5, %s1463_s18  ;;  %377 = vrot.lane.b32.xlu0 %v1495_v0, %s1463_s18 }
   0xa   :  { %v105_v13 = vld [vmem:[#allocation3] sm:$0xf] }
   0xb   :  { %v127_v16 = vrot.slane %v105_v13, 4 }
   0xc   :  { %307 = vrot.lane.b32.xlu1 %v1495_v0, %s1464_s21  ;;  %305 = vrot.lane.b32.xlu0 %v1508_v3, %s1464_s21 }
  0x10   :  { %311 = vrot.lane.b32.xlu1 %v1520_v5, %s1464_s21  ;;  %309 = vrot.lane.b32.xlu0 %v1504_v2, %s1464_s21 }
  0x14   :  { %342 = vrot.lane.b32.xlu1 %v121_v6, %s1465_s22  ;;  %340 = vrot.lane.b32.xlu0 %v1508_v3, %s1465_s22 }
  0x18   :  { %346 = vrot.lane.b32.xlu1 %v123_v7, %s1465_s22  ;;  %344 = vrot.lane.b32.xlu0 %v1504_v2, %s1465_s22 }
  0x1c   :  { %303 = vrot.lane.b32.xlu1 %v1500_v1, %s1464_s21  ;;  %373 = vrot.lane.b32.xlu0 %v1500_v1, %s1463_s18 }
  0x20   :  { %235 = vrot.lane.b32.xlu1 %v1508_v3, %s1466_s23  ;;  %338 = vrot.lane.b32.xlu0 %v119_v8, %s1465_s22 }
  0x24   :  { %239 = vrot.lane.b32.xlu1 %v1504_v2, %s1466_s23  ;;  %237 = vrot.lane.b32.xlu0 %v1495_v0, %s1466_s23 }
  0x28   :  { %270 = vrot.lane.b32.xlu1 %v1508_v3, %s1467_s24  ;;  %241 = vrot.lane.b32.xlu0 %v1520_v5, %s1466_s23 }
  0x2c   :  { %274 = vrot.lane.b32.xlu1 %v1504_v2, %s1467_s24  ;;  %272 = vrot.lane.b32.xlu0 %v121_v6, %s1467_s24 }
  0x30   :  { %233 = vrot.lane.b32.xlu1 %v1500_v1, %s1466_s23  ;;  %276 = vrot.lane.b32.xlu0 %v123_v7, %s1467_s24 }
  0x34   :  { %165 = vrot.lane.b32.xlu1 %v1508_v3, %s1468_s25  ;;  %268 = vrot.lane.b32.xlu0 %v119_v8, %s1467_s24 }
  0x38   :  { %169 = vrot.lane.b32.xlu1 %v1504_v2, %s1468_s25  ;;  %167 = vrot.lane.b32.xlu0 %v1495_v0, %s1468_s25 }
  0x3c   :  { %200 = vrot.lane.b32.xlu1 %v1508_v3, %s1469_s26  ;;  %171 = vrot.lane.b32.xlu0 %v1520_v5, %s1468_s25 }
  0x40   :  { %204 = vrot.lane.b32.xlu1 %v1504_v2, %s1469_s26  ;;  %202 = vrot.lane.b32.xlu0 %v121_v6, %s1469_s26 }
  0x44   :  { %163 = vrot.lane.b32.xlu1 %v1500_v1, %s1468_s25  ;;  %206 = vrot.lane.b32.xlu0 %v123_v7, %s1469_s26 }
  0x48   :  { %130 = vrot.lane.b32.xlu1 %v1508_v3, %s1470_s27  ;;  %198 = vrot.lane.b32.xlu0 %v119_v8, %s1469_s26 }
  0x4c   :  { %134 = vrot.lane.b32.xlu1 %v1504_v2, %s1470_s27  ;;  %132 = vrot.lane.b32.xlu0 %v121_v6, %s1470_s27 }
  0x50   :  { %128 = vrot.lane.b32.xlu1 %v119_v8, %s1470_s27  ;;  %136 = vrot.lane.b32.xlu0 %v123_v7, %s1470_s27 }
  0x54   :  { %385 = vrot.lane.b32.xlu1 %v1598_v11, %s1463_s18  ;;  %383 = vrot.lane.b32.xlu0 %v1591_v10, %s1463_s18 }
  0x58   :  { %389 = vrot.lane.b32.xlu1 %v105_v13, %s1463_s18  ;;  %387 = vrot.lane.b32.xlu0 %v1602_v12, %s1463_s18 }
  0x5c   :  { %315 = vrot.lane.b32.xlu1 %v1598_v11, %s1464_s21  ;;  %313 = vrot.lane.b32.xlu0 %v1591_v10, %s1464_s21 }
  0x60   :  { %319 = vrot.lane.b32.xlu1 %v105_v13, %s1464_s21  ;;  %317 = vrot.lane.b32.xlu0 %v1602_v12, %s1464_s21 }
  0x64   :  { %350 = vrot.lane.b32.xlu1 %v125_v14, %s1465_s22  ;;  %348 = vrot.lane.b32.xlu0 %v1591_v10, %s1465_s22 }
  0x68   :  { %354 = vrot.lane.b32.xlu1 %v127_v16, %s1465_s22  ;;  %352 = vrot.lane.b32.xlu0 %v1602_v12, %s1465_s22 }
  0x6c   :  { %245 = vrot.lane.b32.xlu1 %v1598_v11, %s1466_s23  ;;  %243 = vrot.lane.b32.xlu0 %v1591_v10, %s1466_s23 }
  0x70   :  { %249 = vrot.lane.b32.xlu1 %v105_v13, %s1466_s23  ;;  %247 = vrot.lane.b32.xlu0 %v1602_v12, %s1466_s23 }
  0x74   :  { %280 = vrot.lane.b32.xlu1 %v125_v14, %s1467_s24  ;;  %278 = vrot.lane.b32.xlu0 %v1591_v10, %s1467_s24 }
  0x76   :  { %v380_v17 = vpop.permute.xlu1 %379  ;;  %v376_v18 = vpop.permute.xlu0 %375 }
  0x78   :  { %284 = vrot.lane.b32.xlu1 %v127_v16, %s1467_s24  ;;  %282 = vrot.lane.b32.xlu0 %v1602_v12, %s1467_s24 }
  0x7a   :  { %v1641_v19 = vpop.permute.xlu1 %381  ;;  %v378_v20 = vpop.permute.xlu0 %377 }
  0x7b   :  { %v395_v21 = vsel %vm391_vm0, %v380_v17, %v1641_v19  ;;  %v393_v22 = vsel %vm391_vm0, %v376_v18, %v378_v20  ;;  %v394_v23 = vsel %vm391_vm0, %v378_v20, %v380_v17 }
  0x7c   :  { %1421 = vmatprep.subr.msk.mxu1 %vm400_vm1, %v395_v21  ;;  %175 = vrot.lane.b32.xlu1 %v1598_v11, %s1468_s25 }
  0x7d   :  { %173 = vrot.lane.b32.xlu0 %v1591_v10, %s1468_s25  ;;  %1418 = vmatprep.subr.msk.mxu0 %vm400_vm1, %v393_v22 }
  0x7e   :  { %1422 = vmatpush1.msk.msra.mxu1 %vm400_vm1, %v394_v23  ;;  %v308_v24 = vpop.permute.xlu1 %307  ;;  %v306_v25 = vpop.permute.xlu0 %305 }
  0x7f   :  { %v323_v42 = vsel %vm321_vm2, %v306_v25, %v308_v24 }
  0x80   :  { %179 = vrot.lane.b32.xlu1 %v105_v13, %s1468_s25 }
  0x81   :  { %177 = vrot.lane.b32.xlu0 %v1602_v12, %s1468_s25 }
  0x82   :  { %v1657_v26 = vpop.permute.xlu1 %311  ;;  %v310_v27 = vpop.permute.xlu0 %309 }
  0x83   :  { %v324_v32 = vsel %vm321_vm2, %v308_v24, %v310_v27  ;;  %v325_v33 = vsel %vm321_vm2, %v310_v27, %v1657_v26  ;;  %v1765_v27 = vrot.slane %v1682_v41, 4 }
  0x84   :  { %210 = vrot.lane.b32.xlu1 %v125_v14, %s1469_s26 }
  0x85   :  { %208 = vrot.lane.b32.xlu0 %v1591_v10, %s1469_s26 }
  0x86   :  { %v343_v28 = vpop.permute.xlu1 %342  ;;  %v341_v29 = vpop.permute.xlu0 %340 }
  0x87   :  { %v358_v38 = vsel %vm356_vm3, %v341_v29, %v343_v28 }
  0x88   :  { %214 = vrot.lane.b32.xlu1 %v127_v16, %s1469_s26  ;;  %v426_v44 = vsel %vm400_vm1, %v323_v42, %v358_v38 }
  0x89   :  { %212 = vrot.lane.b32.xlu0 %v1602_v12, %s1469_s26 }
  0x8a   :  { %v1665_v30 = vpop.permute.xlu1 %346  ;;  %v345_v31 = vpop.permute.xlu0 %344 }
  0x8b   :  { %v359_v34 = vsel %vm356_vm3, %v343_v28, %v345_v31  ;;  %v360_v35 = vsel %vm356_vm3, %v345_v31, %v1665_v30 }
  0x8c   :  { %140 = vrot.lane.b32.xlu1 %v125_v14, %s1470_s27  ;;  %v428_v36 = vsel %vm400_vm1, %v325_v33, %v360_v35  ;;  %v427_v37 = vsel %vm400_vm1, %v324_v32, %v359_v34 }
  0x8d   :  { %138 = vrot.lane.b32.xlu0 %v1591_v10, %s1470_s27  ;;  %548 = vmatprep.subr.mxu1 %v428_v36 }
  0x8e   :  { %v304_v39 = vpop.permute.xlu1 %303  ;;  %549 = vmatpush1.msra.mxu1 %v427_v37  ;;  %v374_v40 = vpop.permute.xlu0 %373 }
  0x8f   :  { %v392_v43 = vsel %vm391_vm0, %v374_v40, %v376_v18  ;;  %v322_v49 = vsel %vm321_vm2, %v304_v39, %v306_v25 }
  0x90   :  { %144 = vrot.lane.b32.xlu1 %v127_v16, %s1470_s27  ;;  %1419 = vmatpush1.msk.msra.mxu0 %vm400_vm1, %v392_v43  ;;  %v1748_v16 = vrot.slane %v1714_v53, 4 }
  0x91   :  { %142 = vrot.lane.b32.xlu0 %v1602_v12, %s1470_s27  ;;  %477 = vmatprep.subr.mxu0 %v426_v44 }
  0x92   :  { %v236_v47 = vpop.permute.xlu1 %235  ;;  %v339_v48 = vpop.permute.xlu0 %338 }
  0x93   :  { %v357_v50 = vsel %vm356_vm3, %v339_v48, %v341_v29 }
  0x94   :  { %1028 = vrot.lane.b32.xlu1 %v1694_v45, %s1463_s18  ;;  %v425_v51 = vsel %vm400_vm1, %v322_v49, %v357_v50 }
  0x95   :  { %1026 = vrot.lane.b32.xlu0 %v1698_v46, %s1463_s18  ;;  %478 = vmatpush1.msra.mxu0 %v425_v51 }
  0x96   :  { %v240_v54 = vpop.permute.xlu1 %239  ;;  %v238_v55 = vpop.permute.xlu0 %237 }
  0x97   :  { %v253_v60 = vsel %vm251_vm4, %v236_v47, %v238_v55  ;;  %v254_v14 = vsel %vm251_vm4, %v238_v55, %v240_v54 }
  0x98   :  { %1032 = vrot.lane.b32.xlu1 %v1714_v53, %s1463_s18 }
  0x99   :  { %1030 = vrot.lane.b32.xlu0 %v1707_v52, %s1463_s18 }
  0x9a   :  { %v271_v56 = vpop.permute.xlu1 %270  ;;  %v1720_v57 = vpop.permute.xlu0 %241 }
  0x9b   :  { %v255_v8 = vsel %vm251_vm4, %v240_v54, %v1720_v57 }
  0x9c   :  { %960 = vrot.lane.b32.xlu1 %v1694_v45, %s1464_s21 }
  0x9d   :  { %958 = vrot.lane.b32.xlu0 %v1698_v46, %s1464_s21 }
  0x9e   :  { %v275_v58 = vpop.permute.xlu1 %274  ;;  %v273_v59 = vpop.permute.xlu0 %272 }
  0x9f   :  { %v288_v61 = vsel %vm286_vm5, %v271_v56, %v273_v59  ;;  %v289_v4 = vsel %vm286_vm5, %v273_v59, %v275_v58 }
  0xa0   :  { %964 = vrot.lane.b32.xlu1 %v1714_v53, %s1464_s21  ;;  %v418_v62 = vsel %vm400_vm1, %v253_v60, %v288_v61  ;;  %v419_v17 = vsel %vm400_vm1, %v254_v14, %v289_v4 }
  0xa1   :  { %962 = vrot.lane.b32.xlu0 %v1707_v52, %s1464_s21  ;;  %479 = vmatprep.subr.mxu0 %v418_v62 }
  0xa2   :  { %v234_v6 = vpop.permute.xlu1 %233  ;;  %v1737_v7 = vpop.permute.xlu0 %276 }
  0xa3   :  { %v290_v13 = vsel %vm286_vm5, %v275_v58, %v1737_v7  ;;  %v252_v21 = vsel %vm251_vm4, %v234_v6, %v236_v47  ;;  %v1817_v6 = vld [vmem:[%s2198_s2] sm:$0xf] }
  0xa4   :  { %994 = vrot.lane.b32.xlu1 %v1732_v63, %s1465_s22  ;;  %v420_v15 = vsel %vm400_vm1, %v255_v8, %v290_v13 }
  0xa5   :  { %992 = vrot.lane.b32.xlu0 %v1698_v46, %s1465_s22  ;;  %550 = vmatprep.subr.mxu1 %v420_v15 }
  0xa6   :  { %v166_v18 = vpop.permute.xlu1 %165  ;;  %551 = vmatpush1.msra.mxu1 %v419_v17  ;;  %v269_v20 = vpop.permute.xlu0 %268 }
  0xa7   :  { %v287_v22 = vsel %vm286_vm5, %v269_v20, %v271_v56 }
  0xa8   :  { %998 = vrot.lane.b32.xlu1 %v1748_v16, %s1465_s22  ;;  %v417_v23 = vsel %vm400_vm1, %v252_v21, %v287_v22 }
  0xa9   :  { %996 = vrot.lane.b32.xlu0 %v1707_v52, %s1465_s22  ;;  %480 = vmatpush1.msra.mxu0 %v417_v23 }
  0xaa   :  { %v170_v24 = vpop.permute.xlu1 %169  ;;  %v168_v25 = vpop.permute.xlu0 %167 }
  0xab   :  { %v183_v33 = vsel %vm181_vm6, %v166_v18, %v168_v25  ;;  %v184_v42 = vsel %vm181_vm6, %v168_v25, %v170_v24 }
  0xac   :  { %956 = vrot.lane.b32.xlu1 %v1682_v41, %s1464_s21 }
  0xad   :  { %1024 = vrot.lane.b32.xlu0 %v1682_v41, %s1463_s18 }
  0xae   :  { %v201_v28 = vpop.permute.xlu1 %200  ;;  %v1767_v29 = vpop.permute.xlu0 %171 }
  0xaf   :  { %v185_v39 = vsel %vm181_vm6, %v170_v24, %v1767_v29 }
  0xb0   :  { %890 = vrot.lane.b32.xlu1 %v1698_v46, %s1466_s23 }
  0xb1   :  { %990 = vrot.lane.b32.xlu0 %v1765_v27, %s1465_s22 }
  0xb2   :  { %v205_v31 = vpop.permute.xlu1 %204  ;;  %v203_v32 = vpop.permute.xlu0 %202 }
  0xb3   :  { %v218_v34 = vsel %vm216_vm7, %v201_v28, %v203_v32  ;;  %v219_v36 = vsel %vm216_vm7, %v203_v32, %v205_v31 }
  0xb4   :  { %894 = vrot.lane.b32.xlu1 %v1707_v52, %s1466_s23  ;;  %v410_v35 = vsel %vm400_vm1, %v183_v33, %v218_v34  ;;  %v411_v44 = vsel %vm400_vm1, %v184_v42, %v219_v36 }
  0xb5   :  { %892 = vrot.lane.b32.xlu0 %v1694_v45, %s1466_s23  ;;  %481 = vmatprep.subr.mxu0 %v410_v35 }
  0xb6   :  { %v164_v37 = vpop.permute.xlu1 %163  ;;  %v1781_v38 = vpop.permute.xlu0 %206 }
  0xb7   :  { %v220_v40 = vsel %vm216_vm7, %v205_v31, %v1781_v38  ;;  %v182_v49 = vsel %vm181_vm6, %v164_v37, %v166_v18 }
  0xb8   :  { %924 = vrot.lane.b32.xlu1 %v1698_v46, %s1467_s24  ;;  %v412_v43 = vsel %vm400_vm1, %v185_v39, %v220_v40 }
  0xb9   :  { %896 = vrot.lane.b32.xlu0 %v1714_v53, %s1466_s23  ;;  %552 = vmatprep.subr.mxu1 %v412_v43 }
  0xba   :  { %v131_v47 = vpop.permute.xlu1 %130  ;;  %553 = vmatpush1.msra.mxu1 %v411_v44  ;;  %v199_v48 = vpop.permute.xlu0 %198 }
  0xbb   :  { %v217_v50 = vsel %vm216_vm7, %v199_v48, %v201_v28  ;;  %v1886_v48 = vcombine.high %v1714_v53, %v1714_v53 }
  0xbc   :  { %928 = vrot.lane.b32.xlu1 %v1707_v52, %s1467_s24  ;;  %v409_v51 = vsel %vm400_vm1, %v182_v49, %v217_v50  ;;  %v1893_v49 = vld [vmem:[%s2196_s0 + $0x3c] sm:$0xff] }
  0xbd   :  { %926 = vrot.lane.b32.xlu0 %v1732_v63, %s1467_s24  ;;  %482 = vmatpush1.msra.mxu0 %v409_v51  ;;  %v1903_v51 = vld [vmem:[#allocation3 + $0x4] sm:$0xf] }
  0xbe   :  { %v135_v54 = vpop.permute.xlu1 %134  ;;  %v133_v55 = vpop.permute.xlu0 %132 }
  0xbf   :  { %v148_v56 = vsel %vm146_vm8, %v131_v47, %v133_v55  ;;  %v149_v61 = vsel %vm146_vm8, %v133_v55, %v135_v54 }
  0xc0   :  { %888 = vrot.lane.b32.xlu1 %v1682_v41, %s1466_s23  ;;  %v402_v58 = vsel %vm400_vm1, %v1508_v3, %v148_v56  ;;  %v403_v14 = vsel %vm400_vm1, %v1495_v0, %v149_v61 }
  0xc1   :  { %930 = vrot.lane.b32.xlu0 %v1748_v16, %s1467_s24  ;;  %483 = vmatprep.subr.mxu0 %v402_v58 }
  0xc2   :  { %v129_v59 = vpop.permute.xlu1 %128  ;;  %v1808_v60 = vpop.permute.xlu0 %136 }
  0xc3   :  { %v147_v62 = vsel %vm146_vm8, %v129_v59, %v131_v47  ;;  %v150_v4 = vsel %vm146_vm8, %v135_v54, %v1808_v60 }
  0xc4   :  { %822 = vrot.lane.b32.xlu1 %v1698_v46, %s1468_s25  ;;  %v401_v3 = vsel %vm400_vm1, %v1500_v1, %v147_v62  ;;  %v404_v8 = vsel %vm400_vm1, %v1504_v2, %v150_v4 }
  0xc5   :  { %922 = vrot.lane.b32.xlu0 %v1765_v27, %s1467_s24  ;;  %484 = vmatpush1.msra.mxu0 %v401_v3 }
  0xc6   :  { %554 = vmatprep.subr.mxu1 %v404_v8  ;;  %v386_v13 = vpop.permute.xlu1 %385  ;;  %v384_v15 = vpop.permute.xlu0 %383  ;;  %1420 = vmatmul.mubr.msk.f32.vlgmr.msra.gmra.mxu0 %vm433_vm9, %v1817_v6 }
  0xc7   :  { %555 = vmatpush1.msra.mxu1 %v403_v14  ;;  %v396_v1 = vsel %vm391_vm0, %v1641_v19, %v384_v15  ;;  %v397_v17 = vsel %vm391_vm0, %v384_v15, %v386_v13  ;;  %659 = vmatprep.mubr.f32.mxu0 %v1471_v9 }
  0xc8   :  { %826 = vrot.lane.b32.xlu1 %v1707_v52, %s1468_s25  ;;  %1424 = vmatprep.subr.msk.mxu0 %vm400_vm1, %v397_v17 }
  0xc9   :  { %824 = vrot.lane.b32.xlu0 %v1694_v45, %s1468_s25  ;;  %1425 = vmatpush1.msk.msra.mxu0 %vm400_vm1, %v396_v1 }
  0xca   :  { %v390_v0 = vpop.permute.xlu1 %389  ;;  %v388_v2 = vpop.permute.xlu0 %387  ;;  %1423 = vmatmul.mubr.msk.f32.vlgmr.msra.gmra.mxu1 %vm433_vm9, %v1817_v6 }
  0xcb   :  { %v398_v19 = vsel %vm391_vm0, %v386_v13, %v388_v2  ;;  %v399_v18 = vsel %vm391_vm0, %v388_v2, %v390_v0  ;;  %730 = vmatprep.mubr.f32.mxu1 %v1471_v9  ;;  %v1930_v0 = vrot.slane %v1893_v49, 4 }
  0xcc   :  { %856 = vrot.lane.b32.xlu1 %v1698_v46, %s1469_s26  ;;  %1427 = vmatprep.subr.msk.mxu1 %vm400_vm1, %v399_v18  ;;  %v1937_v18 = vrot.slane %v1903_v51, 4 }
  0xcd   :  { %828 = vrot.lane.b32.xlu0 %v1714_v53, %s1468_s25  ;;  %1428 = vmatpush1.msk.msra.mxu1 %vm400_vm1, %v398_v19 }
  0xce   :  { %v316_v20 = vpop.permute.xlu1 %315  ;;  %v314_v21 = vpop.permute.xlu0 %313 }
  0xcf   :  { %v326_v28 = vsel %vm321_vm2, %v1657_v26, %v314_v21  ;;  %v327_v31 = vsel %vm321_vm2, %v314_v21, %v316_v20 }
  0xd0   :  { %860 = vrot.lane.b32.xlu1 %v1707_v52, %s1469_s26 }
  0xd1   :  { %858 = vrot.lane.b32.xlu0 %v1732_v63, %s1469_s26 }
  0xd2   :  { %v320_v22 = vpop.permute.xlu1 %319  ;;  %v318_v23 = vpop.permute.xlu0 %317 }
  0xd3   :  { %v328_v37 = vsel %vm321_vm2, %v316_v20, %v318_v23 }
  0xd4   :  { %820 = vrot.lane.b32.xlu1 %v1682_v41, %s1468_s25 }
  0xd5   :  { %862 = vrot.lane.b32.xlu0 %v1748_v16, %s1469_s26 }
  0xd6   :  { %v351_v24 = vpop.permute.xlu1 %350  ;;  %v349_v25 = vpop.permute.xlu0 %348 }
  0xd7   :  { %v361_v32 = vsel %vm356_vm3, %v1665_v30, %v349_v25  ;;  %v362_v33 = vsel %vm356_vm3, %v349_v25, %v351_v24  ;;  %v329_v30 = vsel %vm321_vm2, %v318_v23, %v320_v22 }
  0xd8   :  { %788 = vrot.lane.b32.xlu1 %v1698_v46, %s1470_s27  ;;  %v430_v34 = vsel %vm400_vm1, %v327_v31, %v362_v33  ;;  %v429_v35 = vsel %vm400_vm1, %v326_v28, %v361_v32 }
  0xd9   :  { %854 = vrot.lane.b32.xlu0 %v1765_v27, %s1469_s26  ;;  %619 = vmatprep.subr.mxu0 %v430_v34 }
  0xda   :  { %v355_v36 = vpop.permute.xlu1 %354  ;;  %620 = vmatpush1.msra.mxu0 %v429_v35  ;;  %v353_v26 = vpop.permute.xlu0 %352 }
  0xdb   :  { %v363_v39 = vsel %vm356_vm3, %v351_v24, %v353_v26  ;;  %v364_v40 = vsel %vm356_vm3, %v353_v26, %v355_v36 }
  0xdc   :  { %792 = vrot.lane.b32.xlu1 %v1707_v52, %s1470_s27  ;;  %v432_v42 = vsel %vm400_vm1, %v329_v30, %v364_v40  ;;  %v431_v43 = vsel %vm400_vm1, %v328_v37, %v363_v39 }
  0xdd   :  { %790 = vrot.lane.b32.xlu0 %v1732_v63, %s1470_s27  ;;  %690 = vmatprep.subr.mxu1 %v432_v42 }
  0xde   :  { %v246_v44 = vpop.permute.xlu1 %245  ;;  %691 = vmatpush1.msra.mxu1 %v431_v43  ;;  %v244_v47 = vpop.permute.xlu0 %243 }
  0xdf   :  { %v256_v55 = vsel %vm251_vm4, %v1720_v57, %v244_v47  ;;  %v257_v56 = vsel %vm251_vm4, %v244_v47, %v246_v44 }
  0xe0   :  { %786 = vrot.lane.b32.xlu1 %v1765_v27, %s1470_s27  ;;  %v1899_v27 = vcombine.high %v1893_v49, %v1893_v49 }
  0xe1   :  { %794 = vrot.lane.b32.xlu0 %v1748_v16, %s1470_s27 }
  0xe2   :  { %v250_v63 = vpop.permute.xlu1 %249  ;;  %v248_v50 = vpop.permute.xlu0 %247 }
  0xe3   :  { %v258_v3 = vsel %vm251_vm4, %v246_v44, %v248_v50 }
  0xe4   :  { %1036 = vrot.lane.b32.xlu1 %v1893_v49, %s1463_s18 }
  0xe5   :  { %1034 = vrot.lane.b32.xlu0 %v1886_v48, %s1463_s18 }
  0xe6   :  { %v281_v16 = vpop.permute.xlu1 %280  ;;  %v279_v54 = vpop.permute.xlu0 %278 }
  0xe7   :  { %v291_v58 = vsel %vm286_vm5, %v1737_v7, %v279_v54  ;;  %v292_v59 = vsel %vm286_vm5, %v279_v54, %v281_v16  ;;  %v259_v7 = vsel %vm251_vm4, %v248_v50, %v250_v63 }
  0xe8   :  { %1040 = vrot.lane.b32.xlu1 %v1903_v51, %s1463_s18  ;;  %v422_v61 = vsel %vm400_vm1, %v257_v56, %v292_v59  ;;  %v421_v62 = vsel %vm400_vm1, %v256_v55, %v291_v58 }
  0xe9   :  { %1038 = vrot.lane.b32.xlu0 %v1899_v27, %s1463_s18  ;;  %621 = vmatprep.subr.mxu0 %v422_v61 }
  0xea   :  { %v285_v4 = vpop.permute.xlu1 %284  ;;  %622 = vmatpush1.msra.mxu0 %v421_v62  ;;  %v283_v57 = vpop.permute.xlu0 %282 }
  0xeb   :  { %v293_v8 = vsel %vm286_vm5, %v281_v16, %v283_v57  ;;  %v294_v13 = vsel %vm286_vm5, %v283_v57, %v285_v4 }
  0xec   :  { %968 = vrot.lane.b32.xlu1 %v1893_v49, %s1464_s21  ;;  %v424_v14 = vsel %vm400_vm1, %v259_v7, %v294_v13  ;;  %v423_v15 = vsel %vm400_vm1, %v258_v3, %v293_v8 }
  0xed   :  { %966 = vrot.lane.b32.xlu0 %v1886_v48, %s1464_s21  ;;  %692 = vmatprep.subr.mxu1 %v424_v14 }
  0xee   :  { %v176_v1 = vpop.permute.xlu1 %175  ;;  %693 = vmatpush1.msra.mxu1 %v423_v15 }
  0xef   :  { %v174_v17 = vpop.permute.xlu0 %173 }
  0xf0   :  { %972 = vrot.lane.b32.xlu1 %v1903_v51, %s1464_s21  ;;  %v186_v22 = vsel %vm181_vm6, %v1767_v29, %v174_v17  ;;  %v187_v23 = vsel %vm181_vm6, %v174_v17, %v176_v1 }
  0xf1   :  { %970 = vrot.lane.b32.xlu0 %v1899_v27, %s1464_s21 }
  0xf2   :  { %v180_v2 = vpop.permute.xlu1 %179 }
  0xf3   :  { %v178_v19 = vpop.permute.xlu0 %177 }
  0xf4   :  { %1002 = vrot.lane.b32.xlu1 %v1930_v0, %s1465_s22  ;;  %v188_v33 = vsel %vm181_vm6, %v176_v1, %v178_v19 }
  0xf5   :  { %1000 = vrot.lane.b32.xlu0 %v1886_v48, %s1465_s22 }
  0xf6   :  { %v211_v20 = vpop.permute.xlu1 %210 }
  0xf7   :  { %v209_v21 = vpop.permute.xlu0 %208 }
  0xf8   :  { %v221_v24 = vsel %vm216_vm7, %v1781_v38, %v209_v21  ;;  %v222_v25 = vsel %vm216_vm7, %v209_v21, %v211_v20  ;;  %1006 = vrot.lane.b32.xlu1 %v1937_v18, %s1465_s22  ;;  %v189_v38 = vsel %vm181_vm6, %v178_v19, %v180_v2 }
  0xf9   :  { %1004 = vrot.lane.b32.xlu0 %v1899_v27, %s1465_s22  ;;  %v414_v28 = vsel %vm400_vm1, %v187_v23, %v222_v25  ;;  %v413_v31 = vsel %vm400_vm1, %v186_v22, %v221_v24 }
  0xfa   :  { %623 = vmatprep.subr.mxu0 %v414_v28  ;;  %v215_v32 = vpop.permute.xlu1 %214 }
  0xfb   :  { %624 = vmatpush1.msra.mxu0 %v413_v31  ;;  %v213_v29 = vpop.permute.xlu0 %212 }
  0xfc   :  { %v223_v34 = vsel %vm216_vm7, %v211_v20, %v213_v29  ;;  %v224_v35 = vsel %vm216_vm7, %v213_v29, %v215_v32  ;;  %900 = vrot.lane.b32.xlu1 %v1893_v49, %s1466_s23 }
  0xfd   :  { %898 = vrot.lane.b32.xlu0 %v1886_v48, %s1466_s23  ;;  %v416_v36 = vsel %vm400_vm1, %v189_v38, %v224_v35  ;;  %v415_v26 = vsel %vm400_vm1, %v188_v33, %v223_v34 }
  0xfe   :  { %694 = vmatprep.subr.mxu1 %v416_v36  ;;  %v141_v37 = vpop.permute.xlu1 %140 }
  0xff   :  { %695 = vmatpush1.msra.mxu1 %v415_v26  ;;  %v139_v30 = vpop.permute.xlu0 %138 }
 0x100   :  { %v151_v39 = vsel %vm146_vm8, %v1808_v60, %v139_v30  ;;  %v152_v40 = vsel %vm146_vm8, %v139_v30, %v141_v37  ;;  %904 = vrot.lane.b32.xlu1 %v1903_v51, %s1466_s23 }
 0x101   :  { %902 = vrot.lane.b32.xlu0 %v1899_v27, %s1466_s23  ;;  %v406_v42 = vsel %vm400_vm1, %v1591_v10, %v152_v40  ;;  %v405_v43 = vsel %vm400_vm1, %v1520_v5, %v151_v39 }
 0x102   :  { %625 = vmatprep.subr.mxu0 %v406_v42  ;;  %v145_v44 = vpop.permute.xlu1 %144 }
 0x103   :  { %626 = vmatpush1.msra.mxu0 %v405_v43  ;;  %v143_v47 = vpop.permute.xlu0 %142 }
 0x104   :  { %v153_v60 = vsel %vm146_vm8, %v141_v37, %v143_v47  ;;  %v154_v63 = vsel %vm146_vm8, %v143_v47, %v145_v44  ;;  %934 = vrot.lane.b32.xlu1 %v1930_v0, %s1467_s24  ;;  %1426 = vmatmul.mubr.msk.f32.vlgmr.msra.gmra.mxu0 %vm433_vm9, %v1817_v6 }
 0x105   :  { %932 = vrot.lane.b32.xlu0 %v1886_v48, %s1467_s24  ;;  %v408_v5 = vsel %vm400_vm1, %v1602_v12, %v154_v63  ;;  %v407_v10 = vsel %vm400_vm1, %v1598_v11, %v153_v60  ;;  %1162 = vmatprep.mubr.f32.mxu0 %v1471_v9 }
 0x106   :  { %696 = vmatprep.subr.mxu1 %v408_v5  ;;  %v1029_v50 = vpop.permute.xlu1 %1028 }
 0x107   :  { %697 = vmatpush1.msra.mxu1 %v407_v10  ;;  %v1027_v16 = vpop.permute.xlu0 %1026 }
 0x108   :  { %v1043_v54 = vsel %vm391_vm0, %v1027_v16, %v1029_v50  ;;  %938 = vrot.lane.b32.xlu1 %v1937_v18, %s1467_s24  ;;  %1429 = vmatmul.mubr.msk.f32.vlgmr.msra.gmra.mxu1 %vm433_vm9, %v1817_v6 }
 0x109   :  { %936 = vrot.lane.b32.xlu0 %v1899_v27, %s1467_s24  ;;  %1430 = vmatprep.subr.msk.mxu0 %vm400_vm1, %v1043_v54 }
 0x10a   :  { %v1995_v11 = vpop.permute.xlu1 %1032  ;;  %1233 = vmatprep.mubr.f32.mxu1 %v1471_v9 }
 0x10b   :  { %v1031_v12 = vpop.permute.xlu0 %1030 }
 0x10c   :  { %v1044_v55 = vsel %vm391_vm0, %v1029_v50, %v1031_v12  ;;  %v1045_v56 = vsel %vm391_vm0, %v1031_v12, %v1995_v11  ;;  %832 = vrot.lane.b32.xlu1 %v1893_v49, %s1468_s25 }
 0x10d   :  { %830 = vrot.lane.b32.xlu0 %v1886_v48, %s1468_s25  ;;  %1433 = vmatprep.subr.msk.mxu1 %vm400_vm1, %v1045_v56 }
 0x10e   :  { %1434 = vmatpush1.msk.msra.mxu1 %vm400_vm1, %v1044_v55  ;;  %v961_v58 = vpop.permute.xlu1 %960 }
 0x10f   :  { %v959_v59 = vpop.permute.xlu0 %958 }
 0x110   :  { %836 = vrot.lane.b32.xlu1 %v1903_v51, %s1468_s25  ;;  %v975_v20 = vsel %vm321_vm2, %v959_v59, %v961_v58 }
 0x111   :  { %834 = vrot.lane.b32.xlu0 %v1899_v27, %s1468_s25 }
 0x112   :  { %v2011_v61 = vpop.permute.xlu1 %964 }
 0x113   :  { %v963_v62 = vpop.permute.xlu0 %962 }
 0x114   :  { %866 = vrot.lane.b32.xlu1 %v1930_v0, %s1469_s26  ;;  %v976_v7 = vsel %vm321_vm2, %v961_v58, %v963_v62  ;;  %v977_v8 = vsel %vm321_vm2, %v963_v62, %v2011_v61 }
 0x115   :  { %864 = vrot.lane.b32.xlu0 %v1886_v48, %s1469_s26 }
 0x116   :  { %v995_v4 = vpop.permute.xlu1 %994 }
 0x117   :  { %v993_v57 = vpop.permute.xlu0 %992 }
 0x118   :  { %870 = vrot.lane.b32.xlu1 %v1937_v18, %s1469_s26  ;;  %v1009_v17 = vsel %vm356_vm3, %v993_v57, %v995_v4 }
 0x119   :  { %868 = vrot.lane.b32.xlu0 %v1899_v27, %s1469_s26 }
 0x11a   :  { %v2021_v51 = vpop.permute.xlu1 %998 }
 0x11b   :  { %v997_v3 = vpop.permute.xlu0 %996 }
 0x11c   :  { %v1010_v13 = vsel %vm356_vm3, %v995_v4, %v997_v3  ;;  %v1011_v14 = vsel %vm356_vm3, %v997_v3, %v2021_v51  ;;  %798 = vrot.lane.b32.xlu1 %v1930_v0, %s1470_s27  ;;  %v1075_v0 = vsel %vm400_vm1, %v975_v20, %v1009_v17 }
 0x11d   :  { %796 = vrot.lane.b32.xlu0 %v1886_v48, %s1470_s27  ;;  %v1077_v15 = vsel %vm400_vm1, %v977_v8, %v1011_v14  ;;  %v1076_v1 = vsel %vm400_vm1, %v976_v7, %v1010_v13 }
 0x11e   :  { %1193 = vmatprep.subr.mxu1 %v1077_v15  ;;  %v957_v2 = vpop.permute.xlu1 %956 }
 0x11f   :  { %1194 = vmatpush1.msra.mxu1 %v1076_v1  ;;  %v1025_v19 = vpop.permute.xlu0 %1024  ;;  %v974_v24 = vsel %vm321_vm2, %v957_v2, %v959_v59 }
 0x120   :  { %v1042_v21 = vsel %vm391_vm0, %v1025_v19, %v1027_v16  ;;  %802 = vrot.lane.b32.xlu1 %v1937_v18, %s1470_s27 }
 0x121   :  { %800 = vrot.lane.b32.xlu0 %v1899_v27, %s1470_s27  ;;  %1431 = vmatpush1.msk.msra.mxu0 %vm400_vm1, %v1042_v21 }
 0x122   :  { %1122 = vmatprep.subr.mxu0 %v1075_v0  ;;  %v891_v22 = vpop.permute.xlu1 %890 }
 0x123   :  { %v991_v23 = vpop.permute.xlu0 %990 }
 0x124   :  { %v1008_v25 = vsel %vm356_vm3, %v991_v23, %v993_v57 }
 0x125   :  { %v1074_v28 = vsel %vm400_vm1, %v974_v24, %v1008_v25 }
 0x126   :  { %1123 = vmatpush1.msra.mxu0 %v1074_v28  ;;  %v895_v31 = vpop.permute.xlu1 %894 }
 0x127   :  { %v893_v32 = vpop.permute.xlu0 %892 }
 0x128   :  { %v907_v34 = vsel %vm251_vm4, %v891_v22, %v893_v32  ;;  %v908_v42 = vsel %vm251_vm4, %v893_v32, %v895_v31 }
 0x12a   :  { %v925_v18 = vpop.permute.xlu1 %924 }
 0x12b   :  { %v2047_v29 = vpop.permute.xlu0 %896 }
 0x12c   :  { %v909_v39 = vsel %vm251_vm4, %v895_v31, %v2047_v29 }
 0x12e   :  { %v929_v33 = vpop.permute.xlu1 %928 }
 0x12f   :  { %v927_v38 = vpop.permute.xlu0 %926 }
 0x130   :  { %v941_v35 = vsel %vm286_vm5, %v925_v18, %v927_v38  ;;  %v942_v37 = vsel %vm286_vm5, %v927_v38, %v929_v33 }
 0x131   :  { %v1067_v36 = vsel %vm400_vm1, %v907_v34, %v941_v35  ;;  %v1068_v47 = vsel %vm400_vm1, %v908_v42, %v942_v37 }
 0x132   :  { %1124 = vmatprep.subr.mxu0 %v1067_v36  ;;  %v889_v26 = vpop.permute.xlu1 %888 }
 0x133   :  { %v2053_v30 = vpop.permute.xlu0 %930  ;;  %v906_v63 = vsel %vm251_vm4, %v889_v26, %v891_v22 }
 0x134   :  { %v943_v40 = vsel %vm286_vm5, %v929_v33, %v2053_v30 }
 0x135   :  { %v1069_v43 = vsel %vm400_vm1, %v909_v39, %v943_v40 }
 0x136   :  { %1195 = vmatprep.subr.mxu1 %v1069_v43  ;;  %v823_v44 = vpop.permute.xlu1 %822 }
 0x137   :  { %1196 = vmatpush1.msra.mxu1 %v1068_v47  ;;  %v923_v60 = vpop.permute.xlu0 %922 }
 0x138   :  { %v940_v5 = vsel %vm286_vm5, %v923_v60, %v925_v18 }
 0x139   :  { %v1066_v10 = vsel %vm400_vm1, %v906_v63, %v940_v5 }
 0x13a   :  { %1125 = vmatpush1.msra.mxu0 %v1066_v10  ;;  %v827_v50 = vpop.permute.xlu1 %826 }
 0x13b   :  { %v825_v16 = vpop.permute.xlu0 %824 }
 0x13c   :  { %v839_v58 = vsel %vm181_vm6, %v823_v44, %v825_v16  ;;  %v840_v13 = vsel %vm181_vm6, %v825_v16, %v827_v50 }
 0x13e   :  { %v857_v54 = vpop.permute.xlu1 %856 }
 0x13f   :  { %v2065_v12 = vpop.permute.xlu0 %828 }
 0x140   :  { %v841_v7 = vsel %vm181_vm6, %v827_v50, %v2065_v12 }
 0x142   :  { %v861_v55 = vpop.permute.xlu1 %860 }
 0x143   :  { %v859_v56 = vpop.permute.xlu0 %858 }
 0x144   :  { %v873_v59 = vsel %vm216_vm7, %v857_v54, %v859_v56  ;;  %v874_v57 = vsel %vm216_vm7, %v859_v56, %v861_v55 }
 0x145   :  { %v1059_v62 = vsel %vm400_vm1, %v839_v58, %v873_v59  ;;  %v1060_v1 = vsel %vm400_vm1, %v840_v13, %v874_v57 }
 0x146   :  { %1126 = vmatprep.subr.mxu0 %v1059_v62  ;;  %v821_v4 = vpop.permute.xlu1 %820 }
 0x147   :  { %v2071_v3 = vpop.permute.xlu0 %862  ;;  %v838_v2 = vsel %vm181_vm6, %v821_v4, %v823_v44 }
 0x148   :  { %v875_v8 = vsel %vm216_vm7, %v861_v55, %v2071_v3 }
 0x149   :  { %v1061_v14 = vsel %vm400_vm1, %v841_v7, %v875_v8 }
 0x14a   :  { %1197 = vmatprep.subr.mxu1 %v1061_v14  ;;  %v789_v15 = vpop.permute.xlu1 %788 }
 0x14b   :  { %1198 = vmatpush1.msra.mxu1 %v1060_v1  ;;  %v855_v17 = vpop.permute.xlu0 %854 }
 0x14c   :  { %v872_v19 = vsel %vm216_vm7, %v855_v17, %v857_v54 }
 0x14d   :  { %v1058_v20 = vsel %vm400_vm1, %v838_v2, %v872_v19 }
 0x14e   :  { %1127 = vmatpush1.msra.mxu0 %v1058_v20  ;;  %v793_v21 = vpop.permute.xlu1 %792 }
 0x14f   :  { %v791_v0 = vpop.permute.xlu0 %790 }
 0x150   :  { %v805_v22 = vsel %vm146_vm8, %v789_v15, %v791_v0  ;;  %v806_v25 = vsel %vm146_vm8, %v791_v0, %v793_v21 }
 0x151   :  { %v1051_v23 = vsel %vm400_vm1, %v1698_v46, %v805_v22  ;;  %v1052_v38 = vsel %vm400_vm1, %v1694_v45, %v806_v25 }
 0x152   :  { %1128 = vmatprep.subr.mxu0 %v1051_v23  ;;  %v787_v24 = vpop.permute.xlu1 %786 }
 0x153   :  { %v804_v28 = vsel %vm146_vm8, %v787_v24, %v789_v15  ;;  %v2088_v31 = vpop.permute.xlu0 %794 }
 0x154   :  { %v807_v32 = vsel %vm146_vm8, %v793_v21, %v2088_v31  ;;  %v1050_v18 = vsel %vm400_vm1, %v1682_v41, %v804_v28 }
 0x155   :  { %1129 = vmatpush1.msra.mxu0 %v1050_v18  ;;  %v1053_v33 = vsel %vm400_vm1, %v1707_v52, %v807_v32 }
 0x156   :  { %1199 = vmatprep.subr.mxu1 %v1053_v33  ;;  %v1037_v46 = vpop.permute.xlu1 %1036  ;;  %1432 = vmatmul.mubr.msk.f32.vlgmr.msra.gmra.mxu0 %vm433_vm9, %v1817_v6 }
 0x157   :  { %1200 = vmatpush1.msra.mxu1 %v1052_v38  ;;  %v1035_v34 = vpop.permute.xlu0 %1034  ;;  %1304 = vmatprep.mubr.f32.mxu0 %v1471_v9 }
 0x158   :  { %v1046_v35 = vsel %vm391_vm0, %v1995_v11, %v1035_v34  ;;  %v1047_v41 = vsel %vm391_vm0, %v1035_v34, %v1037_v46  ;;  %1435 = vmatmul.mubr.msk.f32.vlgmr.msra.gmra.mxu1 %vm433_vm9, %v1817_v6 }
 0x159   :  { %1436 = vmatprep.subr.msk.mxu0 %vm400_vm1, %v1047_v41  ;;  %1375 = vmatprep.mubr.f32.mxu1 %v1471_v9 }
 0x15a   :  { %1437 = vmatpush1.msk.msra.mxu0 %vm400_vm1, %v1046_v35  ;;  %v1041_v45 = vpop.permute.xlu1 %1040 }
 0x15b   :  { %v1039_v52 = vpop.permute.xlu0 %1038 }
 0x15c   :  { %v1048_v36 = vsel %vm391_vm0, %v1037_v46, %v1039_v52  ;;  %v1049_v26 = vsel %vm391_vm0, %v1039_v52, %v1041_v45 }
 0x15d   :  { %1439 = vmatprep.subr.msk.mxu1 %vm400_vm1, %v1049_v26 }
 0x15e   :  { %1440 = vmatpush1.msk.msra.mxu1 %vm400_vm1, %v1048_v36  ;;  %v969_v11 = vpop.permute.xlu1 %968 }
 0x15f   :  { %v967_v37 = vpop.permute.xlu0 %966 }
 0x160   :  { %v978_v9 = vsel %vm321_vm2, %v2011_v61, %v967_v37  ;;  %v979_v44 = vsel %vm321_vm2, %v967_v37, %v969_v11 }
 0x162   :  { %v973_v39 = vpop.permute.xlu1 %972 }
 0x163   :  { %v971_v40 = vpop.permute.xlu0 %970 }
 0x164   :  { %v980_v16 = vsel %vm321_vm2, %v969_v11, %v971_v40  ;;  %v981_v54 = vsel %vm321_vm2, %v971_v40, %v973_v39 }
 0x166   :  { %v1003_v42 = vpop.permute.xlu1 %1002 }
 0x167   :  { %v1001_v43 = vpop.permute.xlu0 %1000 }
 0x168   :  { %v1012_v47 = vsel %vm356_vm3, %v2021_v51, %v1001_v43  ;;  %v1013_v60 = vsel %vm356_vm3, %v1001_v43, %v1003_v42 }
 0x169   :  { %v1079_v63 = vsel %vm400_vm1, %v979_v44, %v1013_v60  ;;  %v1078_v5 = vsel %vm400_vm1, %v978_v9, %v1012_v47 }
 0x16a   :  { %1264 = vmatprep.subr.mxu0 %v1079_v63  ;;  %v1007_v10 = vpop.permute.xlu1 %1006 }
 0x16b   :  { %1265 = vmatpush1.msra.mxu0 %v1078_v5  ;;  %v1005_v50 = vpop.permute.xlu0 %1004 }
 0x16c   :  { %v1014_v61 = vsel %vm356_vm3, %v1003_v42, %v1005_v50  ;;  %v1015_v55 = vsel %vm356_vm3, %v1005_v50, %v1007_v10 }
 0x16d   :  { %v1081_v51 = vsel %vm400_vm1, %v981_v54, %v1015_v55  ;;  %v1080_v56 = vsel %vm400_vm1, %v980_v16, %v1014_v61 }
 0x16e   :  { %1335 = vmatprep.subr.mxu1 %v1081_v51  ;;  %v901_v58 = vpop.permute.xlu1 %900 }
 0x16f   :  { %1336 = vmatpush1.msra.mxu1 %v1080_v56  ;;  %v899_v59 = vpop.permute.xlu0 %898 }
 0x170   :  { %v910_v8 = vsel %vm251_vm4, %v2047_v29, %v899_v59  ;;  %v911_v13 = vsel %vm251_vm4, %v899_v59, %v901_v58 }
 0x172   :  { %v905_v62 = vpop.permute.xlu1 %904 }
 0x173   :  { %v903_v4 = vpop.permute.xlu0 %902 }
 0x174   :  { %v912_v20 = vsel %vm251_vm4, %v901_v58, %v903_v4  ;;  %v913_v21 = vsel %vm251_vm4, %v903_v4, %v905_v62 }
 0x176   :  { %v935_v57 = vpop.permute.xlu1 %934 }
 0x177   :  { %v933_v7 = vpop.permute.xlu0 %932 }
 0x178   :  { %v944_v14 = vsel %vm286_vm5, %v2053_v30, %v933_v7  ;;  %v945_v15 = vsel %vm286_vm5, %v933_v7, %v935_v57 }
 0x179   :  { %v1071_v1 = vsel %vm400_vm1, %v911_v13, %v945_v15  ;;  %v1070_v17 = vsel %vm400_vm1, %v910_v8, %v944_v14 }
 0x17a   :  { %1266 = vmatprep.subr.mxu0 %v1071_v1  ;;  %v939_v2 = vpop.permute.xlu1 %938 }
 0x17b   :  { %1267 = vmatpush1.msra.mxu0 %v1070_v17  ;;  %v937_v19 = vpop.permute.xlu0 %936 }
 0x17c   :  { %v946_v29 = vsel %vm286_vm5, %v935_v57, %v937_v19  ;;  %v947_v0 = vsel %vm286_vm5, %v937_v19, %v939_v2 }
 0x17d   :  { %v1073_v30 = vsel %vm400_vm1, %v913_v21, %v947_v0  ;;  %v1072_v22 = vsel %vm400_vm1, %v912_v20, %v946_v29 }
 0x17e   :  { %1337 = vmatprep.subr.mxu1 %v1073_v30  ;;  %v833_v23 = vpop.permute.xlu1 %832 }
 0x17f   :  { %1338 = vmatpush1.msra.mxu1 %v1072_v22  ;;  %v831_v24 = vpop.permute.xlu0 %830 }
 0x180   :  { %v842_v46 = vsel %vm181_vm6, %v2065_v12, %v831_v24  ;;  %v843_v38 = vsel %vm181_vm6, %v831_v24, %v833_v23 }
 0x182   :  { %v837_v25 = vpop.permute.xlu1 %836 }
 0x183   :  { %v835_v28 = vpop.permute.xlu0 %834 }
 0x184   :  { %v844_v12 = vsel %vm181_vm6, %v833_v23, %v835_v28 }
 0x186   :  { %v867_v32 = vpop.permute.xlu1 %866  ;;  %v519_v18 = vpop.f32.mrf.mxu0 }
 0x187   :  { %v865_v33 = vpop.permute.xlu0 %864 }
 0x188   :  { %v876_v34 = vsel %vm216_vm7, %v2071_v3, %v865_v33  ;;  %v877_v35 = vsel %vm216_vm7, %v865_v33, %v867_v32  ;;  %v521_v41 = vpop.f32.mrf.mxu0  ;;  %v845_v3 = vsel %vm181_vm6, %v835_v28, %v837_v25 }
 0x189   :  { %v1063_v45 = vsel %vm400_vm1, %v843_v38, %v877_v35  ;;  %v1062_v52 = vsel %vm400_vm1, %v842_v46, %v876_v34  ;;  %v745_v36 = vcombine.low %v519_v18, %v521_v41 }
 0x18a   :  { %1268 = vmatprep.subr.mxu0 %v1063_v45  ;;  %v871_v26 = vpop.permute.xlu1 %870  ;;  %v590_v11 = vpop.f32.mrf.mxu1 }
 0x18b   :  { %1269 = vmatpush1.msra.mxu0 %v1062_v52  ;;  %v869_v37 = vpop.permute.xlu0 %868  ;;  %753 = vst [vmem:[%s2199_s3] sm:$0xff] %v745_v36 }
 0x18c   :  { %v878_v39 = vsel %vm216_vm7, %v867_v32, %v869_v37  ;;  %v879_v40 = vsel %vm216_vm7, %v869_v37, %v871_v26  ;;  %v592_v42 = vpop.f32.mrf.mxu1 }
 0x18d   :  { %v1065_v43 = vsel %vm400_vm1, %v845_v3, %v879_v40  ;;  %v1064_v9 = vsel %vm400_vm1, %v844_v12, %v878_v39  ;;  %v746_v44 = vcombine.low %v590_v11, %v592_v42 }
 0x18e   :  { %1339 = vmatprep.subr.mxu1 %v1065_v43  ;;  %v799_v47 = vpop.permute.xlu1 %798 }
 0x18f   :  { %1340 = vmatpush1.msra.mxu1 %v1064_v9  ;;  %v797_v60 = vpop.permute.xlu0 %796  ;;  %754 = vst [vmem:[%s2199_s3 + $0x8] sm:$0xff] %v746_v44 }
 0x190   :  { %v808_v63 = vsel %vm146_vm8, %v2088_v31, %v797_v60  ;;  %v809_v5 = vsel %vm146_vm8, %v797_v60, %v799_v47 }
 0x191   :  { %v1055_v10 = vsel %vm400_vm1, %v1886_v48, %v809_v5  ;;  %v1054_v50 = vsel %vm400_vm1, %v1714_v53, %v808_v63 }
 0x192   :  { %1270 = vmatprep.subr.mxu0 %v1055_v10  ;;  %v803_v16 = vpop.permute.xlu1 %802 }
 0x193   :  { %1271 = vmatpush1.msra.mxu0 %v1054_v50  ;;  %v801_v54 = vpop.permute.xlu0 %800 }
 0x194   :  { %v810_v61 = vsel %vm146_vm8, %v799_v47, %v801_v54  ;;  %v811_v55 = vsel %vm146_vm8, %v801_v54, %v803_v16  ;;  %1438 = vmatmul.mubr.msk.f32.vlgmr.msra.gmra.mxu0 %vm433_vm9, %v1817_v6 }
 0x195   :  { %v1057_v31 = vsel %vm400_vm1, %v1899_v27, %v811_v55  ;;  %v1056_v48 = vsel %vm400_vm1, %v1893_v49, %v810_v61 }
 0x196   :  { %1341 = vmatprep.subr.mxu1 %v1057_v31 }
 0x197   :  { %1342 = vmatpush1.msra.mxu1 %v1056_v48 }
 0x198   :  { %1441 = vmatmul.mubr.msk.f32.vlgmr.msra.gmra.mxu1 %vm433_vm9, %v1817_v6 }
 0x1c4   :  { %v661_v53 = vpop.f32.mrf.mxu0 }
 0x1c6   :  { %v663_v51 = vpop.f32.mrf.mxu0 }
 0x1c7   :  { %v747_v56 = vcombine.low %v661_v53, %v663_v51 }
 0x1c8   :  { %v732_v58 = vpop.f32.mrf.mxu1 }
 0x1c9   :  { %755 = vst [vmem:[%s2199_s3 + $0x10] sm:$0xff] %v747_v56 }
 0x1ca   :  { %v734_v59 = vpop.f32.mrf.mxu1 }
 0x1cb   :  { %v748_v62 = vcombine.low %v732_v58, %v734_v59 }
 0x1cd   :  { %756 = vst [vmem:[%s2199_s3 + $0x18] sm:$0xff] %v748_v62 }
 0x216   :  { %v1164_v49 = vpop.f32.mrf.mxu0 }
 0x218   :  { %v1235_v27 = vpop.f32.mrf.mxu1  ;;  %v1166_v4 = vpop.f32.mrf.mxu0 }
 0x219   :  { %v1390_v57 = vcombine.low %v1164_v49, %v1166_v4 }
 0x21a   :  { %v1237_v7 = vpop.f32.mrf.mxu1 }
 0x21b   :  { %1442 = vst [vmem:[%s2199_s3 + $0x20] sm:$0xff] %v1390_v57  ;;  %v1391_v6 = vcombine.low %v1235_v27, %v1237_v7 }
 0x21d   :  { %1443 = vst [vmem:[%s2199_s3 + $0x28] sm:$0xff] %v1391_v6 }
 0x254   :  { %v1306_v8 = vpop.f32.mrf.mxu0 }
 0x256   :  { %v1308_v13 = vpop.f32.mrf.mxu0 }
 0x257   :  { %v1392_v14 = vcombine.low %v1306_v8, %v1308_v13 }
 0x258   :  { %v1377_v15 = vpop.f32.mrf.mxu1 }
 0x259   :  { %1444 = vst [vmem:[%s2199_s3 + $0x30] sm:$0xff] %v1392_v14 }
 0x25a   :  { %v1379_v1 = vpop.f32.mrf.mxu1 }
 0x25b   :  { %v1393_v17 = vcombine.low %v1377_v15, %v1379_v1 }
 0x25d   :  { %1445 = vst [vmem:[%s2199_s3 + $0x38] sm:$0xff] %v1393_v17 }

// kernel: scale_conv_forward.17
= control target key start
LH: loop header
LB: loop body
LE: loop exit
PB: predicated region body
PF: predicated region fallthrough
CT: control target
= control target key end

     0   :  { %v123_v4 = vmov 0.25881904   ;;  %v124_v8 = vmov -0.9659258   ;;  %s244_s0 = inlined_call_operand.vmem [shape: f32[8,256], index: 0, kind: input, shape index: {}]   ;;  %s245_s1 = inlined_call_operand.vmem [shape: f32[8,256], index: 1, kind: input, shape index: {}]   ;;  %s246_s2 = inlined_call_operand.vmem [shape: f32[8,256], index: 2, kind: input, shape index: {}]   ;;  %s247_s3 = inlined_call_operand.vmem [shape: f32[8,256], index: 3, kind: input, shape index: {}]   ;;  %s248_s4 = inlined_call_operand.vmem [shape: f32[8,256], index: 4, kind: input, shape index: {}]   ;;  %s249_s5 = inlined_call_operand.vmem [shape: f32[8,256], index: 5, kind: input, shape index: {}]   ;;  %s250_s6 = inlined_call_operand.vmem [shape: f32[8,256], index: 6, kind: input, shape index: {}]   ;;  %s251_s7 = inlined_call_operand.vmem [shape: f32[8,256], index: 7, kind: input, shape index: {}]   ;;  %s252_s8 = inlined_call_operand.vmem [shape: f32[8,256], index: 8, kind: output, shape index: {0}]   ;;  %s253_s9 = inlined_call_operand.vmem [shape: f32[8,256], index: 9, kind: output, shape index: {1}]  }
   0x1   :  { %v31_v0 = vld [vmem:[%s244_s0] sm:$0xff]  ;;  %v32_v7 = vld [vmem:[%s244_s0 + $0x8] sm:$0xff] }
   0x2   :  { %v33_v1 = vld [vmem:[%s245_s1] sm:$0xff]  ;;  %v34_v10 = vld [vmem:[%s245_s1 + $0x8] sm:$0xff] }
   0x3   :  { %v43_v2 = vld [vmem:[%s246_s2] sm:$0xff]  ;;  %vm35_vm0 = vcmp.gt.f32.partialorder %v33_v1, %v31_v0  ;;  %v44_v11 = vld [vmem:[%s246_s2 + $0x8] sm:$0xff]  ;;  %vm36_vm2 = vcmp.gt.f32.partialorder %v34_v10, %v32_v7 }
   0x4   :  { %v37_v3 = vsel %vm35_vm0, %v33_v1, %v31_v0  ;;  %v39_v5 = vsel %vm35_vm0, 0.5, %v123_v4  ;;  %v53_v6 = vld [vmem:[%s247_s3] sm:$0xff]  ;;  %v41_v9 = vsel %vm35_vm0, -0.8660254, %v124_v8  ;;  %v38_v15 = vsel %vm36_vm2, %v34_v10, %v32_v7  ;;  %v54_v17 = vld [vmem:[%s247_s3 + $0x8] sm:$0xff] }
   0x5   :  { %vm45_vm1 = vcmp.gt.f32.partialorder %v43_v2, %v37_v3  ;;  %v63_v14 = vld [vmem:[%s248_s4] sm:$0xff]  ;;  %v40_v16 = vsel %vm36_vm2, 0.5, %v123_v4  ;;  %vm46_vm4 = vcmp.gt.f32.partialorder %v44_v11, %v38_v15  ;;  %v64_v25 = vld [vmem:[%s248_s4 + $0x8] sm:$0xff]  ;;  %v42_v26 = vsel %vm36_vm2, -0.8660254, %v124_v8 }
   0x6   :  { %v47_v12 = vsel %vm45_vm1, %v43_v2, %v37_v3  ;;  %v49_v13 = vsel %vm45_vm1, 0.70710677, %v39_v5  ;;  %v51_v18 = vsel %vm45_vm1, -0.70710677, %v41_v9  ;;  %v73_v21 = vld [vmem:[%s249_s5] sm:$0xff]  ;;  %v48_v23 = vsel %vm46_vm4, %v44_v11, %v38_v15  ;;  %v74_v33 = vld [vmem:[%s249_s5 + $0x8] sm:$0xff] }
   0x7   :  { %vm55_vm3 = vcmp.gt.f32.partialorder %v53_v6, %v47_v12  ;;  %v50_v24 = vsel %vm46_vm4, 0.70710677, %v40_v16  ;;  %v83_v29 = vld [vmem:[%s250_s6] sm:$0xff]  ;;  %vm56_vm6 = vcmp.gt.f32.partialorder %v54_v17, %v48_v23  ;;  %v52_v34 = vsel %vm46_vm4, -0.70710677, %v42_v26  ;;  %v84_v41 = vld [vmem:[%s250_s6 + $0x8] sm:$0xff] }
   0x8   :  { %v57_v19 = vsel %vm55_vm3, %v53_v6, %v47_v12  ;;  %v59_v20 = vsel %vm55_vm3, 0.8660254, %v49_v13  ;;  %v61_v22 = vsel %vm55_vm3, -0.5, %v51_v18  ;;  %v58_v31 = vsel %vm56_vm6, %v54_v17, %v48_v23  ;;  %v93_v37 = vld [vmem:[%s251_s7] sm:$0xff]  ;;  %v94_v48 = vld [vmem:[%s251_s7 + $0x8] sm:$0xff] }
   0x9   :  { %vm65_vm5 = vcmp.gt.f32.partialorder %v63_v14, %v57_v19  ;;  %v60_v32 = vsel %vm56_vm6, 0.8660254, %v50_v24  ;;  %vm66_vm8 = vcmp.gt.f32.partialorder %v64_v25, %v58_v31  ;;  %v62_v42 = vsel %vm56_vm6, -0.5, %v52_v34 }
   0xa   :  { %v67_v27 = vsel %vm65_vm5, %v63_v14, %v57_v19  ;;  %v69_v28 = vsel %vm65_vm5, 0.9659258, %v59_v20  ;;  %v71_v30 = vsel %vm65_vm5, -0.25881904, %v61_v22  ;;  %v68_v39 = vsel %vm66_vm8, %v64_v25, %v58_v31 }
   0xb   :  { %vm75_vm7 = vcmp.gt.f32.partialorder %v73_v21, %v67_v27  ;;  %v70_v40 = vsel %vm66_vm8, 0.9659258, %v60_v32  ;;  %vm76_vm10 = vcmp.gt.f32.partialorder %v74_v33, %v68_v39  ;;  %v72_v49 = vsel %vm66_vm8, -0.25881904, %v62_v42 }
   0xc   :  { %v77_v35 = vsel %vm75_vm7, %v73_v21, %v67_v27  ;;  %v79_v36 = vsel %vm75_vm7, 1.0, %v69_v28  ;;  %v81_v38 = vsel %vm75_vm7, 0.0, %v71_v30  ;;  %v78_v46 = vsel %vm76_vm10, %v74_v33, %v68_v39 }
   0xd   :  { %vm85_vm9 = vcmp.gt.f32.partialorder %v83_v29, %v77_v35  ;;  %v80_v47 = vsel %vm76_vm10, 1.0, %v70_v40  ;;  %vm86_vm12 = vcmp.gt.f32.partialorder %v84_v41, %v78_v46  ;;  %v82_v56 = vsel %vm76_vm10, 0.0, %v72_v49 }
   0xe   :  { %v87_v43 = vsel %vm85_vm9, %v83_v29, %v77_v35  ;;  %v89_v44 = vsel %vm85_vm9, 0.9659258, %v79_v36  ;;  %v91_v45 = vsel %vm85_vm9, 0.25881904, %v81_v38  ;;  %v88_v54 = vsel %vm86_vm12, %v84_v41, %v78_v46 }
   0xf   :  { %vm95_vm11 = vcmp.gt.f32.partialorder %v93_v37, %v87_v43  ;;  %v90_v55 = vsel %vm86_vm12, 0.9659258, %v80_v47  ;;  %vm96_vm13 = vcmp.gt.f32.partialorder %v94_v48, %v88_v54  ;;  %v92_v57 = vsel %vm86_vm12, 0.25881904, %v82_v56 }
  0x10   :  { %v97_v50 = vsel %vm95_vm11, %v93_v37, %v87_v43  ;;  %v99_v51 = vsel %vm95_vm11, 0.8660254, %v89_v44  ;;  %v101_v52 = vsel %vm95_vm11, 0.5, %v91_v45  ;;  %v98_v59 = vsel %vm96_vm13, %v94_v48, %v88_v54 }
  0x11   :  { %v103_v53 = vmax.f32 %v97_v50, 0.0  ;;  %v100_v60 = vsel %vm96_vm13, 0.8660254, %v90_v55  ;;  %v104_v62 = vmax.f32 %v98_v59, 0.0  ;;  %v102_v63 = vsel %vm96_vm13, 0.5, %v92_v57 }
  0x13   :  { %v105_v58 = vmul.f32 %v103_v53, %v99_v51  ;;  %v109_v61 = vmul.f32 %v103_v53, %v101_v52  ;;  %v106_v0 = vmul.f32 %v104_v62, %v100_v60  ;;  %v110_v1 = vmul.f32 %v104_v62, %v102_v63 }
  0x15   :  { %107 = vst [vmem:[%s252_s8] sm:$0xff] %v105_v58  ;;  %111 = vst [vmem:[%s253_s9] sm:$0xff] %v109_v61 }
  0x16   :  { %108 = vst [vmem:[%s252_s8 + $0x8] sm:$0xff] %v106_v0  ;;  %112 = vst [vmem:[%s253_s9 + $0x8] sm:$0xff] %v110_v1 }

</bundles_post_ra>
